<compile_context>
chip_gen: v5e
topology: v5e:2x2
jax: 0.10.0
libtpu: 0.0.40
codegen_flags: <defaults>
</compile_context>

<pallas_src>
import functools

import jax
import jax.numpy as jnp
from jax import lax
from jax.experimental import pallas as pl
from jax.experimental.pallas import tpu as pltpu


# ---------------------------------------------------------------------------
# Tuning knobs.
# ---------------------------------------------------------------------------
_SMALL_N_FALLBACK = 64            # below this many gathered rows, XLA gather wins
_ROW_TILE_CAP = 512               # rows gathered per grid step (sublane aligned)
_M_CHUNK = 256                    # table rows per one-hot MXU matmul chunk
_ONEHOT_MAX_ROWS = 8192           # above this the one-hot FLOPs stop paying off
_STREAM_WINDOW = 8                # in-flight per-row DMAs in the streaming gather
_STREAM_MAX_ROWS_PER_CALL = 1 << 16   # bounds scalar-prefetch SMEM footprint
_MIN_STREAM_ROW_BYTES = 256       # rows narrower than this are not worth row DMAs


def _round_up(x: int, m: int) -> int:
    return ((x + m - 1) // m) * m


def _row_tile(n_rows: int, dtype) -> int:
    # sublane multiple: 8 for f32, 16 for bf16, 32 for int8.
    sub = max(8, 32 // jnp.dtype(dtype).itemsize)
    return _round_up(min(_ROW_TILE_CAP, _round_up(n_rows, sub)), sub)


@functools.lru_cache(maxsize=None)
def _vmem_capacity_bytes() -> int:
    """Per-core VMEM capacity (generation aware); conservative default on failure."""
    try:
        cap = int(getattr(pltpu.get_tpu_info(), "vmem_capacity_bytes", 0))
        if cap > 0:
            return cap
    except Exception:
        pass
    return 64 << 20   # v7x per-TensorCore size; a safe lower bound everywhere.


def _resident_table_cap() -> int:
    # ~24 MiB on v7x (64 MiB VMEM), ~48 MiB on v5e/v6e (128 MiB VMEM).
    return (_vmem_capacity_bytes() * 3) // 8


def _vmem_limit_cap() -> int:
    # ~40 MiB on v7x, ~80 MiB on v5e/v6e.
    return (_vmem_capacity_bytes() * 5) // 8


def _onehot_vmem_limit(table_bytes: int, out_tile_bytes: int, idx_tile_bytes: int,
                       tile_rows: int, single_buffer: bool) -> int:
    table_bufs = 1 if single_buffer else 2
    work = 3 * tile_rows * _M_CHUNK * 4            # iota / compare / one-hot slabs
    need = (table_bufs * table_bytes + 3 * (out_tile_bytes + idx_tile_bytes)
            + work + (2 << 20))
    return int(min(max(need, 4 << 20), _vmem_limit_cap()))


def _stream_vmem_limit(tile_bytes: int) -> int:
    need = 4 * tile_bytes + (2 << 20)
    return int(min(max(need, 4 << 20), _vmem_limit_cap()))


# ---------------------------------------------------------------------------
# In-kernel vectorized gather: one-hot MXU matmul, chunked over table rows.
# ---------------------------------------------------------------------------
def _onehot_gather_accumulate(o_view, idx, table_ref, num_rows: int, out_dtype):
    """o_view[...] += one_hot(idx) @ table_ref, chunked over the table rows.

    Exact: each output row receives exactly one contribution 1.0 * table[row];
    every other chunk adds exactly 0 (so accumulating in out_dtype is bit-exact).
    `idx` is a (tile_rows, 1) int32 array, `o_view` a (tile_rows, D) ref view.
    """
    tile_rows = idx.shape[0]

    def chunk(start, size):
        col = lax.broadcasted_iota(jnp.int32, (tile_rows, size), 1) + start
        onehot = (col == idx).astype(table_ref.dtype)
        part = jnp.dot(onehot, table_ref[pl.ds(start, size), :],
                       preferred_element_type=jnp.float32)
        return part.astype(out_dtype)

    n_full = num_rows // _M_CHUNK
    rem = num_rows - n_full * _M_CHUNK

    if n_full > 0:
        if n_full <= 4:
            # Short, fixed trip-count: keep it statically visible to the scheduler.
            for c in range(n_full):
                o_view[...] += chunk(c * _M_CHUNK, _M_CHUNK)
        else:
            @pl.loop(0, n_full)
            def _(c):
                start = pl.multiple_of(c * _M_CHUNK, _M_CHUNK)
                o_view[...] += chunk(start, _M_CHUNK)
    if rem > 0:
        o_view[...] += chunk(n_full * _M_CHUNK, rem)


def _make_node_gather_kernel(num_rows: int):
    def kernel(idx_ref, table_ref, o_ref):
        o_ref[...] = jnp.zeros_like(o_ref)
        _onehot_gather_accumulate(o_ref, idx_ref[...], table_ref, num_rows,
                                  o_ref.dtype)
    return kernel


def _make_edge_gather_kernel(m_src: int, m_dst: int, d: int):
    def kernel(sidx_ref, didx_ref, src_ref, dst_ref, o_ref):
        o_ref[...] = jnp.zeros_like(o_ref)
        _onehot_gather_accumulate(o_ref.at[:, pl.ds(0, d)], sidx_ref[...],
                                  src_ref, m_src, o_ref.dtype)
        _onehot_gather_accumulate(o_ref.at[:, pl.ds(d, d)], didx_ref[...],
                                  dst_ref, m_dst, o_ref.dtype)
    return kernel


# ---------------------------------------------------------------------------
# Resident-table (VMEM) vectorized gather: out[i, :] = table[idx[i], :]
# ---------------------------------------------------------------------------
def _call_resident_gather(idx2d, table, tile: int, n_tiles: int, single_buffer: bool):
    m, d = table.shape
    itemsize = table.dtype.itemsize
    if single_buffer:
        # Constant block index -> the table is DMA'd once; single-buffer it so the
        # pipeline does not reserve a second (useless) copy of it in VMEM.
        table_spec = pl.BlockSpec((m, d), lambda i: (0, 0),
                                  pipeline_mode=pl.Buffered(1))
    else:
        table_spec = pl.BlockSpec((m, d), lambda i: (0, 0))
    return pl.pallas_call(
        _make_node_gather_kernel(m),
        out_shape=jax.ShapeDtypeStruct((idx2d.shape[0], d), table.dtype),
        grid=(n_tiles,),
        in_specs=[
            # Blocked VMEM indices: one (tile, 1) chunk per grid step.
            pl.BlockSpec((tile, 1), lambda i: (i, 0)),
            table_spec,
        ],
        # Lane/sublane-dense (tile, D) output slab per grid step.
        out_specs=pl.BlockSpec((tile, d), lambda i: (i, 0)),
        compiler_params=pltpu.CompilerParams(
            # Megacore only pays when there are >= 2 disjoint row tiles.
            dimension_semantics=("parallel",) if n_tiles >= 2 else ("arbitrary",),
            vmem_limit_bytes=_onehot_vmem_limit(
                m * d * itemsize, tile * d * itemsize, tile * 4, tile,
                single_buffer),
        ),
    )(idx2d, table)


def _gather_rows_resident(table: jax.Array, idx: jax.Array) -> jax.Array:
    m, d = table.shape
    n = idx.shape[0]
    tile = _row_tile(n, table.dtype)
    n_pad = _round_up(n, tile)
    idx2d = idx.reshape(n, 1)
    if n_pad != n:
        idx2d = jnp.pad(idx2d, ((0, n_pad - n), (0, 0)))   # pads gather row 0
    n_tiles = n_pad // tile
    try:
        out = _call_resident_gather(idx2d, table, tile, n_tiles, True)
    except Exception:
        # Older Pallas without single-buffer pipeline_mode support.
        out = _call_resident_gather(idx2d, table, tile, n_tiles, False)
    return out[:n] if n_pad != n else out


# ---------------------------------------------------------------------------
# Streaming HBM gather for tables that should NOT be made VMEM resident:
# table stays in HBM; per-row DMAs (windowed, several in flight) fetch only the
# rows that are actually needed (~N*D bytes of HBM traffic instead of M*D).
# ---------------------------------------------------------------------------
def _make_stream_gather_kernel(tile_rows: int, window: int):
    def kernel(idx_ref, table_hbm, o_ref, row_buf, sem):
        base = pl.program_id(0) * tile_rows

        def start_copy(r):
            row = idx_ref[base + r]
            pltpu.make_async_copy(table_hbm.at[pl.ds(row, 1), :],
                                  row_buf.at[pl.ds(r, 1), :],
                                  sem.at[r % window]).start()

        def wait_copy(r):
            pltpu.make_async_copy(table_hbm.at[pl.ds(0, 1), :],
                                  row_buf.at[pl.ds(r, 1), :],
                                  sem.at[r % window]).wait()

        @pl.loop(0, window)
        def _(r):                      # prime the window
            start_copy(r)

        @pl.loop(window, tile_rows)
        def _(r):                      # steady state: wait one, launch one
            wait_copy(r - window)
            start_copy(r)

        @pl.loop(tile_rows - window, tile_rows)
        def _(r):                      # drain
            wait_copy(r)

        o_ref[...] = row_buf[...]

    return kernel


def _gather_rows_streaming(table: jax.Array, idx: jax.Array) -> jax.Array:
    m, d = table.shape
    idx = jnp.clip(jnp.asarray(idx).astype(jnp.int32).reshape(-1), 0, m - 1)
    n = idx.shape[0]
    if n > _STREAM_MAX_ROWS_PER_CALL:
        # Bound the scalar-prefetch (SMEM) index footprint.
        parts = [_gather_rows_streaming(table, idx[s:s + _STREAM_MAX_ROWS_PER_CALL])
                 for s in range(0, n, _STREAM_MAX_ROWS_PER_CALL)]
        return jnp.concatenate(parts, axis=0)

    tile = _row_tile(n, table.dtype)
    n_pad = _round_up(n, tile)
    idx_flat = idx if n_pad == n else jnp.pad(idx, (0, n_pad - n))
    window = min(_STREAM_WINDOW, tile)
    tile_bytes = tile * d * table.dtype.itemsize

    out = pl.pallas_call(
        _make_stream_gather_kernel(tile, window),
        out_shape=jax.ShapeDtypeStruct((n_pad, d), table.dtype),
        grid_spec=pltpu.PrefetchScalarGridSpec(
            num_scalar_prefetch=1,                 # indices -> SMEM
            grid=(n_pad // tile,),
            in_specs=[pl.BlockSpec(memory_space=pl.ANY)],   # table stays in HBM
            out_specs=pl.BlockSpec((tile, d), lambda i, idx_r: (i, 0)),
            scratch_shapes=[pltpu.VMEM((tile, d), table.dtype),
                            pltpu.SemaphoreType.DMA((window,))]),
        compiler_params=pltpu.CompilerParams(
            dimension_semantics=("arbitrary",),
            vmem_limit_bytes=_stream_vmem_limit(tile_bytes)),
    )(idx_flat, table)
    return out[:n] if n_pad != n else out


# ---------------------------------------------------------------------------
# Public gather helpers.
# ---------------------------------------------------------------------------
def gather_rows(table: jax.Array, flat_idx: jax.Array) -> jax.Array:
    """Returns table[flat_idx] with shape (n, D). Indices are clamped to [0, M-1]."""
    m, d = table.shape
    idx = jnp.clip(jnp.asarray(flat_idx).astype(jnp.int32).reshape(-1), 0, m - 1)
    n = idx.shape[0]
    table_bytes = m * d * table.dtype.itemsize

    if n < _SMALL_N_FALLBACK:
        return jnp.take(table, idx, axis=0)

    resident_ok = (jnp.issubdtype(table.dtype, jnp.floating)
                   and m <= _ONEHOT_MAX_ROWS
                   and table_bytes <= _resident_table_cap())
    if resident_ok:
        return _gather_rows_resident(table, idx)
    if d * table.dtype.itemsize >= _MIN_STREAM_ROW_BYTES:
        return _gather_rows_streaming(table, idx)
    return jnp.take(table, idx, axis=0)


def gather_edge_pair(src_table: jax.Array, dst_table: jax.Array,
                     seed_lookup_idx: jax.Array) -> jax.Array:
    """out[i,0,:] = src[idx[i,0]], out[i,1,:] = dst[idx[i,1]] -> (n, 2, D)."""
    m_src, d = src_table.shape
    m_dst, d2 = dst_table.shape
    assert d == d2, "src/dst embedding dims must match"
    n = seed_lookup_idx.shape[0]
    src_idx = jnp.clip(seed_lookup_idx[:, 0].astype(jnp.int32), 0, m_src - 1)
    dst_idx = jnp.clip(seed_lookup_idx[:, 1].astype(jnp.int32), 0, m_dst - 1)

    tables_bytes = (m_src + m_dst) * d * src_table.dtype.itemsize
    fused_ok = (n >= _SMALL_N_FALLBACK
                and src_table.dtype == dst_table.dtype
                and jnp.issubdtype(src_table.dtype, jnp.floating)
                and max(m_src, m_dst) <= _ONEHOT_MAX_ROWS
                and tables_bytes <= _resident_table_cap()
                and d % 128 == 0)
    if not fused_ok:
        # Two separate gathers (each still picks its own Pallas fast path).
        return jnp.stack([gather_rows(src_table, src_idx),
                          gather_rows(dst_table, dst_idx)], axis=1)

    tile = _row_tile(n, src_table.dtype)
    n_pad = _round_up(n, tile)
    s2d = src_idx.reshape(n, 1)
    d2d = dst_idx.reshape(n, 1)
    if n_pad != n:
        s2d = jnp.pad(s2d, ((0, n_pad - n), (0, 0)))
        d2d = jnp.pad(d2d, ((0, n_pad - n), (0, 0)))
    n_tiles = n_pad // tile
    itemsize = src_table.dtype.itemsize
    out_tile_bytes = tile * 2 * d * itemsize

    def call(single_buffer: bool):
        if single_buffer:
            src_spec = pl.BlockSpec((m_src, d), lambda i: (0, 0),
                                    pipeline_mode=pl.Buffered(1))
            dst_spec = pl.BlockSpec((m_dst, d), lambda i: (0, 0),
                                    pipeline_mode=pl.Buffered(1))
        else:
            src_spec = pl.BlockSpec((m_src, d), lambda i: (0, 0))
            dst_spec = pl.BlockSpec((m_dst, d), lambda i: (0, 0))
        return pl.pallas_call(
            _make_edge_gather_kernel(m_src, m_dst, d),
            out_shape=jax.ShapeDtypeStruct((n_pad, 2 * d), src_table.dtype),
            grid=(n_tiles,),
            in_specs=[pl.BlockSpec((tile, 1), lambda i: (i, 0)),
                      pl.BlockSpec((tile, 1), lambda i: (i, 0)),
                      src_spec, dst_spec],
            out_specs=pl.BlockSpec((tile, 2 * d), lambda i: (i, 0)),
            compiler_params=pltpu.CompilerParams(
                dimension_semantics=("parallel",) if n_tiles >= 2 else ("arbitrary",),
                vmem_limit_bytes=_onehot_vmem_limit(
                    tables_bytes, out_tile_bytes, 2 * tile * 4, tile, single_buffer)),
        )(s2d, d2d, src_table, dst_table)

    try:
        out2d = call(True)
    except Exception:
        out2d = call(False)
    if n_pad != n:
        out2d = out2d[:n]
    return out2d.reshape(n, 2, d)


# ---------------------------------------------------------------------------
# Module wrapper (same forward semantics as the PyTorch SeedLookup).
# ---------------------------------------------------------------------------
class SeedLookup:
    """JAX/Pallas port of dbinfer SeedLookup."""

    def __init__(self, target_type: str):
        self.target_type = target_type

    def __call__(self, node_embed_dict, seed_lookup_idx):
        parts = self.target_type.split(':')
        if len(parts) != 3:
            node_embed = node_embed_dict[self.target_type]
            if seed_lookup_idx is None:
                return node_embed
            n, k = seed_lookup_idx.shape
            d = node_embed.shape[1]
            out = gather_rows(node_embed, seed_lookup_idx.reshape(-1))
            return out.reshape(n, k, d)
        else:
            src_type, _, dst_type = parts
            src_embed = node_embed_dict[src_type]
            dst_embed = node_embed_dict[dst_type]
            if seed_lookup_idx is None:
                # Matches torch.stack semantics: requires equal row counts.
                return jnp.stack([src_embed, dst_embed], axis=1)
            return gather_edge_pair(src_embed, dst_embed, seed_lookup_idx)


if __name__ == "__main__":
    key = jax.random.PRNGKey(0)
    (k_user, k_item, k_idx1, k_src, k_dst,
     k_small, k_sidx, k_stream) = jax.random.split(key, 8)

    D = 128
    M_USER, M_ITEM = 2048, 768     # 2048 -> 8 one-hot chunks (loop path); 768 -> 3
    N_NODE, K = 40, 16             # 640 gathered rows -> padded to 2 tiles of 512
    N_EDGE = 300                   # non-tile-multiple edge batch

    node_embed_dict = {
        "user": jax.random.normal(k_user, (M_USER, D), dtype=jnp.float32),
        "item": jax.random.normal(k_item, (M_ITEM, D), dtype=jnp.float32),
    }

    # ---- Case 1: node target type (resident one-hot MXU gather) ----
    seed_idx = jax.random.randint(k_idx1, (N_NODE, K), 0, M_USER, dtype=jnp.int32)
    lookup_node = SeedLookup("user")
    out_node = jax.block_until_ready(lookup_node(node_embed_dict, seed_idx))
    ref_node = node_embed_dict["user"][seed_idx]
    assert out_node.shape == (N_NODE, K, D)
    assert jnp.allclose(out_node, ref_node, atol=1e-6), "node-type gather mismatch"

    # ---- Case 2: edge target type "src:rel:dst" (fused dual-table gather) ----
    src_i = jax.random.randint(k_src, (N_EDGE, 1), 0, M_USER, dtype=jnp.int32)
    dst_i = jax.random.randint(k_dst, (N_EDGE, 1), 0, M_ITEM, dtype=jnp.int32)
    seed_idx_edge = jnp.concatenate([src_i, dst_i], axis=1)   # (N_EDGE, 2)
    lookup_edge = SeedLookup("user:click:item")
    out_edge = jax.block_until_ready(lookup_edge(node_embed_dict, seed_idx_edge))
    ref_edge = jnp.stack(
        [node_embed_dict["user"][seed_idx_edge[:, 0]],
         node_embed_dict["item"][seed_idx_edge[:, 1]]], axis=1)
    assert out_edge.shape == (N_EDGE, 2, D)
    assert jnp.allclose(out_edge, ref_edge, atol=1e-6), "edge-type gather mismatch"

    # ---- Case 3: identity (seed_lookup_idx is None) ----
    out_id = jax.block_until_ready(lookup_node(node_embed_dict, None))
    assert out_id.shape == (M_USER, D)

    # ---- Case 4: narrow-D table through the one-hot path (tail chunk, D<128) ----
    small_tab = jax.random.normal(k_small, (300, 64), dtype=jnp.float32)
    small_idx = jax.random.randint(k_sidx, (128,), 0, 300, dtype=jnp.int32)
    out_small = jax.block_until_ready(gather_rows(small_tab, small_idx))
    assert jnp.allclose(out_small, jnp.take(small_tab, small_idx, axis=0),
                        atol=1e-6), "narrow-D gather mismatch"

    # ---- Case 5: streaming HBM row-DMA gather (exercised at small scale) ----
    stream_tab = node_embed_dict["item"][:256]
    stream_idx = jax.random.randint(k_stream, (48,), 0, 256, dtype=jnp.int32)
    out_stream = jax.block_until_ready(_gather_rows_streaming(stream_tab, stream_idx))
    assert jnp.allclose(out_stream, jnp.take(stream_tab, stream_idx, axis=0)), \
        "streaming gather mismatch"

    print("KERNEL_OK")
</pallas_src>

<mosaic_0001>
module attributes {stable_mosaic.version = 11 : i64} {
  func.func @kernel(%arg0: i32, %arg1: memref<512x1xi32, #tpu.memory_space<vmem>>, %arg2: memref<2048x128xf32, #tpu.memory_space<vmem>>, %arg3: memref<512x128xf32, #tpu.memory_space<vmem>>) attributes {dimension_semantics = [#tpu.dimension_semantics<parallel>], iteration_bounds = array<i64: 2>, scalar_prefetch = 0 : i64, scratch_operands = 0 : i64, tpu.core_type = #tpu.core_type<tc>, window_params = [{transform_indices = @transform_0, window_bounds = array<i64: 512, 1>}, {pipeline_mode = #tpu.pipeline_mode<synchronous>, transform_indices = @transform_1, window_bounds = array<i64: 2048, 128>}, {transform_indices = @transform_2, window_bounds = array<i64: 512, 128>}]} {
    %cst = arith.constant 0.000000e+00 : f32
    %0 = vector.broadcast %cst : f32 to vector<512x128xf32>
    %c0 = arith.constant 0 : index
    %c0_0 = arith.constant 0 : index
    %1 = vector.load %arg3[%c0, %c0_0] : memref<512x128xf32, #tpu.memory_space<vmem>>, vector<512x128xf32>
    tpu.vector_store %arg3[%c0, %c0_0], %0 {strides = array<i32>} : memref<512x128xf32, #tpu.memory_space<vmem>>, vector<512x128xf32>,
    %c0_1 = arith.constant 0 : index
    %c0_2 = arith.constant 0 : index
    %2 = vector.load %arg1[%c0_1, %c0_2] : memref<512x1xi32, #tpu.memory_space<vmem>>, vector<512x1xi32>
    %c0_i32 = arith.constant 0 : i32
    %c8_i32 = arith.constant 8 : i32
    %3 = arith.addi %c0_i32, %c8_i32 : i32
    %c1_i32 = arith.constant 1 : i32
    scf.for %arg4 = %c0_i32 to %3 step %c1_i32  : i32 {
      %c1_i32_4 = arith.constant 1 : i32
      %4 = arith.muli %arg4, %c1_i32_4 : i32
      %c0_i32_5 = arith.constant 0 : i32
      %5 = arith.addi %c0_i32_5, %4 : i32
      %c256_i32 = arith.constant 256 : i32
      %6 = arith.muli %5, %c256_i32 : i32
      %7 = tpu.assume_multiple %6, 256 : i32
      %c0_6 = arith.constant 0 : index
      %c0_7 = arith.constant 0 : index
      %8 = vector.load %arg3[%c0_6, %c0_7] : memref<512x128xf32, #tpu.memory_space<vmem>>, vector<512x128xf32>
      %9 = tpu.iota {dimensions = array<i32: 1>} : vector<512x256xi32>
      %10 = vector.broadcast %7 : i32 to vector<512x256xi32>
      %11 = arith.addi %9, %10 : vector<512x256xi32>
      %12 = vector.broadcast %2 : vector<512x1xi32> to vector<512x256xi32>
      %13 = arith.cmpi eq, %11, %12 : vector<512x256xi32>
      %14 = arith.extui %13 : vector<512x256xi1> to vector<512x256xi32>
      %15 = arith.sitofp %14 : vector<512x256xi32> to vector<512x256xf32>
      %16 = arith.index_cast %7 : i32 to index
      %c0_8 = arith.constant 0 : index
      %17 = vector.load %arg2[%16, %c0_8] : memref<2048x128xf32, #tpu.memory_space<vmem>>, vector<256x128xf32>
      %cst_9 = arith.constant dense<0.000000e+00> : vector<512x128xf32>
      %18 = tpu.matmul %15, %17, %cst_9 {dimension_numbers = #tpu.dot_dimension_numbers<[1], [0], [0], [1], [0, 0, 1, 1], [], []>} : vector<512x256xf32>, vector<256x128xf32>, vector<512x128xf32> -> vector<512x128xf32>
      %19 = arith.addf %8, %18 : vector<512x128xf32>
      %c0_10 = arith.constant 0 : index
      %c0_11 = arith.constant 0 : index
      %20 = vector.load %arg3[%c0_10, %c0_11] : memref<512x128xf32, #tpu.memory_space<vmem>>, vector<512x128xf32>
      tpu.vector_store %arg3[%c0_10, %c0_11], %19 {strides = array<i32>} : memref<512x128xf32, #tpu.memory_space<vmem>>, vector<512x128xf32>,
    }
    %c8_i32_3 = arith.constant 8 : i32
    return
  }
  func.func @transform_0(%arg0: i32) -> (i32, i32) {
    %c0_i32 = arith.constant 0 : i32
    %c0_i32_0 = arith.constant 0 : i32
    return %arg0, %c0_i32 : i32, i32
  }
  func.func @transform_1(%arg0: i32) -> (i32, i32) {
    %c0_i32 = arith.constant 0 : i32
    %c0_i32_0 = arith.constant 0 : i32
    %c0_i32_1 = arith.constant 0 : i32
    return %c0_i32, %c0_i32_0 : i32, i32
  }
  func.func @transform_2(%arg0: i32) -> (i32, i32) {
    %c0_i32 = arith.constant 0 : i32
    %c0_i32_0 = arith.constant 0 : i32
    return %arg0, %c0_i32 : i32, i32
  }
}

module attributes {stable_mosaic.version = 11 : i64} {
  func.func @kernel(%arg0: i32, %arg1: memref<512x1xi32, #tpu.memory_space<vmem>>, %arg2: memref<2048x128xf32, #tpu.memory_space<vmem>>, %arg3: memref<512x128xf32, #tpu.memory_space<vmem>>) attributes {dimension_semantics = [#tpu.dimension_semantics<parallel>], iteration_bounds = array<i64: 2>, scalar_prefetch = 0 : i64, scratch_operands = 0 : i64, tpu.core_type = #tpu.core_type<tc>, window_params = [{transform_indices = @transform_0, window_bounds = array<i64: 512, 1>}, {pipeline_mode = #tpu.pipeline_mode<synchronous>, transform_indices = @transform_1, window_bounds = array<i64: 2048, 128>}, {transform_indices = @transform_2, window_bounds = array<i64: 512, 128>}]} {
    %cst = arith.constant 0.000000e+00 : f32
    %0 = vector.broadcast %cst : f32 to vector<512x128xf32>
    %c0 = arith.constant 0 : index
    %c0_0 = arith.constant 0 : index
    %1 = vector.load %arg3[%c0, %c0_0] : memref<512x128xf32, #tpu.memory_space<vmem>>, vector<512x128xf32>
    tpu.vector_store %arg3[%c0, %c0_0], %0 {strides = array<i32>} : memref<512x128xf32, #tpu.memory_space<vmem>>, vector<512x128xf32>,
    %c0_1 = arith.constant 0 : index
    %c0_2 = arith.constant 0 : index
    %2 = vector.load %arg1[%c0_1, %c0_2] : memref<512x1xi32, #tpu.memory_space<vmem>>, vector<512x1xi32>
    %c0_i32 = arith.constant 0 : i32
    %c8_i32 = arith.constant 8 : i32
    %3 = arith.addi %c0_i32, %c8_i32 : i32
    %c1_i32 = arith.constant 1 : i32
    scf.for %arg4 = %c0_i32 to %3 step %c1_i32  : i32 {
      %c1_i32_4 = arith.constant 1 : i32
      %4 = arith.muli %arg4, %c1_i32_4 : i32
      %c0_i32_5 = arith.constant 0 : i32
      %5 = arith.addi %c0_i32_5, %4 : i32
      %c256_i32 = arith.constant 256 : i32
      %6 = arith.muli %5, %c256_i32 : i32
      %7 = tpu.assume_multiple %6, 256 : i32
      %c0_6 = arith.constant 0 : index
      %c0_7 = arith.constant 0 : index
      %8 = vector.load %arg3[%c0_6, %c0_7] : memref<512x128xf32, #tpu.memory_space<vmem>>, vector<512x128xf32>
      %9 = tpu.iota {dimensions = array<i32: 1>} : vector<512x256xi32>
      %10 = vector.broadcast %7 : i32 to vector<512x256xi32>
      %11 = arith.addi %9, %10 : vector<512x256xi32>
      %12 = vector.broadcast %2 : vector<512x1xi32> to vector<512x256xi32>
      %13 = arith.cmpi eq, %11, %12 : vector<512x256xi32>
      %14 = arith.extui %13 : vector<512x256xi1> to vector<512x256xi32>
      %15 = arith.sitofp %14 : vector<512x256xi32> to vector<512x256xf32>
      %16 = arith.index_cast %7 : i32 to index
      %c0_8 = arith.constant 0 : index
      %17 = vector.load %arg2[%16, %c0_8] : memref<2048x128xf32, #tpu.memory_space<vmem>>, vector<256x128xf32>
      %cst_9 = arith.constant dense<0.000000e+00> : vector<512x128xf32>
      %18 = tpu.matmul %15, %17, %cst_9 {dimension_numbers = #tpu.dot_dimension_numbers<[1], [0], [0], [1], [0, 0, 1, 1], [], []>} : vector<512x256xf32>, vector<256x128xf32>, vector<512x128xf32> -> vector<512x128xf32>
      %19 = arith.addf %8, %18 : vector<512x128xf32>
      %c0_10 = arith.constant 0 : index
      %c0_11 = arith.constant 0 : index
      %20 = vector.load %arg3[%c0_10, %c0_11] : memref<512x128xf32, #tpu.memory_space<vmem>>, vector<512x128xf32>
      tpu.vector_store %arg3[%c0_10, %c0_11], %19 {strides = array<i32>} : memref<512x128xf32, #tpu.memory_space<vmem>>, vector<512x128xf32>,
    }
    %c8_i32_3 = arith.constant 8 : i32
    return
  }
  func.func @transform_0(%arg0: i32) -> (i32, i32) {
    %c0_i32 = arith.constant 0 : i32
    %c0_i32_0 = arith.constant 0 : i32
    return %arg0, %c0_i32 : i32, i32
  }
  func.func @transform_1(%arg0: i32) -> (i32, i32) {
    %c0_i32 = arith.constant 0 : i32
    %c0_i32_0 = arith.constant 0 : i32
    %c0_i32_1 = arith.constant 0 : i32
    return %c0_i32, %c0_i32_0 : i32, i32
  }
  func.func @transform_2(%arg0: i32) -> (i32, i32) {
    %c0_i32 = arith.constant 0 : i32
    %c0_i32_0 = arith.constant 0 : i32
    return %arg0, %c0_i32 : i32, i32
  }
}

</mosaic_0001>

<bundles_post_ra>
// kernel: tpu_custom_call.1
= control target key start
LH: loop header
LB: loop body
LE: loop exit
PB: predicated region body
PF: predicated region fallthrough
CT: control target
= control target key end

     0   :  { %7 = vsyncpa [#allocation3], 0  ;;  %s3042_s0 = inlined_call_operand.vmem [shape: s32[1024,1], index: 0, kind: input, shape index: {}]   ;;  %s3043_s1 = inlined_call_operand.hbm [shape: f32[2048,128], index: 1, kind: input, shape index: {}]   ;;  %s3044_s2 = inlined_call_operand.hbm [shape: f32[1024,128], index: 2, kind: output, shape index: {}]  }
   0x1   :  { %8 = vsyncpa [#allocation4], 0 }
   0x2   :  { %10 = vsyncpa [#allocation4 + $0x1], 0  ;;  %s2120_s9 = smov 0   ;;  %s2122_s10 = smov 0  }
   0x3   :  { %s2124_s11 = smov 0   ;;  %s2126_s12 = smov 0  }
   0x4 LB: > { %s2141_s13 = sadd.s32 4294967295, %s2091_s12   ;;  %s1619_s14 = sadd.s32 4294967294, %s2091_s12   ;;  %s2091_s12 = sphi %s2126_s12, %s3088_s12   ;;  %s2087_s11 = sphi %s2124_s11, %s3087_s11   ;;  %s2083_s10 = sphi %s2122_s10, %s3086_s10   ;;  %s2079_s9 = sphi %s2120_s9, %s3085_s9  }
   0x5   : > { %s2145_s15 = sadd.s32 1, %s2091_s12   ;;  %s70_s16 = sadd.s32 1, %s2087_s11 }
   0x6   : > { %s67_s17 = ssub.s32 %s2091_s12, %s2145_s15  ;;  %p80_p0 = scmp.ne.s32.totalorder %s2087_s11, %s2083_s10 }
   0x7   : > { %p68_p1 = scmp.eq.s32.totalorder %s67_s17, 0  ;;  %p81_p2 = scmp.eq.s32.totalorder %s2141_s13, 1 }
   0x8   : > { %p86_p3 = scmp.ne.s32.totalorder %s2083_s10, %s2079_s9  ;;  %p87_p4 = scmp.eq.s32.totalorder %s1619_s14, 1 }
   0x9   : > { %s2156_s18 = scalar_select %p68_p1, %s2087_s11, %s70_s16  }
   0xa   : > { %p2158_p5 = por %p81_p2, %p80_p0  ;;  %p2162_p6 = por %p87_p4, %p86_p3 }
   0xb   : > { %p1620_p7 = scmp.ge.s32.totalorder %s2091_s12, 1  ;;  %p94_p8 = scmp.lt.s32.totalorder %s2091_s12, 3 }
   0xc   : > { %p1937_p9 = scmp.eq.s32.totalorder %s2141_s13, 0  ;;  %s105_s23 = sshll.u32 %s3043_s1, 4  ;;  %s106_s23 = int_to_ptr.hbm [resolvable:$true] %s105_s23 }
   0xd   : > { %p95_p10 = pnand %p1620_p7, %p94_p8  ;;  %s2097_s24 = smov [#allocation2]  }
   0xe   : > { %s107_s25 = sshll.u32 %s2097_s24, 4  ;;  %s2098_s26 = smov 128   ;;  %s108_s25 = int_to_ptr.vmem [resolvable:$true] %s107_s25 }
   0xf   : > { %p1929_p11 = pneg %p95_p10  ;;  %s2099_s27 = smov 8  }
  0x10   : > { %132 = sbr.rel (%p95_p10) target bundleno = 618 (0x26a), region = 28 }
  0x11   : > { %p1930_p12 = pnand %p1937_p9, %p1929_p11 }
  0x13   : > { %1932 = dma.hbm_to_vmem [thread:$0]  (!%p1930_p12), %s106_s23, 32768, %s108_s25, [#allocation3], %s2098_s26, %s2098_s26, %s2099_s27  }
  0x15   : > { %2070 = dma.done.wait (%p1937_p9), [#allocation3], 32768  }
  0x16   : > { %2072 = vsyncadd (%p1937_p9), [#allocation3], 4294934528  ;;  %s1626_s28 = sshll.u32 %s2141_s13, 6  ;;  %s152_s29 = sand.u32 1, %s2083_s10   ;;  %v2100_v0 = vmov 0.0  }
  0x17   : > { %p156_p13 = scmp.lt.s32.totalorder %s1626_s28, 127  ;;  %s1625_s30 = sshll.u32 %s152_s29, 9 }
  0x18   : > { %s2182_s3 = scalar_lea.vmem [#allocation5], %s1625_s30  ;;  %s2509_s8 = smov 0  }
  0x19   : > { %s3090_s28 = smov (!%p156_p13, %s1626_s28), 127  ;;  %162 = vst [vmem:[%s2182_s3] sm:$0xff] %v2100_v0 }
  0x1a   : > { %163 = vst [vmem:[%s2182_s3 + $0x8] sm:$0xff] %v2100_v0  ;;  %s1627_s4 = sshll.u32 %s3090_s28, 3 }
  0x1b   : > { %164 = vst [vmem:[%s2182_s3 + $0x10] sm:$0xff] %v2100_v0  ;;  %s2193_s7 = scalar_lea.vmem %s3042_s0, %s1627_s4 }
  0x1c   : > { %165 = vst [vmem:[%s2182_s3 + $0x18] sm:$0xff] %v2100_v0  ;;  %v2198_v1 = vld [vmem:[%s2193_s7] sm:$0xff]  ;;  %v2201_v2 = vld [vmem:[%s2193_s7 + $0x8] sm:$0xff]  ;;  %v2204_v3 = vld [vmem:[%s2193_s7 + $0x10] sm:$0xff] }
  0x1d   : > { %3047 = vst [vmem:[#allocation8_spill] sm:$0xff] %v2198_v1  ;;  %v2209_v4 = vld [vmem:[%s2193_s7 + $0x18] sm:$0xff]  ;;  %v2212_v5 = vld [vmem:[%s2193_s7 + $0x20] sm:$0xff]  ;;  %v2215_v6 = vld [vmem:[%s2193_s7 + $0x28] sm:$0xff] }
  0x1e   : > { %3048 = vst [vmem:[#allocation9_spill] sm:$0xff] %v2201_v2  ;;  %v2220_v7 = vld [vmem:[%s2193_s7 + $0x30] sm:$0xff]  ;;  %v2223_v8 = vld [vmem:[%s2193_s7 + $0x38] sm:$0xff]  ;;  %v2226_v9 = vld [vmem:[%s2193_s7 + $0x40] sm:$0xff] }
  0x1f   : > { %3049 = vst [vmem:[#allocation10_spill] sm:$0xff] %v2204_v3  ;;  %v2231_v10 = vld [vmem:[%s2193_s7 + $0x48] sm:$0xff]  ;;  %v2234_v11 = vld [vmem:[%s2193_s7 + $0x50] sm:$0xff]  ;;  %v2237_v12 = vld [vmem:[%s2193_s7 + $0x58] sm:$0xff] }
  0x20   : > { %166 = vst [vmem:[%s2182_s3 + $0x20] sm:$0xff] %v2100_v0  ;;  %v2242_v13 = vld [vmem:[%s2193_s7 + $0x60] sm:$0xff]  ;;  %v2245_v14 = vld [vmem:[%s2193_s7 + $0x68] sm:$0xff]  ;;  %v2248_v15 = vld [vmem:[%s2193_s7 + $0x70] sm:$0xff] }
  0x21   : > { %3050 = vst [vmem:[#allocation11_spill] sm:$0xff] %v2209_v4  ;;  %v2253_v16 = vld [vmem:[%s2193_s7 + $0x78] sm:$0xff]  ;;  %v2256_v17 = vld [vmem:[%s2193_s7 + $0x80] sm:$0xff]  ;;  %v2259_v18 = vld [vmem:[%s2193_s7 + $0x88] sm:$0xff] }
  0x22   : > { %3051 = vst [vmem:[#allocation12_spill] sm:$0xff] %v2212_v5  ;;  %v2264_v19 = vld [vmem:[%s2193_s7 + $0x90] sm:$0xff]  ;;  %v2267_v20 = vld [vmem:[%s2193_s7 + $0x98] sm:$0xff]  ;;  %v2270_v21 = vld [vmem:[%s2193_s7 + $0xa0] sm:$0xff] }
  0x23   : > { %3052 = vst [vmem:[#allocation13_spill] sm:$0xff] %v2215_v6  ;;  %v2275_v22 = vld [vmem:[%s2193_s7 + $0xa8] sm:$0xff]  ;;  %v2278_v23 = vld [vmem:[%s2193_s7 + $0xb0] sm:$0xff]  ;;  %v2281_v24 = vld [vmem:[%s2193_s7 + $0xb8] sm:$0xff] }
  0x24   : > { %167 = vst [vmem:[%s2182_s3 + $0x28] sm:$0xff] %v2100_v0  ;;  %v2286_v25 = vld [vmem:[%s2193_s7 + $0xc0] sm:$0xff]  ;;  %v2289_v26 = vld [vmem:[%s2193_s7 + $0xc8] sm:$0xff]  ;;  %v2292_v27 = vld [vmem:[%s2193_s7 + $0xd0] sm:$0xff] }
  0x25   : > { %3053 = vst [vmem:[#allocation14_spill] sm:$0xff] %v2220_v7  ;;  %v2297_v28 = vld [vmem:[%s2193_s7 + $0xd8] sm:$0xff]  ;;  %v2300_v29 = vld [vmem:[%s2193_s7 + $0xe0] sm:$0xff]  ;;  %v2303_v30 = vld [vmem:[%s2193_s7 + $0xe8] sm:$0xff] }
  0x26   : > { %3054 = vst [vmem:[#allocation15_spill] sm:$0xff] %v2223_v8  ;;  %v2308_v31 = vld [vmem:[%s2193_s7 + $0xf0] sm:$0xff]  ;;  %v2311_v32 = vld [vmem:[%s2193_s7 + $0xf8] sm:$0xff]  ;;  %v2314_v33 = vld [vmem:[%s2193_s7 + $0x100] sm:$0xff] }
  0x27   : > { %3055 = vst [vmem:[#allocation16_spill] sm:$0xff] %v2226_v9  ;;  %v2319_v34 = vld [vmem:[%s2193_s7 + $0x108] sm:$0xff]  ;;  %v2322_v35 = vld [vmem:[%s2193_s7 + $0x110] sm:$0xff]  ;;  %v2325_v36 = vld [vmem:[%s2193_s7 + $0x118] sm:$0xff] }
  0x28   : > { %168 = vst [vmem:[%s2182_s3 + $0x30] sm:$0xff] %v2100_v0  ;;  %v2330_v37 = vld [vmem:[%s2193_s7 + $0x120] sm:$0xff]  ;;  %v2333_v38 = vld [vmem:[%s2193_s7 + $0x128] sm:$0xff]  ;;  %v2336_v39 = vld [vmem:[%s2193_s7 + $0x130] sm:$0xff] }
  0x29   : > { %3056 = vst [vmem:[#allocation17_spill] sm:$0xff] %v2231_v10  ;;  %v2341_v40 = vld [vmem:[%s2193_s7 + $0x138] sm:$0xff]  ;;  %v2344_v41 = vld [vmem:[%s2193_s7 + $0x140] sm:$0xff]  ;;  %v2347_v42 = vld [vmem:[%s2193_s7 + $0x148] sm:$0xff] }
  0x2a   : > { %3057 = vst [vmem:[#allocation18_spill] sm:$0xff] %v2234_v11  ;;  %v2352_v43 = vld [vmem:[%s2193_s7 + $0x150] sm:$0xff]  ;;  %v2355_v44 = vld [vmem:[%s2193_s7 + $0x158] sm:$0xff]  ;;  %v2358_v45 = vld [vmem:[%s2193_s7 + $0x160] sm:$0xff] }
  0x2b   : > { %3058 = vst [vmem:[#allocation19_spill] sm:$0xff] %v2237_v12  ;;  %v2363_v46 = vld [vmem:[%s2193_s7 + $0x168] sm:$0xff]  ;;  %v2366_v47 = vld [vmem:[%s2193_s7 + $0x170] sm:$0xff]  ;;  %v2369_v48 = vld [vmem:[%s2193_s7 + $0x178] sm:$0xff] }
  0x2c   : > { %169 = vst [vmem:[%s2182_s3 + $0x38] sm:$0xff] %v2100_v0  ;;  %v2374_v49 = vld [vmem:[%s2193_s7 + $0x180] sm:$0xff]  ;;  %v2377_v50 = vld [vmem:[%s2193_s7 + $0x188] sm:$0xff]  ;;  %v2380_v51 = vld [vmem:[%s2193_s7 + $0x190] sm:$0xff] }
  0x2d   : > { %3059 = vst [vmem:[#allocation20_spill] sm:$0xff] %v2242_v13  ;;  %v2385_v52 = vld [vmem:[%s2193_s7 + $0x198] sm:$0xff]  ;;  %v2388_v53 = vld [vmem:[%s2193_s7 + $0x1a0] sm:$0xff]  ;;  %v2391_v54 = vld [vmem:[%s2193_s7 + $0x1a8] sm:$0xff] }
  0x2e   : > { %3060 = vst [vmem:[#allocation21_spill] sm:$0xff] %v2245_v14  ;;  %v2396_v55 = vld [vmem:[%s2193_s7 + $0x1b0] sm:$0xff]  ;;  %v2399_v56 = vld [vmem:[%s2193_s7 + $0x1b8] sm:$0xff]  ;;  %v2402_v57 = vld [vmem:[%s2193_s7 + $0x1c0] sm:$0xff] }
  0x2f   : > { %3061 = vst [vmem:[#allocation22_spill] sm:$0xff] %v2248_v15  ;;  %v2407_v58 = vld [vmem:[%s2193_s7 + $0x1c8] sm:$0xff]  ;;  %v2410_v59 = vld [vmem:[%s2193_s7 + $0x1d0] sm:$0xff]  ;;  %v2413_v60 = vld [vmem:[%s2193_s7 + $0x1d8] sm:$0xff] }
  0x30   : > { %170 = vst [vmem:[%s2182_s3 + $0x40] sm:$0xff] %v2100_v0  ;;  %v2418_v61 = vld [vmem:[%s2193_s7 + $0x1e0] sm:$0xff]  ;;  %v2421_v62 = vld [vmem:[%s2193_s7 + $0x1e8] sm:$0xff]  ;;  %v2424_v63 = vld [vmem:[%s2193_s7 + $0x1f0] sm:$0xff] }
  0x31   : > { %3062 = vst [vmem:[#allocation23_spill] sm:$0xff] %v2253_v16 }
  0x32   : > { %3063 = vst [vmem:[#allocation24_spill] sm:$0xff] %v2256_v17 }
  0x33   : > { %171 = vst [vmem:[%s2182_s3 + $0x48] sm:$0xff] %v2100_v0 }
  0x34   : > { %172 = vst [vmem:[%s2182_s3 + $0x50] sm:$0xff] %v2100_v0 }
  0x35   : > { %173 = vst [vmem:[%s2182_s3 + $0x58] sm:$0xff] %v2100_v0 }
  0x36   : > { %174 = vst [vmem:[%s2182_s3 + $0x60] sm:$0xff] %v2100_v0 }
  0x37   : > { %175 = vst [vmem:[%s2182_s3 + $0x68] sm:$0xff] %v2100_v0 }
  0x38   : > { %3064 = vst [vmem:[#allocation25_spill] sm:$0xff] %v2311_v32  ;;  %v2429_v32 = vld [vmem:[%s2193_s7 + $0x1f8] sm:$0xff] }
  0x39   : > { %176 = vst [vmem:[%s2182_s3 + $0x70] sm:$0xff] %v2100_v0 }
  0x3a   : > { %177 = vst [vmem:[%s2182_s3 + $0x78] sm:$0xff] %v2100_v0 }
  0x3b   : > { %178 = vst [vmem:[%s2182_s3 + $0x80] sm:$0xff] %v2100_v0 }
  0x3c   : > { %179 = vst [vmem:[%s2182_s3 + $0x88] sm:$0xff] %v2100_v0 }
  0x3d   : > { %180 = vst [vmem:[%s2182_s3 + $0x90] sm:$0xff] %v2100_v0 }
  0x3e   : > { %181 = vst [vmem:[%s2182_s3 + $0x98] sm:$0xff] %v2100_v0 }
  0x3f   : > { %182 = vst [vmem:[%s2182_s3 + $0xa0] sm:$0xff] %v2100_v0 }
  0x40   : > { %183 = vst [vmem:[%s2182_s3 + $0xa8] sm:$0xff] %v2100_v0 }
  0x41   : > { %184 = vst [vmem:[%s2182_s3 + $0xb0] sm:$0xff] %v2100_v0 }
  0x42   : > { %185 = vst [vmem:[%s2182_s3 + $0xb8] sm:$0xff] %v2100_v0 }
  0x43   : > { %3065 = vst [vmem:[#allocation26_spill] sm:$0xff] %v2424_v63 }
  0x44   : > { %186 = vst [vmem:[%s2182_s3 + $0xc0] sm:$0xff] %v2100_v0 }
  0x45   : > { %187 = vst [vmem:[%s2182_s3 + $0xc8] sm:$0xff] %v2100_v0 }
  0x46   : > { %188 = vst [vmem:[%s2182_s3 + $0xd0] sm:$0xff] %v2100_v0 }
  0x47   : > { %189 = vst [vmem:[%s2182_s3 + $0xd8] sm:$0xff] %v2100_v0 }
  0x48   : > { %190 = vst [vmem:[%s2182_s3 + $0xe0] sm:$0xff] %v2100_v0 }
  0x49   : > { %191 = vst [vmem:[%s2182_s3 + $0xe8] sm:$0xff] %v2100_v0 }
  0x4a   : > { %192 = vst [vmem:[%s2182_s3 + $0xf0] sm:$0xff] %v2100_v0 }
  0x4b   : > { %193 = vst [vmem:[%s2182_s3 + $0xf8] sm:$0xff] %v2100_v0 }
  0x4c   : > { %194 = vst [vmem:[%s2182_s3 + $0x100] sm:$0xff] %v2100_v0 }
  0x4d   : > { %195 = vst [vmem:[%s2182_s3 + $0x108] sm:$0xff] %v2100_v0 }
  0x4e   : > { %196 = vst [vmem:[%s2182_s3 + $0x110] sm:$0xff] %v2100_v0 }
  0x4f   : > { %197 = vst [vmem:[%s2182_s3 + $0x118] sm:$0xff] %v2100_v0 }
  0x50   : > { %198 = vst [vmem:[%s2182_s3 + $0x120] sm:$0xff] %v2100_v0 }
  0x51   : > { %199 = vst [vmem:[%s2182_s3 + $0x128] sm:$0xff] %v2100_v0 }
  0x52   : > { %200 = vst [vmem:[%s2182_s3 + $0x130] sm:$0xff] %v2100_v0 }
  0x53   : > { %201 = vst [vmem:[%s2182_s3 + $0x138] sm:$0xff] %v2100_v0 }
  0x54   : > { %202 = vst [vmem:[%s2182_s3 + $0x140] sm:$0xff] %v2100_v0 }
  0x55   : > { %203 = vst [vmem:[%s2182_s3 + $0x148] sm:$0xff] %v2100_v0 }
  0x56   : > { %204 = vst [vmem:[%s2182_s3 + $0x150] sm:$0xff] %v2100_v0 }
  0x57   : > { %205 = vst [vmem:[%s2182_s3 + $0x158] sm:$0xff] %v2100_v0 }
  0x58   : > { %206 = vst [vmem:[%s2182_s3 + $0x160] sm:$0xff] %v2100_v0 }
  0x59   : > { %207 = vst [vmem:[%s2182_s3 + $0x168] sm:$0xff] %v2100_v0 }
  0x5a   : > { %208 = vst [vmem:[%s2182_s3 + $0x170] sm:$0xff] %v2100_v0 }
  0x5b   : > { %209 = vst [vmem:[%s2182_s3 + $0x178] sm:$0xff] %v2100_v0 }
  0x5c   : > { %210 = vst [vmem:[%s2182_s3 + $0x180] sm:$0xff] %v2100_v0 }
  0x5d   : > { %211 = vst [vmem:[%s2182_s3 + $0x188] sm:$0xff] %v2100_v0 }
  0x5e   : > { %212 = vst [vmem:[%s2182_s3 + $0x190] sm:$0xff] %v2100_v0 }
  0x5f   : > { %213 = vst [vmem:[%s2182_s3 + $0x198] sm:$0xff] %v2100_v0 }
  0x60   : > { %214 = vst [vmem:[%s2182_s3 + $0x1a0] sm:$0xff] %v2100_v0 }
  0x61   : > { %215 = vst [vmem:[%s2182_s3 + $0x1a8] sm:$0xff] %v2100_v0 }
  0x62   : > { %216 = vst [vmem:[%s2182_s3 + $0x1b0] sm:$0xff] %v2100_v0 }
  0x63   : > { %217 = vst [vmem:[%s2182_s3 + $0x1b8] sm:$0xff] %v2100_v0 }
  0x64   : > { %218 = vst [vmem:[%s2182_s3 + $0x1c0] sm:$0xff] %v2100_v0 }
  0x65   : > { %219 = vst [vmem:[%s2182_s3 + $0x1c8] sm:$0xff] %v2100_v0 }
  0x66   : > { %220 = vst [vmem:[%s2182_s3 + $0x1d0] sm:$0xff] %v2100_v0 }
  0x67   : > { %221 = vst [vmem:[%s2182_s3 + $0x1d8] sm:$0xff] %v2100_v0 }
  0x68   : > { %222 = vst [vmem:[%s2182_s3 + $0x1e0] sm:$0xff] %v2100_v0 }
  0x69   : > { %223 = vst [vmem:[%s2182_s3 + $0x1e8] sm:$0xff] %v2100_v0 }
  0x6a   : > { %224 = vst [vmem:[%s2182_s3 + $0x1f0] sm:$0xff] %v2100_v0 }
  0x6b   : > { %225 = vst [vmem:[%s2182_s3 + $0x1f8] sm:$0xff] %v2100_v0 }
  0x6c LB: >> { %v2101_v63 = vmov 0   ;;  %v3066_v3 = vld [vmem:[#allocation10_spill] sm:$0xff]  ;;  %v3067_v2 = vld [vmem:[#allocation9_spill] sm:$0xff]  ;;  %v3068_v1 = vld [vmem:[#allocation8_spill] sm:$0xff]  ;;  %s1628_s14 = sshll.u32 %s2095_s8, 8  ;;  %s295_s8 = sadd.s32 1, %s2095_s8   ;;  %s2095_s8 = sphi %s2509_s8, %s295_s8  }
  0x6d   : >> { %1990 = vset.pattern.permute.xlu2 %v2101_v63  ;;  %1989 = vset.pattern.permute.xlu1 %v2101_v63  ;;  %v3069_v4 = vld [vmem:[#allocation11_spill] sm:$0xff]  ;;  %v3070_v6 = vld [vmem:[#allocation13_spill] sm:$0xff]  ;;  %v3071_v5 = vld [vmem:[#allocation12_spill] sm:$0xff]  ;;  %s2538_s16 = scalar_lea.vmem [#allocation2], %s1628_s14  ;;  %p292_p0 = scmp.ge.s32.totalorder %s295_s8, 8  }
  0x6e   : >> { %1988 = vset.pattern.permute.xlu0 %v2101_v63  ;;  %470 = vperm.xlu2 %1990, %v2322_v35   ;;  %v3072_v7 = vld [vmem:[#allocation14_spill] sm:$0xff]  ;;  %v3073_v9 = vld [vmem:[#allocation16_spill] sm:$0xff]  ;;  %v3074_v8 = vld [vmem:[#allocation15_spill] sm:$0xff]  ;;  %s1890_s17 = sshll.u32 (%p292_p0), %s2141_s13, 9  ;;  %s1535_s24 = sshll.u32 (%p292_p0), %s2182_s3, 4  ;;  %s1536_s24 = int_to_ptr.vmem [resolvable:$true] %s1535_s24 }
  0x6f   : >> { %467 = vperm.xlu1 %1989, %v2319_v34   ;;  %464 = vperm.xlu0 %1988, %v2314_v33   ;;  %v3075_v10 = vld [vmem:[#allocation17_spill] sm:$0xff]  ;;  %v959_v0 = vld [vmem:[%s2538_s16 + $0x78] sm:$0xff]  ;;  %v3077_v11 = vld [vmem:[#allocation18_spill] sm:$0xff]  ;;  %s1534_s23 = scalar_lea.hbm (%p292_p0), %s3044_s2, %s1890_s17  ;;  %s1523_s26 = scalar_lea.sflag (%p292_p0), [#allocation4], %s152_s29 }
  0x70   : >> { %v975_v63 = vld [vmem:[%s2538_s16 + $0xf8] sm:$0xff]  ;;  %1891 = vmatpush.msra.mxu2 %v959_v0  ;;  %976 = vmatpush.msra.mxu0 %v959_v0  ;;  %v972_v0 = vld [vmem:[%s2538_s16 + $0xe0] sm:$0xff]  ;;  %v3079_v15 = vld [vmem:[#allocation22_spill] sm:$0xff]  ;;  %s1537_s25 = sshll.u32 (%p292_p0), %s1534_s23, 4  ;;  %s2041_s13 = scalar_lea.hbm (%p292_p0), %s3044_s2, 1024  ;;  %s1538_s25 = int_to_ptr.hbm [resolvable:$true] %s1537_s25 }
  0x71   : >> { %1907 = vmatpush.msra.mxu3 %v975_v63  ;;  %1185 = vmatpush.msra.mxu1 %v975_v63  ;;  %v3076_v12 = vld [vmem:[#allocation19_spill] sm:$0xff]  ;;  %v3078_v13 = vld [vmem:[#allocation20_spill] sm:$0xff]  ;;  %v3080_v14 = vld [vmem:[#allocation21_spill] sm:$0xff]  ;;  %s2035_s27 = sshra.s32 (%p292_p0), %s1538_s25, 4  ;;  %s2036_s27 = int_to_ptr.hbm [resolvable:$true] %s2035_s27 }
  0x72   : >> { %v971_v63 = vld [vmem:[%s2538_s16 + $0xd8] sm:$0xff]  ;;  %v3082_v17 = vld [vmem:[#allocation24_spill] sm:$0xff]  ;;  %s2037_s28 = scalar_lea.hbm (%p292_p0), %s2036_s27, 512  ;;  %p2042_p4 = scmp.lt.s32.totalorder (%p292_p0), %s2036_s27, %s3044_s2 }
  0x73   : >> { %v3081_v16 = vld [vmem:[#allocation23_spill] sm:$0xff]  ;;  %p2038_p1 = scmp.ne.s32.totalorder (%p292_p0), %s2036_s27, %s2037_s28  ;;  %p2043_p7 = scmp.lt.s32.totalorder (%p292_p0), %s2041_s13, %s2037_s28 }
  0x75   : > { %p2039_p2 = pnand (%p292_p0), %p2038_p1, %p2158_p5  ;;  %p2044_p8 = por (%p292_p0), %p2043_p7, %p2042_p4 }
  0x76   : >> { %374 = vperm.xlu2 %1990, %v3066_v3   ;;  %v957_v3 = vld [vmem:[%s2538_s16 + $0x68] sm:$0xff] }
  0x77   : >> { %371 = vperm.xlu1 %1989, %v3067_v2   ;;  %368 = vperm.xlu0 %1988, %v3068_v1   ;;  %v958_v1 = vld [vmem:[%s2538_s16 + $0x70] sm:$0xff]  ;;  %p2040_p3 = pneg (%p292_p0), %p2039_p2 }
  0x78   : >> { %v974_v2 = vld [vmem:[%s2538_s16 + $0xf0] sm:$0xff]  ;;  %1892 = vmatpush.msra.mxu2 %v958_v1  ;;  %977 = vmatpush.msra.mxu0 %v958_v1 }
  0x79   : >> { %1908 = vmatpush.msra.mxu3 %v974_v2  ;;  %1186 = vmatpush.msra.mxu1 %v974_v2  ;;  %v954_v1 = vld [vmem:[%s2538_s16 + $0x50] sm:$0xff]  ;;  %p2045_p9 = pnand (%p292_p0), %p2044_p8, %p2040_p3 }
  0x7a   : >> { %1893 = vmatpush.msra.mxu2 %v957_v3  ;;  %978 = vmatpush.msra.mxu0 %v957_v3  ;;  %v970_v2 = vld [vmem:[%s2538_s16 + $0xd0] sm:$0xff]  ;;  %v953_v3 = vld [vmem:[%s2538_s16 + $0x48] sm:$0xff] }
  0x7e   : >> { %476 = vperm.xlu2 %1990, %v2330_v37  }
  0x7f   : >> { %377 = vperm.xlu1 %1989, %v3069_v4   ;;  %473 = vperm.xlu0 %1988, %v2325_v36   ;;  %v973_v4 = vld [vmem:[%s2538_s16 + $0xe8] sm:$0xff] }
  0x80   : >> { %1909 = vmatpush.msra.mxu3 %v973_v4  ;;  %1187 = vmatpush.msra.mxu1 %v973_v4  ;;  %v969_v4 = vld [vmem:[%s2538_s16 + $0xc8] sm:$0xff] }
  0x82   : >> { %1910 = vmatpush.msra.mxu3 %v972_v0  ;;  %1188 = vmatpush.msra.mxu1 %v972_v0  ;;  %v968_v0 = vld [vmem:[%s2538_s16 + $0xc0] sm:$0xff] }
  0x84   : >> { %1911 = vmatpush.msra.mxu3 %v971_v63  ;;  %1189 = vmatpush.msra.mxu1 %v971_v63  ;;  %v950_v63 = vld [vmem:[%s2538_s16 + $0x30] sm:$0xff] }
  0x86   : >> { %383 = vperm.xlu2 %1990, %v3070_v6   ;;  %v955_v6 = vld [vmem:[%s2538_s16 + $0x58] sm:$0xff]  ;;  %1912 = vmatpush.msra.mxu3 %v970_v2 }
  0x87   : >> { %479 = vperm.xlu1 %1989, %v2333_v38   ;;  %380 = vperm.xlu0 %1988, %v3071_v5   ;;  %v956_v5 = vld [vmem:[%s2538_s16 + $0x60] sm:$0xff] }
  0x88   : >> { %1894 = vmatpush.msra.mxu2 %v956_v5  ;;  %979 = vmatpush.msra.mxu0 %v956_v5  ;;  %v952_v5 = vld [vmem:[%s2538_s16 + $0x40] sm:$0xff] }
  0x89   : >> { %1190 = vmatpush.msra.mxu1 %v970_v2  ;;  %1913 = vmatpush.msra.mxu3 %v969_v4  ;;  %v965_v2 = vld [vmem:[%s2538_s16 + $0xa8] sm:$0xff] }
  0x8a   : >> { %1895 = vmatpush.msra.mxu2 %v955_v6  ;;  %980 = vmatpush.msra.mxu0 %v955_v6  ;;  %v967_v6 = vld [vmem:[%s2538_s16 + $0xb8] sm:$0xff] }
  0x8b   : >> { %1191 = vmatpush.msra.mxu1 %v969_v4  ;;  %1914 = vmatpush.msra.mxu3 %v968_v0  ;;  %v964_v4 = vld [vmem:[%s2538_s16 + $0xa0] sm:$0xff] }
  0x8c   : >> { %1896 = vmatpush.msra.mxu2 %v954_v1  ;;  %981 = vmatpush.msra.mxu0 %v954_v1  ;;  %v949_v1 = vld [vmem:[%s2538_s16 + $0x28] sm:$0xff] }
  0x8d   : >> { %1192 = vmatpush.msra.mxu1 %v968_v0  ;;  %1915 = vmatpush.msra.mxu3 %v967_v6  ;;  %v963_v0 = vld [vmem:[%s2538_s16 + $0x98] sm:$0xff] }
  0x8e   : >> { %485 = vperm.xlu2 %1990, %v2341_v40   ;;  %1897 = vmatpush.msra.mxu2 %v953_v3 }
  0x8f   : >> { %386 = vperm.xlu1 %1989, %v3072_v7   ;;  %482 = vperm.xlu0 %1988, %v2336_v39   ;;  %v951_v7 = vld [vmem:[%s2538_s16 + $0x38] sm:$0xff] }
  0x90   : >> { %1898 = vmatpush.msra.mxu2 %v952_v5  ;;  %982 = vmatpush.msra.mxu0 %v953_v3  ;;  %v948_v3 = vld [vmem:[%s2538_s16 + $0x20] sm:$0xff] }
  0x91   : >> { %1193 = vmatpush.msra.mxu1 %v967_v6  ;;  %v945_v6 = vld [vmem:[%s2538_s16 + $0x8] sm:$0xff] }
  0x92   : >> { %1899 = vmatpush.msra.mxu2 %v951_v7  ;;  %983 = vmatpush.msra.mxu0 %v952_v5  ;;  %v947_v5 = vld [vmem:[%s2538_s16 + $0x18] sm:$0xff] }
  0x94   : >> { %1900 = vmatpush.msra.mxu2 %v950_v63  ;;  %984 = vmatpush.msra.mxu0 %v951_v7  ;;  %v962_v7 = vld [vmem:[%s2538_s16 + $0x90] sm:$0xff] }
  0x96   : >> { %392 = vperm.xlu2 %1990, %v3073_v9   ;;  %1901 = vmatpush.msra.mxu2 %v949_v1  ;;  %v946_v9 = vld [vmem:[%s2538_s16 + $0x10] sm:$0xff] }
  0x97   : >> { %488 = vperm.xlu1 %1989, %v2344_v41   ;;  %389 = vperm.xlu0 %1988, %v3074_v8   ;;  %v966_v8 = vld [vmem:[%s2538_s16 + $0xb0] sm:$0xff] }
  0x98   : >> { %1916 = vmatpush.msra.mxu3 %v966_v8  ;;  %985 = vmatpush.msra.mxu0 %v950_v63  ;;  %v944_v63 = vld [vmem:[%s2538_s16] sm:$0xff] }
  0x99   : >> { %1194 = vmatpush.msra.mxu1 %v966_v8  ;;  %1902 = vmatpush.msra.mxu2 %v948_v3  ;;  %v961_v8 = vld [vmem:[%s2538_s16 + $0x88] sm:$0xff] }
  0x9a   : >> { %1917 = vmatpush.msra.mxu3 %v965_v2  ;;  %986 = vmatpush.msra.mxu0 %v949_v1  ;;  %v960_v1 = vld [vmem:[%s2538_s16 + $0x80] sm:$0xff] }
  0x9b   : >> { %1195 = vmatpush.msra.mxu1 %v965_v2  ;;  %1903 = vmatpush.msra.mxu2 %v947_v5 }
  0x9c   : >> { %1918 = vmatpush.msra.mxu3 %v964_v4  ;;  %987 = vmatpush.msra.mxu0 %v948_v3 }
  0x9d   : >> { %1904 = vmatpush.msra.mxu2 %v946_v9  ;;  %1196 = vmatpush.msra.mxu1 %v964_v4  ;;  %v364_v4 = vstv %s1628_s14 }
  0x9e   : >> { %494 = vperm.xlu2 %1990, %v2352_v43   ;;  %1919 = vmatpush.msra.mxu3 %v963_v0 }
  0x9f   : >> { %395 = vperm.xlu1 %1989, %v3075_v10   ;;  %491 = vperm.xlu0 %1988, %v2347_v42  }
  0xa0   : >> { %1920 = vmatpush.msra.mxu3 %v962_v7  ;;  %1905 = vmatpush.msra.mxu2 %v945_v6 }
  0xa1   : >> { %988 = vmatpush.msra.mxu0 %v947_v5  ;;  %1197 = vmatpush.msra.mxu1 %v963_v0 }
  0xa2   : >> { %1921 = vmatpush.msra.mxu3 %v961_v8  ;;  %1906 = vmatpush.msra.mxu2 %v944_v63 }
  0xa3   : >> { %989 = vmatpush.msra.mxu0 %v946_v9  ;;  %1198 = vmatpush.msra.mxu1 %v962_v7  ;;  %v361_v9 = vlaneseq }
  0xa4   : >> { %1922 = vmatpush.msra.mxu3 %v960_v1 }
  0xa5   : >> { %990 = vmatpush.msra.mxu0 %v945_v6  ;;  %1199 = vmatpush.msra.mxu1 %v961_v8  ;;  %v362_v2 = vand.u32 127, %v361_v9  ;;  %v2102_v6 = vmov 1.0  }
  0xa6   : >> { %401 = vperm.xlu2 %1990, %v3076_v12   ;;  %v297_v12 = vld [vmem:[%s2182_s3] sm:$0xff] }
  0xa7   : >> { %497 = vperm.xlu1 %1989, %v2355_v44   ;;  %398 = vperm.xlu0 %1988, %v3077_v11   ;;  %v363_v3 = vadd.s32 128, %v362_v2  ;;  %v2595_v5 = vadd.s32 %v364_v4, %v362_v2 }
  0xa8   : >> { %991 = vmatpush.msra.mxu0 %v944_v63  ;;  %1200 = vmatpush.msra.mxu1 %v960_v1 }
  0xa9   : >> { %v2597_v0 = vadd.s32 %v364_v4, %v363_v3 }
  0xae   : >> { %503 = vperm.xlu2 %1990, %v2363_v46  }
  0xaf   : >> { %404 = vperm.xlu1 %1989, %v3078_v13   ;;  %500 = vperm.xlu0 %1988, %v2358_v45  }
  0xb6   : >> { %410 = vperm.xlu2 %1990, %v3079_v15  }
  0xb7   : >> { %506 = vperm.xlu1 %1989, %v2366_v47   ;;  %407 = vperm.xlu0 %1988, %v3080_v14   ;;  %v298_v14 = vld [vmem:[%s2182_s3 + $0x8] sm:$0xff] }
  0xbe   : >> { %512 = vperm.xlu2 %1990, %v2374_v49  }
  0xbf   : >> { %413 = vperm.xlu1 %1989, %v3081_v16   ;;  %509 = vperm.xlu0 %1988, %v2369_v48  }
  0xc6   : >> { %419 = vperm.xlu2 %1990, %v2259_v18  }
  0xc7   : >> { %515 = vperm.xlu1 %1989, %v2377_v50   ;;  %416 = vperm.xlu0 %1988, %v3082_v17  }
  0xc8   : >> { %v471_v1 = vpop.permute.xlu2 %470 }
  0xc9   : >> { %vm627_vm6 = vcmp.eq.s32.totalorder %v2595_v5, %v471_v1  ;;  %vm628_vm7 = vcmp.eq.s32.totalorder %v2597_v0, %v471_v1 }
  0xce   : >> { %521 = vperm.xlu2 %1990, %v2385_v52  }
  0xcf   : >> { %422 = vperm.xlu1 %1989, %v2264_v19   ;;  %518 = vperm.xlu0 %1988, %v2380_v51  }
  0xd0   : >> { %v375_v2 = vpop.permute.xlu2 %374 }
  0xd1   : >> { %vm563_vm10 = vcmp.eq.s32.totalorder %v2595_v5, %v375_v2  ;;  %vm564_vm12 = vcmp.eq.s32.totalorder %v2597_v0, %v375_v2  ;;  %v3083_v2 = vld [vmem:[#allocation26_spill] sm:$0xff] }
  0xd6   : >> { %428 = vperm.xlu2 %1990, %v2270_v21  }
  0xd7   : >> { %524 = vperm.xlu1 %1989, %v2388_v53   ;;  %425 = vperm.xlu0 %1988, %v2267_v20  }
  0xde   : >> { %530 = vperm.xlu2 %1990, %v2396_v55  }
  0xdf   : >> { %431 = vperm.xlu1 %1989, %v2275_v22   ;;  %527 = vperm.xlu0 %1988, %v2391_v54  }
  0xe1   : >> { %v465_v7 = vpop.permute.xlu0 %464  ;;  %v468_v8 = vpop.permute.xlu1 %467 }
  0xe2   : >> { %vm623_vm0 = vcmp.eq.s32.totalorder %v2595_v5, %v465_v7  ;;  %vm624_vm1 = vcmp.eq.s32.totalorder %v2597_v0, %v465_v7  ;;  %vm625_vm2 = vcmp.eq.s32.totalorder %v2595_v5, %v468_v8  ;;  %vm626_vm3 = vcmp.eq.s32.totalorder %v2597_v0, %v468_v8  ;;  %v477_v7 = vpop.permute.xlu2 %476 }
  0xe3   : >> { %1789 = vmatmul.msk.f32.vlgmr.msra.gmra.mxu2 %vm623_vm0, %v2102_v6  ;;  %1853 = vmatmul.msk.f32.vlgmr.msra.gmra.mxu3 %vm624_vm1, %v2102_v6  ;;  %vm631_vm15 = vcmp.eq.s32.totalorder %v2595_v5, %v477_v7  ;;  %vm632_vm1 = vcmp.eq.s32.totalorder %v2597_v0, %v477_v7 }
  0xe6   : >> { %437 = vperm.xlu2 %1990, %v2281_v24  }
  0xe7   : >> { %533 = vperm.xlu1 %1989, %v2399_v56   ;;  %434 = vperm.xlu0 %1988, %v2278_v23  }
  0xe9   : >> { %v369_v63 = vpop.permute.xlu0 %368  ;;  %v372_v9 = vpop.permute.xlu1 %371 }
  0xea   : >> { %vm559_vm4 = vcmp.eq.s32.totalorder %v2595_v5, %v369_v63  ;;  %vm560_vm5 = vcmp.eq.s32.totalorder %v2597_v0, %v369_v63  ;;  %vm561_vm8 = vcmp.eq.s32.totalorder %v2595_v5, %v372_v9  ;;  %vm562_vm9 = vcmp.eq.s32.totalorder %v2597_v0, %v372_v9  ;;  %v384_v1 = vpop.permute.xlu2 %383 }
  0xeb   : >> { %1757 = vmatmul.msk.f32.vlgmr.msra.gmra.mxu0 %vm559_vm4, %v2102_v6  ;;  %1790 = vmatmul.msk.f32.gmra.mxu2 %vm625_vm2, %v2102_v6 }
  0xec   : >> { %1821 = vmatmul.msk.f32.vlgmr.msra.gmra.mxu1 %vm560_vm5, %v2102_v6  ;;  %1854 = vmatmul.msk.f32.gmra.mxu3 %vm626_vm3, %v2102_v6 }
  0xee   : >> { %539 = vperm.xlu2 %1990, %v2407_v58  }
  0xef   : >> { %440 = vperm.xlu1 %1989, %v2286_v25   ;;  %536 = vperm.xlu0 %1988, %v2402_v57  }
  0xf1   : >> { %v474_v3 = vpop.permute.xlu0 %473  ;;  %v378_v4 = vpop.permute.xlu1 %377 }
  0xf2   : >> { %vm629_vm11 = vcmp.eq.s32.totalorder %v2595_v5, %v474_v3  ;;  %vm630_vm13 = vcmp.eq.s32.totalorder %v2597_v0, %v474_v3  ;;  %vm565_vm14 = vcmp.eq.s32.totalorder %v2595_v5, %v378_v4  ;;  %vm566_vm0 = vcmp.eq.s32.totalorder %v2597_v0, %v378_v4  ;;  %v3084_v4 = vld [vmem:[#allocation25_spill] sm:$0xff]  ;;  %v486_v7 = vpop.permute.xlu2 %485 }
  0xf3   : >> { %1758 = vmatmul.msk.f32.gmra.mxu0 %vm561_vm8, %v2102_v6  ;;  %1791 = vmatmul.msk.f32.gmra.mxu2 %vm627_vm6, %v2102_v6  ;;  %vm569_vm6 = vcmp.eq.s32.totalorder %v2595_v5, %v384_v1  ;;  %vm570_vm8 = vcmp.eq.s32.totalorder %v2597_v0, %v384_v1 }
  0xf4   : >> { %1822 = vmatmul.msk.f32.gmra.mxu1 %vm562_vm9, %v2102_v6  ;;  %1855 = vmatmul.msk.f32.gmra.mxu3 %vm628_vm7, %v2102_v6 }
  0xf6   : >> { %446 = vperm.xlu2 %1990, %v2292_v27  }
  0xf7   : >> { %542 = vperm.xlu1 %1989, %v2410_v59   ;;  %443 = vperm.xlu0 %1988, %v2289_v26  }
  0xf9   : >> { %v381_v8 = vpop.permute.xlu0 %380  ;;  %v480_v63 = vpop.permute.xlu1 %479 }
  0xfa   : >> { %vm567_vm2 = vcmp.eq.s32.totalorder %v2595_v5, %v381_v8  ;;  %vm633_vm3 = vcmp.eq.s32.totalorder %v2595_v5, %v480_v63  ;;  %vm568_vm4 = vcmp.eq.s32.totalorder %v2597_v0, %v381_v8  ;;  %vm634_vm5 = vcmp.eq.s32.totalorder %v2597_v0, %v480_v63  ;;  %v393_v1 = vpop.permute.xlu2 %392 }
  0xfb   : >> { %1759 = vmatmul.msk.f32.gmra.mxu0 %vm563_vm10, %v2102_v6  ;;  %1792 = vmatmul.msk.f32.gmra.mxu2 %vm629_vm11, %v2102_v6  ;;  %vm637_vm11 = vcmp.eq.s32.totalorder %v2595_v5, %v486_v7 }
  0xfc   : >> { %1823 = vmatmul.msk.f32.gmra.mxu1 %vm564_vm12, %v2102_v6  ;;  %1856 = vmatmul.msk.f32.gmra.mxu3 %vm630_vm13, %v2102_v6  ;;  %vm638_vm13 = vcmp.eq.s32.totalorder %v2597_v0, %v486_v7 }
  0xfe   : >> { %548 = vperm.xlu2 %1990, %v2418_v61  }
  0xff   : >> { %449 = vperm.xlu1 %1989, %v2297_v28   ;;  %545 = vperm.xlu0 %1988, %v2413_v60  }
 0x101   : >> { %v483_v9 = vpop.permute.xlu0 %482  ;;  %v387_v3 = vpop.permute.xlu1 %386 }
 0x102   : >> { %vm635_vm7 = vcmp.eq.s32.totalorder %v2595_v5, %v483_v9  ;;  %vm636_vm9 = vcmp.eq.s32.totalorder %v2597_v0, %v483_v9  ;;  %vm571_vm10 = vcmp.eq.s32.totalorder %v2595_v5, %v387_v3  ;;  %vm572_vm12 = vcmp.eq.s32.totalorder %v2597_v0, %v387_v3  ;;  %v495_v3 = vpop.permute.xlu2 %494 }
 0x103   : >> { %1760 = vmatmul.msk.f32.gmra.mxu0 %vm565_vm14, %v2102_v6  ;;  %1793 = vmatmul.msk.f32.gmra.mxu2 %vm631_vm15, %v2102_v6 }
 0x104   : >> { %1824 = vmatmul.msk.f32.gmra.mxu1 %vm566_vm0, %v2102_v6  ;;  %1857 = vmatmul.msk.f32.gmra.mxu3 %vm632_vm1, %v2102_v6 }
 0x106   : >> { %455 = vperm.xlu2 %1990, %v2303_v30  }
 0x107   : >> { %551 = vperm.xlu1 %1989, %v2421_v62   ;;  %452 = vperm.xlu0 %1988, %v2300_v29  }
 0x109   : >> { %v390_v8 = vpop.permute.xlu0 %389  ;;  %v489_v63 = vpop.permute.xlu1 %488 }
 0x10a   : >> { %vm573_vm14 = vcmp.eq.s32.totalorder %v2595_v5, %v390_v8  ;;  %vm639_vm15 = vcmp.eq.s32.totalorder %v2595_v5, %v489_v63  ;;  %vm574_vm0 = vcmp.eq.s32.totalorder %v2597_v0, %v390_v8  ;;  %vm640_vm1 = vcmp.eq.s32.totalorder %v2597_v0, %v489_v63  ;;  %v402_v8 = vpop.permute.xlu2 %401 }
 0x10b   : >> { %1761 = vmatmul.msk.f32.gmra.mxu0 %vm567_vm2, %v2102_v6  ;;  %1794 = vmatmul.msk.f32.gmra.mxu2 %vm633_vm3, %v2102_v6  ;;  %vm575_vm2 = vcmp.eq.s32.totalorder %v2595_v5, %v393_v1 }
 0x10c   : >> { %1825 = vmatmul.msk.f32.gmra.mxu1 %vm568_vm4, %v2102_v6  ;;  %1858 = vmatmul.msk.f32.gmra.mxu3 %vm634_vm5, %v2102_v6  ;;  %vm576_vm4 = vcmp.eq.s32.totalorder %v2597_v0, %v393_v1 }
 0x10e   : >> { %557 = vperm.xlu2 %1990, %v2429_v32  }
 0x10f   : >> { %458 = vperm.xlu1 %1989, %v2308_v31   ;;  %554 = vperm.xlu0 %1988, %v3083_v2  }
 0x111   : >> { %v492_v9 = vpop.permute.xlu0 %491  ;;  %v396_v2 = vpop.permute.xlu1 %395 }
 0x112   : >> { %vm641_vm3 = vcmp.eq.s32.totalorder %v2595_v5, %v492_v9  ;;  %vm642_vm5 = vcmp.eq.s32.totalorder %v2597_v0, %v492_v9  ;;  %v504_v9 = vpop.permute.xlu2 %503 }
 0x113   : >> { %1762 = vmatmul.msk.f32.gmra.mxu0 %vm569_vm6, %v2102_v6  ;;  %1795 = vmatmul.msk.f32.gmra.mxu2 %vm635_vm7, %v2102_v6  ;;  %vm577_vm6 = vcmp.eq.s32.totalorder %v2595_v5, %v396_v2  ;;  %vm643_vm7 = vcmp.eq.s32.totalorder %v2595_v5, %v495_v3 }
 0x114   : >> { %1826 = vmatmul.msk.f32.gmra.mxu1 %vm570_vm8, %v2102_v6  ;;  %1859 = vmatmul.msk.f32.gmra.mxu3 %vm636_vm9, %v2102_v6  ;;  %vm578_vm8 = vcmp.eq.s32.totalorder %v2597_v0, %v396_v2  ;;  %vm644_vm9 = vcmp.eq.s32.totalorder %v2597_v0, %v495_v3 }
 0x117   : >> { %461 = vperm.xlu0 %1988, %v3084_v4  }
 0x119   : >> { %v399_v4 = vpop.permute.xlu0 %398  ;;  %v498_v7 = vpop.permute.xlu1 %497 }
 0x11b   : >> { %1763 = vmatmul.msk.f32.gmra.mxu0 %vm571_vm10, %v2102_v6  ;;  %1796 = vmatmul.msk.f32.gmra.mxu2 %vm637_vm11, %v2102_v6  ;;  %vm579_vm10 = vcmp.eq.s32.totalorder %v2595_v5, %v399_v4  ;;  %vm645_vm11 = vcmp.eq.s32.totalorder %v2595_v5, %v498_v7 }
 0x11c   : >> { %1827 = vmatmul.msk.f32.gmra.mxu1 %vm572_vm12, %v2102_v6  ;;  %1860 = vmatmul.msk.f32.gmra.mxu3 %vm638_vm13, %v2102_v6  ;;  %vm580_vm12 = vcmp.eq.s32.totalorder %v2597_v0, %v399_v4  ;;  %vm646_vm13 = vcmp.eq.s32.totalorder %v2597_v0, %v498_v7  ;;  %v411_v4 = vpop.permute.xlu2 %410 }
 0x121   : >> { %v501_v63 = vpop.permute.xlu0 %500  ;;  %v405_v1 = vpop.permute.xlu1 %404 }
 0x123   : >> { %1764 = vmatmul.msk.f32.gmra.mxu0 %vm573_vm14, %v2102_v6  ;;  %1797 = vmatmul.msk.f32.gmra.mxu2 %vm639_vm15, %v2102_v6  ;;  %vm581_vm14 = vcmp.eq.s32.totalorder %v2595_v5, %v402_v8  ;;  %vm647_vm15 = vcmp.eq.s32.totalorder %v2595_v5, %v501_v63 }
 0x124   : >> { %1828 = vmatmul.msk.f32.gmra.mxu1 %vm574_vm0, %v2102_v6  ;;  %1861 = vmatmul.msk.f32.gmra.mxu3 %vm640_vm1, %v2102_v6  ;;  %vm582_vm0 = vcmp.eq.s32.totalorder %v2597_v0, %v402_v8  ;;  %vm648_vm1 = vcmp.eq.s32.totalorder %v2597_v0, %v501_v63  ;;  %v513_v63 = vpop.permute.xlu2 %512 }
 0x129   : >> { %v408_v2 = vpop.permute.xlu0 %407  ;;  %v507_v3 = vpop.permute.xlu1 %506 }
 0x12b   : >> { %1765 = vmatmul.msk.f32.gmra.mxu0 %vm575_vm2, %v2102_v6  ;;  %1798 = vmatmul.msk.f32.gmra.mxu2 %vm641_vm3, %v2102_v6  ;;  %vm583_vm2 = vcmp.eq.s32.totalorder %v2595_v5, %v405_v1  ;;  %vm649_vm3 = vcmp.eq.s32.totalorder %v2595_v5, %v504_v9 }
 0x12c   : >> { %1829 = vmatmul.msk.f32.gmra.mxu1 %vm576_vm4, %v2102_v6  ;;  %1862 = vmatmul.msk.f32.gmra.mxu3 %vm642_vm5, %v2102_v6  ;;  %vm584_vm4 = vcmp.eq.s32.totalorder %v2597_v0, %v405_v1  ;;  %vm650_vm5 = vcmp.eq.s32.totalorder %v2597_v0, %v504_v9 }
 0x131   : >> { %v510_v7 = vpop.permute.xlu0 %509  ;;  %v414_v8 = vpop.permute.xlu1 %413 }
 0x133   : >> { %1766 = vmatmul.msk.f32.gmra.mxu0 %vm577_vm6, %v2102_v6  ;;  %1799 = vmatmul.msk.f32.gmra.mxu2 %vm643_vm7, %v2102_v6  ;;  %vm585_vm6 = vcmp.eq.s32.totalorder %v2595_v5, %v408_v2  ;;  %vm651_vm7 = vcmp.eq.s32.totalorder %v2595_v5, %v507_v3 }
 0x134   : >> { %1830 = vmatmul.msk.f32.gmra.mxu1 %vm578_vm8, %v2102_v6  ;;  %1863 = vmatmul.msk.f32.gmra.mxu3 %vm644_vm9, %v2102_v6  ;;  %vm586_vm8 = vcmp.eq.s32.totalorder %v2597_v0, %v408_v2  ;;  %vm652_vm9 = vcmp.eq.s32.totalorder %v2597_v0, %v507_v3  ;;  %v329_v2 = vld [vmem:[%s2182_s3 + $0x100] sm:$0xff] }
 0x139   : >> { %v417_v1 = vpop.permute.xlu0 %416 }
 0x13b   : >> { %1767 = vmatmul.msk.f32.gmra.mxu0 %vm579_vm10, %v2102_v6  ;;  %1800 = vmatmul.msk.f32.gmra.mxu2 %vm645_vm11, %v2102_v6  ;;  %vm587_vm10 = vcmp.eq.s32.totalorder %v2595_v5, %v411_v4  ;;  %vm653_vm11 = vcmp.eq.s32.totalorder %v2595_v5, %v510_v7 }
 0x13c   : >> { %1831 = vmatmul.msk.f32.gmra.mxu1 %vm580_vm12, %v2102_v6  ;;  %1864 = vmatmul.msk.f32.gmra.mxu3 %vm646_vm13, %v2102_v6  ;;  %vm588_vm12 = vcmp.eq.s32.totalorder %v2597_v0, %v411_v4  ;;  %vm654_vm13 = vcmp.eq.s32.totalorder %v2597_v0, %v510_v7  ;;  %v516_v4 = vpop.permute.xlu1 %515 }
 0x143   : >> { %1768 = vmatmul.msk.f32.gmra.mxu0 %vm581_vm14, %v2102_v6  ;;  %1801 = vmatmul.msk.f32.gmra.mxu2 %vm647_vm15, %v2102_v6  ;;  %vm589_vm14 = vcmp.eq.s32.totalorder %v2595_v5, %v414_v8  ;;  %vm655_vm15 = vcmp.eq.s32.totalorder %v2595_v5, %v513_v63 }
 0x144   : >> { %1832 = vmatmul.msk.f32.gmra.mxu1 %vm582_vm0, %v2102_v6  ;;  %1865 = vmatmul.msk.f32.gmra.mxu3 %vm648_vm1, %v2102_v6  ;;  %vm590_vm0 = vcmp.eq.s32.totalorder %v2597_v0, %v414_v8  ;;  %vm656_vm1 = vcmp.eq.s32.totalorder %v2597_v0, %v513_v63 }
 0x14b   : >> { %1769 = vmatmul.msk.f32.gmra.mxu0 %vm583_vm2, %v2102_v6  ;;  %1802 = vmatmul.msk.f32.gmra.mxu2 %vm649_vm3, %v2102_v6  ;;  %vm591_vm2 = vcmp.eq.s32.totalorder %v2595_v5, %v417_v1  ;;  %vm657_vm3 = vcmp.eq.s32.totalorder %v2595_v5, %v516_v4 }
 0x14c   : >> { %1833 = vmatmul.msk.f32.gmra.mxu1 %vm584_vm4, %v2102_v6  ;;  %1866 = vmatmul.msk.f32.gmra.mxu3 %vm650_vm5, %v2102_v6  ;;  %vm592_vm4 = vcmp.eq.s32.totalorder %v2597_v0, %v417_v1  ;;  %vm658_vm5 = vcmp.eq.s32.totalorder %v2597_v0, %v516_v4 }
 0x153   : >> { %1770 = vmatmul.msk.f32.gmra.mxu0 %vm585_vm6, %v2102_v6  ;;  %1803 = vmatmul.msk.f32.gmra.mxu2 %vm651_vm7, %v2102_v6 }
 0x154   : >> { %1834 = vmatmul.msk.f32.gmra.mxu1 %vm586_vm8, %v2102_v6  ;;  %1867 = vmatmul.msk.f32.gmra.mxu3 %vm652_vm9, %v2102_v6 }
 0x15b   : >> { %1771 = vmatmul.msk.f32.gmra.mxu0 %vm587_vm10, %v2102_v6  ;;  %1804 = vmatmul.msk.f32.gmra.mxu2 %vm653_vm11, %v2102_v6 }
 0x15c   : >> { %1835 = vmatmul.msk.f32.gmra.mxu1 %vm588_vm12, %v2102_v6  ;;  %1868 = vmatmul.msk.f32.gmra.mxu3 %vm654_vm13, %v2102_v6 }
 0x163   : >> { %1772 = vmatmul.msk.f32.gmra.mxu0 %vm589_vm14, %v2102_v6  ;;  %1805 = vmatmul.msk.f32.gmra.mxu2 %vm655_vm15, %v2102_v6 }
 0x164   : >> { %1836 = vmatmul.msk.f32.gmra.mxu1 %vm590_vm0, %v2102_v6  ;;  %1869 = vmatmul.msk.f32.gmra.mxu3 %vm656_vm1, %v2102_v6 }
 0x166   : >> { %v1089_v9 = vpop.f32.mrf.mxu2  ;;  %v1298_v3 = vpop.f32.mrf.mxu3 }
 0x167   : >> { %v1299_v7 = vadd.f32 %v1298_v3, %v1089_v9  ;;  %v519_v9 = vpop.permute.xlu0 %518 }
 0x168   : >> { %v993_v10 = vpop.f32.mrf.mxu0  ;;  %vm659_vm7 = vcmp.eq.s32.totalorder %v2595_v5, %v519_v9  ;;  %vm660_vm9 = vcmp.eq.s32.totalorder %v2597_v0, %v519_v9 }
 0x169   : >> { %v1426_v11 = vadd.f32 %v1299_v7, %v329_v2  ;;  %v1202_v13 = vpop.f32.mrf.mxu1 }
 0x16a   : >> { %v1203_v8 = vadd.f32 %v1202_v13, %v993_v10  ;;  %v420_v10 = vpop.permute.xlu2 %419 }
 0x16b   : >> { %1490 = vst [vmem:[%s2182_s3 + $0x100] sm:$0xff] %v1426_v11  ;;  %1773 = vmatmul.msk.f32.gmra.mxu0 %vm591_vm2, %v2102_v6  ;;  %1806 = vmatmul.msk.f32.gmra.mxu2 %vm657_vm3, %v2102_v6  ;;  %v330_v11 = vld [vmem:[%s2182_s3 + $0x108] sm:$0xff]  ;;  %vm593_vm6 = vcmp.eq.s32.totalorder %v2595_v5, %v420_v10  ;;  %vm594_vm8 = vcmp.eq.s32.totalorder %v2597_v0, %v420_v10 }
 0x16c   : >> { %v1394_v63 = vadd.f32 %v1203_v8, %v297_v12  ;;  %1837 = vmatmul.msk.f32.gmra.mxu1 %vm592_vm4, %v2102_v6  ;;  %1870 = vmatmul.msk.f32.gmra.mxu3 %vm658_vm5, %v2102_v6 }
 0x16e   : >> { %1458 = vst [vmem:[%s2182_s3] sm:$0xff] %v1394_v63  ;;  %v1092_v13 = vpop.f32.mrf.mxu2 }
 0x16f   : >> { %v1301_v2 = vpop.f32.mrf.mxu3 }
 0x170   : >> { %v1302_v3 = vadd.f32 %v1301_v2, %v1092_v13  ;;  %v996_v7 = vpop.f32.mrf.mxu0  ;;  %v331_v13 = vld [vmem:[%s2182_s3 + $0x110] sm:$0xff] }
 0x171   : >> { %v1205_v15 = vpop.f32.mrf.mxu1 }
 0x172   : >> { %v1427_v1 = vadd.f32 %v1302_v3, %v330_v11  ;;  %v1206_v4 = vadd.f32 %v1205_v15, %v996_v7  ;;  %v423_v15 = vpop.permute.xlu1 %422  ;;  %v522_v63 = vpop.permute.xlu2 %521  ;;  %v299_v7 = vld [vmem:[%s2182_s3 + $0x10] sm:$0xff] }
 0x173   : >> { %1774 = vmatmul.msk.f32.gmra.mxu0 %vm593_vm6, %v2102_v6  ;;  %1807 = vmatmul.msk.f32.gmra.mxu2 %vm659_vm7, %v2102_v6  ;;  %vm595_vm10 = vcmp.eq.s32.totalorder %v2595_v5, %v423_v15  ;;  %vm661_vm11 = vcmp.eq.s32.totalorder %v2595_v5, %v522_v63  ;;  %vm596_vm12 = vcmp.eq.s32.totalorder %v2597_v0, %v423_v15 }
 0x174   : >> { %1491 = vst [vmem:[%s2182_s3 + $0x108] sm:$0xff] %v1427_v1  ;;  %v1395_v12 = vadd.f32 %v1206_v4, %v298_v14  ;;  %1838 = vmatmul.msk.f32.gmra.mxu1 %vm594_vm8, %v2102_v6  ;;  %1871 = vmatmul.msk.f32.gmra.mxu3 %vm660_vm9, %v2102_v6  ;;  %vm662_vm13 = vcmp.eq.s32.totalorder %v2597_v0, %v522_v63  ;;  %v426_v1 = vpop.permute.xlu0 %425 }
 0x175   : >> { %vm597_vm14 = vcmp.eq.s32.totalorder %v2595_v5, %v426_v1  ;;  %vm598_vm0 = vcmp.eq.s32.totalorder %v2597_v0, %v426_v1 }
 0x176   : >> { %1459 = vst [vmem:[%s2182_s3 + $0x8] sm:$0xff] %v1395_v12  ;;  %v1095_v8 = vpop.f32.mrf.mxu2 }
 0x177   : >> { %v1304_v11 = vpop.f32.mrf.mxu3 }
 0x178   : >> { %v1305_v2 = vadd.f32 %v1304_v11, %v1095_v8  ;;  %v999_v3 = vpop.f32.mrf.mxu0  ;;  %v332_v8 = vld [vmem:[%s2182_s3 + $0x118] sm:$0xff] }
 0x179   : >> { %v1208_v10 = vpop.f32.mrf.mxu1 }
 0x17a   : >> { %v1428_v16 = vadd.f32 %v1305_v2, %v331_v13  ;;  %v1209_v9 = vadd.f32 %v1208_v10, %v999_v3  ;;  %v525_v12 = vpop.permute.xlu1 %524  ;;  %v300_v3 = vld [vmem:[%s2182_s3 + $0x18] sm:$0xff] }
 0x17b   : >> { %1775 = vmatmul.msk.f32.gmra.mxu0 %vm595_vm10, %v2102_v6  ;;  %1808 = vmatmul.msk.f32.gmra.mxu2 %vm661_vm11, %v2102_v6  ;;  %vm663_vm15 = vcmp.eq.s32.totalorder %v2595_v5, %v525_v12  ;;  %vm664_vm1 = vcmp.eq.s32.totalorder %v2597_v0, %v525_v12 }
 0x17c   : >> { %1492 = vst [vmem:[%s2182_s3 + $0x110] sm:$0xff] %v1428_v16  ;;  %v1396_v14 = vadd.f32 %v1209_v9, %v299_v7  ;;  %1839 = vmatmul.msk.f32.gmra.mxu1 %vm596_vm12, %v2102_v6  ;;  %1872 = vmatmul.msk.f32.gmra.mxu3 %vm662_vm13, %v2102_v6  ;;  %v429_v7 = vpop.permute.xlu2 %428 }
 0x17d   : >> { %vm599_vm2 = vcmp.eq.s32.totalorder %v2595_v5, %v429_v7  ;;  %vm600_vm4 = vcmp.eq.s32.totalorder %v2597_v0, %v429_v7 }
 0x17e   : >> { %1460 = vst [vmem:[%s2182_s3 + $0x10] sm:$0xff] %v1396_v14  ;;  %v1098_v4 = vpop.f32.mrf.mxu2  ;;  %v528_v14 = vpop.permute.xlu0 %527 }
 0x17f   : >> { %v1307_v13 = vpop.f32.mrf.mxu3  ;;  %vm665_vm3 = vcmp.eq.s32.totalorder %v2595_v5, %v528_v14  ;;  %vm666_vm5 = vcmp.eq.s32.totalorder %v2597_v0, %v528_v14 }
 0x180   : >> { %v1308_v11 = vadd.f32 %v1307_v13, %v1098_v4  ;;  %v1002_v2 = vpop.f32.mrf.mxu0  ;;  %v333_v4 = vld [vmem:[%s2182_s3 + $0x120] sm:$0xff] }
 0x181   : >> { %v1211_v15 = vpop.f32.mrf.mxu1 }
 0x182   : >> { %v1429_v10 = vadd.f32 %v1308_v11, %v332_v8  ;;  %v1212_v16 = vadd.f32 %v1211_v15, %v1002_v2  ;;  %v301_v2 = vld [vmem:[%s2182_s3 + $0x20] sm:$0xff] }
 0x183   : >> { %1776 = vmatmul.msk.f32.gmra.mxu0 %vm597_vm14, %v2102_v6  ;;  %1809 = vmatmul.msk.f32.gmra.mxu2 %vm663_vm15, %v2102_v6 }
 0x184   : >> { %1493 = vst [vmem:[%s2182_s3 + $0x118] sm:$0xff] %v1429_v10  ;;  %v1397_v63 = vadd.f32 %v1212_v16, %v300_v3  ;;  %1840 = vmatmul.msk.f32.gmra.mxu1 %vm598_vm0, %v2102_v6  ;;  %1873 = vmatmul.msk.f32.gmra.mxu3 %vm664_vm1, %v2102_v6  ;;  %v432_v10 = vpop.permute.xlu1 %431 }
 0x185   : >> { %vm601_vm6 = vcmp.eq.s32.totalorder %v2595_v5, %v432_v10  ;;  %vm602_vm8 = vcmp.eq.s32.totalorder %v2597_v0, %v432_v10 }
 0x186   : >> { %1461 = vst [vmem:[%s2182_s3 + $0x18] sm:$0xff] %v1397_v63  ;;  %v1101_v9 = vpop.f32.mrf.mxu2  ;;  %v531_v63 = vpop.permute.xlu2 %530 }
 0x187   : >> { %v1310_v8 = vpop.f32.mrf.mxu3  ;;  %vm667_vm7 = vcmp.eq.s32.totalorder %v2595_v5, %v531_v63  ;;  %vm668_vm9 = vcmp.eq.s32.totalorder %v2597_v0, %v531_v63 }
 0x188   : >> { %v1311_v13 = vadd.f32 %v1310_v8, %v1101_v9  ;;  %v1005_v11 = vpop.f32.mrf.mxu0  ;;  %v334_v9 = vld [vmem:[%s2182_s3 + $0x128] sm:$0xff] }
 0x189   : >> { %v1214_v1 = vpop.f32.mrf.mxu1 }
 0x18a   : >> { %v1430_v15 = vadd.f32 %v1311_v13, %v333_v4  ;;  %v1215_v12 = vadd.f32 %v1214_v1, %v1005_v11  ;;  %v302_v11 = vld [vmem:[%s2182_s3 + $0x28] sm:$0xff] }
 0x18b   : >> { %1777 = vmatmul.msk.f32.gmra.mxu0 %vm599_vm2, %v2102_v6  ;;  %1810 = vmatmul.msk.f32.gmra.mxu2 %vm665_vm3, %v2102_v6 }
 0x18c   : >> { %1494 = vst [vmem:[%s2182_s3 + $0x120] sm:$0xff] %v1430_v15  ;;  %v1398_v3 = vadd.f32 %v1215_v12, %v301_v2  ;;  %1841 = vmatmul.msk.f32.gmra.mxu1 %vm600_vm4, %v2102_v6  ;;  %1874 = vmatmul.msk.f32.gmra.mxu3 %vm666_vm5, %v2102_v6  ;;  %v435_v15 = vpop.permute.xlu0 %434 }
 0x18d   : >> { %vm603_vm10 = vcmp.eq.s32.totalorder %v2595_v5, %v435_v15  ;;  %vm604_vm12 = vcmp.eq.s32.totalorder %v2597_v0, %v435_v15 }
 0x18e   : >> { %1462 = vst [vmem:[%s2182_s3 + $0x20] sm:$0xff] %v1398_v3  ;;  %v1104_v16 = vpop.f32.mrf.mxu2  ;;  %v534_v3 = vpop.permute.xlu1 %533 }
 0x18f   : >> { %v1313_v4 = vpop.f32.mrf.mxu3  ;;  %vm669_vm11 = vcmp.eq.s32.totalorder %v2595_v5, %v534_v3  ;;  %vm670_vm13 = vcmp.eq.s32.totalorder %v2597_v0, %v534_v3 }
 0x190   : >> { %v1314_v8 = vadd.f32 %v1313_v4, %v1104_v16  ;;  %v1008_v13 = vpop.f32.mrf.mxu0  ;;  %v335_v16 = vld [vmem:[%s2182_s3 + $0x130] sm:$0xff] }
 0x191   : >> { %v1217_v7 = vpop.f32.mrf.mxu1 }
 0x192   : >> { %v1431_v1 = vadd.f32 %v1314_v8, %v334_v9  ;;  %v1218_v14 = vadd.f32 %v1217_v7, %v1008_v13  ;;  %v303_v13 = vld [vmem:[%s2182_s3 + $0x30] sm:$0xff] }
 0x193   : >> { %1778 = vmatmul.msk.f32.gmra.mxu0 %vm601_vm6, %v2102_v6  ;;  %1811 = vmatmul.msk.f32.gmra.mxu2 %vm667_vm7, %v2102_v6 }
 0x194   : >> { %1495 = vst [vmem:[%s2182_s3 + $0x128] sm:$0xff] %v1431_v1  ;;  %v1399_v2 = vadd.f32 %v1218_v14, %v302_v11  ;;  %1842 = vmatmul.msk.f32.gmra.mxu1 %vm602_vm8, %v2102_v6  ;;  %1875 = vmatmul.msk.f32.gmra.mxu3 %vm668_vm9, %v2102_v6  ;;  %v438_v1 = vpop.permute.xlu2 %437 }
 0x195   : >> { %vm605_vm15 = vcmp.eq.s32.totalorder %v2595_v5, %v438_v1  ;;  %vm606_vm1 = vcmp.eq.s32.totalorder %v2597_v0, %v438_v1 }
 0x196   : >> { %1463 = vst [vmem:[%s2182_s3 + $0x28] sm:$0xff] %v1399_v2  ;;  %v1107_v12 = vpop.f32.mrf.mxu2  ;;  %v537_v2 = vpop.permute.xlu0 %536 }
 0x197   : >> { %v1316_v9 = vpop.f32.mrf.mxu3  ;;  %vm671_vm14 = vcmp.eq.s32.totalorder %v2595_v5, %v537_v2  ;;  %vm672_vm0 = vcmp.eq.s32.totalorder %v2597_v0, %v537_v2 }
 0x198   : >> { %v1317_v4 = vadd.f32 %v1316_v9, %v1107_v12  ;;  %v1011_v8 = vpop.f32.mrf.mxu0  ;;  %v336_v12 = vld [vmem:[%s2182_s3 + $0x138] sm:$0xff] }
 0x199   : >> { %v1220_v10 = vpop.f32.mrf.mxu1 }
 0x19a   : >> { %v1432_v7 = vadd.f32 %v1317_v4, %v335_v16  ;;  %v1221_v63 = vadd.f32 %v1220_v10, %v1011_v8  ;;  %v304_v8 = vld [vmem:[%s2182_s3 + $0x38] sm:$0xff] }
 0x19b   : >> { %1779 = vmatmul.msk.f32.gmra.mxu0 %vm603_vm10, %v2102_v6  ;;  %1812 = vmatmul.msk.f32.gmra.mxu2 %vm669_vm11, %v2102_v6 }
 0x19c   : >> { %1496 = vst [vmem:[%s2182_s3 + $0x130] sm:$0xff] %v1432_v7  ;;  %v1400_v11 = vadd.f32 %v1221_v63, %v303_v13  ;;  %1843 = vmatmul.msk.f32.gmra.mxu1 %vm604_vm12, %v2102_v6  ;;  %1876 = vmatmul.msk.f32.gmra.mxu3 %vm670_vm13, %v2102_v6  ;;  %v441_v7 = vpop.permute.xlu1 %440 }
 0x19d   : >> { %vm607_vm3 = vcmp.eq.s32.totalorder %v2595_v5, %v441_v7  ;;  %vm608_vm5 = vcmp.eq.s32.totalorder %v2597_v0, %v441_v7  ;;  %v306_v7 = vld [vmem:[%s2182_s3 + $0x48] sm:$0xff] }
 0x19e   : >> { %1464 = vst [vmem:[%s2182_s3 + $0x30] sm:$0xff] %v1400_v11  ;;  %v1110_v14 = vpop.f32.mrf.mxu2  ;;  %v540_v11 = vpop.permute.xlu2 %539 }
 0x19f   : >> { %v1319_v16 = vpop.f32.mrf.mxu3  ;;  %vm673_vm2 = vcmp.eq.s32.totalorder %v2595_v5, %v540_v11  ;;  %vm674_vm4 = vcmp.eq.s32.totalorder %v2597_v0, %v540_v11 }
 0x1a0   : >> { %v1320_v9 = vadd.f32 %v1319_v16, %v1110_v14  ;;  %v1014_v4 = vpop.f32.mrf.mxu0  ;;  %v337_v14 = vld [vmem:[%s2182_s3 + $0x140] sm:$0xff] }
 0x1a1   : >> { %v1223_v15 = vpop.f32.mrf.mxu1 }
 0x1a2   : >> { %v1433_v3 = vadd.f32 %v1320_v9, %v336_v12  ;;  %v1224_v13 = vadd.f32 %v1223_v15, %v1014_v4  ;;  %v305_v9 = vld [vmem:[%s2182_s3 + $0x40] sm:$0xff] }
 0x1a3   : >> { %1780 = vmatmul.msk.f32.gmra.mxu0 %vm605_vm15, %v2102_v6  ;;  %1813 = vmatmul.msk.f32.gmra.mxu2 %vm671_vm14, %v2102_v6 }
 0x1a4   : >> { %1497 = vst [vmem:[%s2182_s3 + $0x138] sm:$0xff] %v1433_v3  ;;  %v1401_v10 = vadd.f32 %v1224_v13, %v304_v8  ;;  %1844 = vmatmul.msk.f32.gmra.mxu1 %vm606_vm1, %v2102_v6  ;;  %1877 = vmatmul.msk.f32.gmra.mxu3 %vm672_vm0, %v2102_v6  ;;  %v444_v3 = vpop.permute.xlu0 %443 }
 0x1a5   : >> { %vm609_vm7 = vcmp.eq.s32.totalorder %v2595_v5, %v444_v3  ;;  %vm610_vm9 = vcmp.eq.s32.totalorder %v2597_v0, %v444_v3  ;;  %v307_v3 = vld [vmem:[%s2182_s3 + $0x50] sm:$0xff] }
 0x1a6   : >> { %1465 = vst [vmem:[%s2182_s3 + $0x38] sm:$0xff] %v1401_v10  ;;  %v1113_v63 = vpop.f32.mrf.mxu2  ;;  %v543_v10 = vpop.permute.xlu1 %542 }
 0x1a7   : >> { %v1322_v2 = vpop.f32.mrf.mxu3  ;;  %vm675_vm6 = vcmp.eq.s32.totalorder %v2595_v5, %v543_v10  ;;  %vm676_vm8 = vcmp.eq.s32.totalorder %v2597_v0, %v543_v10 }
 0x1a8   : >> { %v1323_v12 = vadd.f32 %v1322_v2, %v1113_v63  ;;  %v1017_v16 = vpop.f32.mrf.mxu0  ;;  %v338_v63 = vld [vmem:[%s2182_s3 + $0x148] sm:$0xff] }
 0x1a9   : >> { %v1226_v4 = vpop.f32.mrf.mxu1 }
 0x1aa   : >> { %v1434_v1 = vadd.f32 %v1323_v12, %v337_v14  ;;  %v1227_v8 = vadd.f32 %v1226_v4, %v1017_v16 }
 0x1ab   : >> { %1781 = vmatmul.msk.f32.gmra.mxu0 %vm607_vm3, %v2102_v6  ;;  %1814 = vmatmul.msk.f32.gmra.mxu2 %vm673_vm2, %v2102_v6 }
 0x1ac   : >> { %1498 = vst [vmem:[%s2182_s3 + $0x140] sm:$0xff] %v1434_v1  ;;  %v1402_v15 = vadd.f32 %v1227_v8, %v305_v9  ;;  %1845 = vmatmul.msk.f32.gmra.mxu1 %vm608_vm5, %v2102_v6  ;;  %1878 = vmatmul.msk.f32.gmra.mxu3 %vm674_vm4, %v2102_v6  ;;  %v447_v1 = vpop.permute.xlu2 %446 }
 0x1ad   : >> { %vm611_vm10 = vcmp.eq.s32.totalorder %v2595_v5, %v447_v1  ;;  %vm612_vm12 = vcmp.eq.s32.totalorder %v2597_v0, %v447_v1 }
 0x1ae   : >> { %1466 = vst [vmem:[%s2182_s3 + $0x40] sm:$0xff] %v1402_v15  ;;  %v1116_v13 = vpop.f32.mrf.mxu2  ;;  %v546_v15 = vpop.permute.xlu0 %545 }
 0x1af   : >> { %v1325_v11 = vpop.f32.mrf.mxu3  ;;  %vm677_vm11 = vcmp.eq.s32.totalorder %v2595_v5, %v546_v15  ;;  %vm678_vm13 = vcmp.eq.s32.totalorder %v2597_v0, %v546_v15  ;;  %v308_v15 = vld [vmem:[%s2182_s3 + $0x58] sm:$0xff] }
 0x1b0   : >> { %v1326_v14 = vadd.f32 %v1325_v11, %v1116_v13  ;;  %v1020_v2 = vpop.f32.mrf.mxu0  ;;  %v339_v13 = vld [vmem:[%s2182_s3 + $0x150] sm:$0xff] }
 0x1b1   : >> { %v1229_v12 = vpop.f32.mrf.mxu1 }
 0x1b2   : >> { %v1435_v16 = vadd.f32 %v1326_v14, %v338_v63  ;;  %v1230_v9 = vadd.f32 %v1229_v12, %v1020_v2 }
 0x1b3   : >> { %1782 = vmatmul.msk.f32.gmra.mxu0 %vm609_vm7, %v2102_v6  ;;  %1815 = vmatmul.msk.f32.gmra.mxu2 %vm675_vm6, %v2102_v6 }
 0x1b4   : >> { %1499 = vst [vmem:[%s2182_s3 + $0x148] sm:$0xff] %v1435_v16  ;;  %v1403_v4 = vadd.f32 %v1230_v9, %v306_v7  ;;  %1846 = vmatmul.msk.f32.gmra.mxu1 %vm610_vm9, %v2102_v6  ;;  %1879 = vmatmul.msk.f32.gmra.mxu3 %vm676_vm8, %v2102_v6  ;;  %v450_v16 = vpop.permute.xlu1 %449 }
 0x1b5   : >> { %vm613_vm15 = vcmp.eq.s32.totalorder %v2595_v5, %v450_v16  ;;  %vm614_vm1 = vcmp.eq.s32.totalorder %v2597_v0, %v450_v16  ;;  %v309_v16 = vld [vmem:[%s2182_s3 + $0x60] sm:$0xff] }
 0x1b6   : >> { %1467 = vst [vmem:[%s2182_s3 + $0x48] sm:$0xff] %v1403_v4  ;;  %v1119_v8 = vpop.f32.mrf.mxu2  ;;  %v549_v4 = vpop.permute.xlu2 %548 }
 0x1b7   : >> { %v1328_v10 = vpop.f32.mrf.mxu3  ;;  %vm679_vm14 = vcmp.eq.s32.totalorder %v2595_v5, %v549_v4  ;;  %vm680_vm0 = vcmp.eq.s32.totalorder %v2597_v0, %v549_v4 }
 0x1b8   : >> { %v1329_v63 = vadd.f32 %v1328_v10, %v1119_v8  ;;  %v1023_v11 = vpop.f32.mrf.mxu0  ;;  %v340_v8 = vld [vmem:[%s2182_s3 + $0x158] sm:$0xff] }
 0x1b9   : >> { %v1232_v14 = vpop.f32.mrf.mxu1 }
 0x1ba   : >> { %v1436_v2 = vadd.f32 %v1329_v63, %v339_v13  ;;  %v1233_v7 = vadd.f32 %v1232_v14, %v1023_v11 }
 0x1bb   : >> { %1783 = vmatmul.msk.f32.gmra.mxu0 %vm611_vm10, %v2102_v6  ;;  %1816 = vmatmul.msk.f32.gmra.mxu2 %vm677_vm11, %v2102_v6 }
 0x1bc   : >> { %1500 = vst [vmem:[%s2182_s3 + $0x150] sm:$0xff] %v1436_v2  ;;  %v1404_v12 = vadd.f32 %v1233_v7, %v307_v3  ;;  %1847 = vmatmul.msk.f32.gmra.mxu1 %vm612_vm12, %v2102_v6  ;;  %1880 = vmatmul.msk.f32.gmra.mxu3 %vm678_vm13, %v2102_v6  ;;  %v453_v2 = vpop.permute.xlu0 %452 }
 0x1bd   : >> { %vm615_vm3 = vcmp.eq.s32.totalorder %v2595_v5, %v453_v2  ;;  %vm616_vm5 = vcmp.eq.s32.totalorder %v2597_v0, %v453_v2  ;;  %v310_v2 = vld [vmem:[%s2182_s3 + $0x68] sm:$0xff] }
 0x1be   : >> { %1468 = vst [vmem:[%s2182_s3 + $0x50] sm:$0xff] %v1404_v12  ;;  %v1122_v9 = vpop.f32.mrf.mxu2  ;;  %v552_v12 = vpop.permute.xlu1 %551 }
 0x1bf   : >> { %v1331_v1 = vpop.f32.mrf.mxu3  ;;  %vm681_vm2 = vcmp.eq.s32.totalorder %v2595_v5, %v552_v12  ;;  %vm682_vm4 = vcmp.eq.s32.totalorder %v2597_v0, %v552_v12 }
 0x1c0   : >> { %v1332_v13 = vadd.f32 %v1331_v1, %v1122_v9  ;;  %v1026_v10 = vpop.f32.mrf.mxu0  ;;  %v341_v9 = vld [vmem:[%s2182_s3 + $0x160] sm:$0xff] }
 0x1c1   : >> { %v1235_v63 = vpop.f32.mrf.mxu1 }
 0x1c2   : >> { %v1437_v11 = vadd.f32 %v1332_v13, %v340_v8  ;;  %v1236_v3 = vadd.f32 %v1235_v63, %v1026_v10  ;;  %v456_v63 = vpop.permute.xlu2 %455 }
 0x1c3   : >> { %1784 = vmatmul.msk.f32.gmra.mxu0 %vm613_vm15, %v2102_v6  ;;  %1817 = vmatmul.msk.f32.gmra.mxu2 %vm679_vm14, %v2102_v6  ;;  %vm617_vm6 = vcmp.eq.s32.totalorder %v2595_v5, %v456_v63  ;;  %vm618_vm8 = vcmp.eq.s32.totalorder %v2597_v0, %v456_v63 }
 0x1c4   : >> { %1501 = vst [vmem:[%s2182_s3 + $0x158] sm:$0xff] %v1437_v11  ;;  %v1405_v14 = vadd.f32 %v1236_v3, %v308_v15  ;;  %1848 = vmatmul.msk.f32.gmra.mxu1 %vm614_vm1, %v2102_v6  ;;  %1881 = vmatmul.msk.f32.gmra.mxu3 %vm680_vm0, %v2102_v6 }
 0x1c6   : >> { %1469 = vst [vmem:[%s2182_s3 + $0x58] sm:$0xff] %v1405_v14  ;;  %v1125_v7 = vpop.f32.mrf.mxu2  ;;  %v555_v14 = vpop.permute.xlu0 %554 }
 0x1c7   : >> { %v1334_v4 = vpop.f32.mrf.mxu3  ;;  %vm683_vm7 = vcmp.eq.s32.totalorder %v2595_v5, %v555_v14  ;;  %vm684_vm9 = vcmp.eq.s32.totalorder %v2597_v0, %v555_v14 }
 0x1c8   : >> { %v1335_v8 = vadd.f32 %v1334_v4, %v1125_v7  ;;  %v1029_v1 = vpop.f32.mrf.mxu0  ;;  %v342_v7 = vld [vmem:[%s2182_s3 + $0x168] sm:$0xff] }
 0x1c9   : >> { %v1238_v13 = vpop.f32.mrf.mxu1 }
 0x1ca   : >> { %v1438_v10 = vadd.f32 %v1335_v8, %v341_v9  ;;  %v1239_v15 = vadd.f32 %v1238_v13, %v1029_v1 }
 0x1cb   : >> { %1785 = vmatmul.msk.f32.gmra.mxu0 %vm615_vm3, %v2102_v6  ;;  %1818 = vmatmul.msk.f32.gmra.mxu2 %vm681_vm2, %v2102_v6 }
 0x1cc   : >> { %1502 = vst [vmem:[%s2182_s3 + $0x160] sm:$0xff] %v1438_v10  ;;  %v1406_v11 = vadd.f32 %v1239_v15, %v309_v16  ;;  %1849 = vmatmul.msk.f32.gmra.mxu1 %vm616_vm5, %v2102_v6  ;;  %1882 = vmatmul.msk.f32.gmra.mxu3 %vm682_vm4, %v2102_v6  ;;  %v558_v10 = vpop.permute.xlu2 %557 }
 0x1cd   : >> { %vm685_vm10 = vcmp.eq.s32.totalorder %v2595_v5, %v558_v10  ;;  %vm686_vm12 = vcmp.eq.s32.totalorder %v2597_v0, %v558_v10 }
 0x1ce   : >> { %1470 = vst [vmem:[%s2182_s3 + $0x60] sm:$0xff] %v1406_v11  ;;  %v1128_v3 = vpop.f32.mrf.mxu2  ;;  %v459_v11 = vpop.permute.xlu1 %458 }
 0x1cf   : >> { %v1337_v12 = vpop.f32.mrf.mxu3  ;;  %vm619_vm11 = vcmp.eq.s32.totalorder %v2595_v5, %v459_v11  ;;  %vm620_vm13 = vcmp.eq.s32.totalorder %v2597_v0, %v459_v11 }
 0x1d0   : >> { %v1338_v9 = vadd.f32 %v1337_v12, %v1128_v3  ;;  %v1032_v4 = vpop.f32.mrf.mxu0  ;;  %v343_v3 = vld [vmem:[%s2182_s3 + $0x170] sm:$0xff] }
 0x1d1   : >> { %v1241_v8 = vpop.f32.mrf.mxu1  ;;  %v311_v12 = vld [vmem:[%s2182_s3 + $0x70] sm:$0xff] }
 0x1d2   : >> { %v1439_v1 = vadd.f32 %v1338_v9, %v342_v7  ;;  %v1242_v16 = vadd.f32 %v1241_v8, %v1032_v4 }
 0x1d3   : >> { %1786 = vmatmul.msk.f32.gmra.mxu0 %vm617_vm6, %v2102_v6  ;;  %1819 = vmatmul.msk.f32.gmra.mxu2 %vm683_vm7, %v2102_v6 }
 0x1d4   : >> { %1503 = vst [vmem:[%s2182_s3 + $0x168] sm:$0xff] %v1439_v1  ;;  %v1407_v13 = vadd.f32 %v1242_v16, %v310_v2  ;;  %1850 = vmatmul.msk.f32.gmra.mxu1 %vm618_vm8, %v2102_v6  ;;  %1883 = vmatmul.msk.f32.gmra.mxu3 %vm684_vm9, %v2102_v6  ;;  %v462_v16 = vpop.permute.xlu0 %461 }
 0x1d5   : >> { %vm621_vm14 = vcmp.eq.s32.totalorder %v2595_v5, %v462_v16  ;;  %vm622_vm15 = vcmp.eq.s32.totalorder %v2597_v0, %v462_v16 }
 0x1d6   : >> { %1471 = vst [vmem:[%s2182_s3 + $0x68] sm:$0xff] %v1407_v13  ;;  %v1131_v15 = vpop.f32.mrf.mxu2  ;;  %v344_v13 = vld [vmem:[%s2182_s3 + $0x178] sm:$0xff] }
 0x1d7   : >> { %v1340_v63 = vpop.f32.mrf.mxu3 }
 0x1d8   : >> { %v1341_v7 = vadd.f32 %v1340_v63, %v1131_v15  ;;  %v1035_v14 = vpop.f32.mrf.mxu0 }
 0x1d9   : >> { %v1244_v9 = vpop.f32.mrf.mxu1 }
 0x1da   : >> { %v1440_v4 = vadd.f32 %v1341_v7, %v343_v3  ;;  %v1245_v2 = vadd.f32 %v1244_v9, %v1035_v14  ;;  %v312_v3 = vld [vmem:[%s2182_s3 + $0x78] sm:$0xff] }
 0x1db   : >> { %1787 = vmatmul.msk.f32.gmra.mxu0 %vm619_vm11, %v2102_v6  ;;  %1820 = vmatmul.msk.f32.gmra.mxu2 %vm685_vm10, %v2102_v6 }
 0x1dc   : >> { %1504 = vst [vmem:[%s2182_s3 + $0x170] sm:$0xff] %v1440_v4  ;;  %v1408_v8 = vadd.f32 %v1245_v2, %v311_v12  ;;  %1851 = vmatmul.msk.f32.gmra.mxu1 %vm620_vm13, %v2102_v6  ;;  %1884 = vmatmul.msk.f32.gmra.mxu3 %vm686_vm12, %v2102_v6  ;;  %v345_v4 = vld [vmem:[%s2182_s3 + $0x180] sm:$0xff] }
 0x1de   : >> { %1472 = vst [vmem:[%s2182_s3 + $0x70] sm:$0xff] %v1408_v8  ;;  %v1134_v1 = vpop.f32.mrf.mxu2 }
 0x1df   : >> { %v1343_v10 = vpop.f32.mrf.mxu3 }
 0x1e0   : >> { %v1344_v15 = vadd.f32 %v1343_v10, %v1134_v1  ;;  %v1038_v11 = vpop.f32.mrf.mxu0  ;;  %v313_v1 = vld [vmem:[%s2182_s3 + $0x80] sm:$0xff] }
 0x1e1   : >> { %v1247_v63 = vpop.f32.mrf.mxu1 }
 0x1e2   : >> { %v1441_v7 = vadd.f32 %v1344_v15, %v344_v13  ;;  %v1248_v14 = vadd.f32 %v1247_v63, %v1038_v11  ;;  %v346_v11 = vld [vmem:[%s2182_s3 + $0x188] sm:$0xff] }
 0x1e3   : >> { %1788 = vmatmul.msk.f32.gmra.mxu0 %vm621_vm14, %v2102_v6 }
 0x1e4   : >> { %1505 = vst [vmem:[%s2182_s3 + $0x178] sm:$0xff] %v1441_v7  ;;  %v1409_v12 = vadd.f32 %v1248_v14, %v312_v3  ;;  %1852 = vmatmul.msk.f32.gmra.mxu1 %vm622_vm15, %v2102_v6  ;;  %v314_v7 = vld [vmem:[%s2182_s3 + $0x88] sm:$0xff] }
 0x1e6   : >> { %1473 = vst [vmem:[%s2182_s3 + $0x78] sm:$0xff] %v1409_v12  ;;  %v1137_v9 = vpop.f32.mrf.mxu2 }
 0x1e7   : >> { %v1346_v2 = vpop.f32.mrf.mxu3 }
 0x1e8   : >> { %v1347_v8 = vadd.f32 %v1346_v2, %v1137_v9  ;;  %v1041_v5 = vpop.f32.mrf.mxu0 }
 0x1e9   : >> { %v1250_v13 = vpop.f32.mrf.mxu1 }
 0x1ea   : >> { %v1442_v10 = vadd.f32 %v1347_v8, %v345_v4  ;;  %v1251_v0 = vadd.f32 %v1250_v13, %v1041_v5  ;;  %v347_v8 = vld [vmem:[%s2182_s3 + $0x190] sm:$0xff] }
 0x1ec   : >> { %1506 = vst [vmem:[%s2182_s3 + $0x180] sm:$0xff] %v1442_v10  ;;  %v1410_v16 = vadd.f32 %v1251_v0, %v313_v1  ;;  %v315_v10 = vld [vmem:[%s2182_s3 + $0x90] sm:$0xff] }
 0x1ee   : >> { %1474 = vst [vmem:[%s2182_s3 + $0x80] sm:$0xff] %v1410_v16  ;;  %v1140_v15 = vpop.f32.mrf.mxu2 }
 0x1ef   : >> { %v1349_v6 = vpop.f32.mrf.mxu3 }
 0x1f0   : >> { %v1350_v3 = vadd.f32 %v1349_v6, %v1140_v15  ;;  %v1044_v63 = vpop.f32.mrf.mxu0 }
 0x1f1   : >> { %v1253_v14 = vpop.f32.mrf.mxu1 }
 0x1f2   : >> { %v1443_v12 = vadd.f32 %v1350_v3, %v346_v11  ;;  %v1254_v9 = vadd.f32 %v1253_v14, %v1044_v63  ;;  %v348_v3 = vld [vmem:[%s2182_s3 + $0x198] sm:$0xff] }
 0x1f4   : >> { %1507 = vst [vmem:[%s2182_s3 + $0x188] sm:$0xff] %v1443_v12  ;;  %v1411_v4 = vadd.f32 %v1254_v9, %v314_v7  ;;  %v316_v12 = vld [vmem:[%s2182_s3 + $0x98] sm:$0xff] }
 0x1f6   : >> { %1475 = vst [vmem:[%s2182_s3 + $0x88] sm:$0xff] %v1411_v4  ;;  %v1143_v2 = vpop.f32.mrf.mxu2 }
 0x1f7   : >> { %v1352_v5 = vpop.f32.mrf.mxu3 }
 0x1f8   : >> { %v1353_v1 = vadd.f32 %v1352_v5, %v1143_v2  ;;  %v1047_v13 = vpop.f32.mrf.mxu0 }
 0x1f9   : >> { %v1256_v0 = vpop.f32.mrf.mxu1 }
 0x1fa   : >> { %v1444_v16 = vadd.f32 %v1353_v1, %v347_v8  ;;  %v1257_v15 = vadd.f32 %v1256_v0, %v1047_v13  ;;  %v349_v1 = vld [vmem:[%s2182_s3 + $0x1a0] sm:$0xff] }
 0x1fc   : >> { %1508 = vst [vmem:[%s2182_s3 + $0x190] sm:$0xff] %v1444_v16  ;;  %v1412_v11 = vadd.f32 %v1257_v15, %v315_v10  ;;  %v317_v16 = vld [vmem:[%s2182_s3 + $0xa0] sm:$0xff] }
 0x1fe   : >> { %1476 = vst [vmem:[%s2182_s3 + $0x90] sm:$0xff] %v1412_v11  ;;  %v1146_v6 = vpop.f32.mrf.mxu2 }
 0x1ff   : >> { %v1355_v63 = vpop.f32.mrf.mxu3 }
 0x200   : >> { %v1356_v7 = vadd.f32 %v1355_v63, %v1146_v6  ;;  %v1050_v14 = vpop.f32.mrf.mxu0 }
 0x201   : >> { %v1259_v9 = vpop.f32.mrf.mxu1 }
 0x202   : >> { %v1445_v4 = vadd.f32 %v1356_v7, %v348_v3  ;;  %v1260_v2 = vadd.f32 %v1259_v9, %v1050_v14  ;;  %v350_v7 = vld [vmem:[%s2182_s3 + $0x1a8] sm:$0xff] }
 0x204   : >> { %1509 = vst [vmem:[%s2182_s3 + $0x198] sm:$0xff] %v1445_v4  ;;  %v1413_v8 = vadd.f32 %v1260_v2, %v316_v12  ;;  %v318_v4 = vld [vmem:[%s2182_s3 + $0xa8] sm:$0xff] }
 0x206   : >> { %1477 = vst [vmem:[%s2182_s3 + $0x98] sm:$0xff] %v1413_v8  ;;  %v1149_v5 = vpop.f32.mrf.mxu2 }
 0x207   : >> { %v1358_v13 = vpop.f32.mrf.mxu3 }
 0x208   : >> { %v1359_v10 = vadd.f32 %v1358_v13, %v1149_v5  ;;  %v1053_v0 = vpop.f32.mrf.mxu0 }
 0x209   : >> { %v1262_v15 = vpop.f32.mrf.mxu1 }
 0x20a   : >> { %v1446_v11 = vadd.f32 %v1359_v10, %v349_v1  ;;  %v1263_v6 = vadd.f32 %v1262_v15, %v1053_v0  ;;  %v351_v10 = vld [vmem:[%s2182_s3 + $0x1b0] sm:$0xff] }
 0x20c   : >> { %1510 = vst [vmem:[%s2182_s3 + $0x1a0] sm:$0xff] %v1446_v11  ;;  %v1414_v3 = vadd.f32 %v1263_v6, %v317_v16  ;;  %v319_v11 = vld [vmem:[%s2182_s3 + $0xb0] sm:$0xff] }
 0x20e   : >> { %1478 = vst [vmem:[%s2182_s3 + $0xa0] sm:$0xff] %v1414_v3  ;;  %v1152_v63 = vpop.f32.mrf.mxu2 }
 0x20f   : >> { %v1361_v14 = vpop.f32.mrf.mxu3 }
 0x210   : >> { %v1362_v12 = vadd.f32 %v1361_v14, %v1152_v63  ;;  %v1056_v9 = vpop.f32.mrf.mxu0 }
 0x211   : >> { %v1265_v2 = vpop.f32.mrf.mxu1 }
 0x212   : >> { %v1447_v8 = vadd.f32 %v1362_v12, %v350_v7  ;;  %v1266_v5 = vadd.f32 %v1265_v2, %v1056_v9  ;;  %v352_v12 = vld [vmem:[%s2182_s3 + $0x1b8] sm:$0xff] }
 0x214   : >> { %1511 = vst [vmem:[%s2182_s3 + $0x1a8] sm:$0xff] %v1447_v8  ;;  %v1415_v1 = vadd.f32 %v1266_v5, %v318_v4  ;;  %v320_v8 = vld [vmem:[%s2182_s3 + $0xb8] sm:$0xff] }
 0x216   : >> { %1479 = vst [vmem:[%s2182_s3 + $0xa8] sm:$0xff] %v1415_v1  ;;  %v1155_v13 = vpop.f32.mrf.mxu2 }
 0x217   : >> { %v1364_v0 = vpop.f32.mrf.mxu3 }
 0x218   : >> { %v1365_v16 = vadd.f32 %v1364_v0, %v1155_v13  ;;  %v1059_v15 = vpop.f32.mrf.mxu0 }
 0x219   : >> { %v1268_v6 = vpop.f32.mrf.mxu1 }
 0x21a   : >> { %v1448_v3 = vadd.f32 %v1365_v16, %v351_v10  ;;  %v1269_v63 = vadd.f32 %v1268_v6, %v1059_v15  ;;  %v353_v16 = vld [vmem:[%s2182_s3 + $0x1c0] sm:$0xff] }
 0x21c   : >> { %1512 = vst [vmem:[%s2182_s3 + $0x1b0] sm:$0xff] %v1448_v3  ;;  %v1416_v7 = vadd.f32 %v1269_v63, %v319_v11  ;;  %v321_v3 = vld [vmem:[%s2182_s3 + $0xc0] sm:$0xff] }
 0x21e   : >> { %1480 = vst [vmem:[%s2182_s3 + $0xb0] sm:$0xff] %v1416_v7  ;;  %v1158_v14 = vpop.f32.mrf.mxu2 }
 0x21f   : >> { %v1367_v9 = vpop.f32.mrf.mxu3 }
 0x220   : >> { %v1368_v4 = vadd.f32 %v1367_v9, %v1158_v14  ;;  %v1062_v2 = vpop.f32.mrf.mxu0 }
 0x221   : >> { %v1271_v5 = vpop.f32.mrf.mxu1 }
 0x222   : >> { %v1449_v1 = vadd.f32 %v1368_v4, %v352_v12  ;;  %v1272_v13 = vadd.f32 %v1271_v5, %v1062_v2  ;;  %v354_v4 = vld [vmem:[%s2182_s3 + $0x1c8] sm:$0xff] }
 0x224   : >> { %1513 = vst [vmem:[%s2182_s3 + $0x1b8] sm:$0xff] %v1449_v1  ;;  %v1417_v10 = vadd.f32 %v1272_v13, %v320_v8  ;;  %v322_v1 = vld [vmem:[%s2182_s3 + $0xc8] sm:$0xff] }
 0x226   : >> { %1481 = vst [vmem:[%s2182_s3 + $0xb8] sm:$0xff] %v1417_v10  ;;  %v1161_v0 = vpop.f32.mrf.mxu2 }
 0x227   : >> { %v1370_v15 = vpop.f32.mrf.mxu3 }
 0x228   : >> { %v1371_v11 = vadd.f32 %v1370_v15, %v1161_v0  ;;  %v1065_v6 = vpop.f32.mrf.mxu0 }
 0x229   : >> { %v1274_v63 = vpop.f32.mrf.mxu1 }
 0x22a   : >> { %v1450_v7 = vadd.f32 %v1371_v11, %v353_v16  ;;  %v1275_v14 = vadd.f32 %v1274_v63, %v1065_v6  ;;  %v355_v11 = vld [vmem:[%s2182_s3 + $0x1d0] sm:$0xff] }
 0x22c   : >> { %1514 = vst [vmem:[%s2182_s3 + $0x1c0] sm:$0xff] %v1450_v7  ;;  %v1418_v12 = vadd.f32 %v1275_v14, %v321_v3  ;;  %v323_v7 = vld [vmem:[%s2182_s3 + $0xd0] sm:$0xff] }
 0x22e   : >> { %1482 = vst [vmem:[%s2182_s3 + $0xc0] sm:$0xff] %v1418_v12  ;;  %v1164_v9 = vpop.f32.mrf.mxu2 }
 0x22f   : >> { %v1373_v2 = vpop.f32.mrf.mxu3 }
 0x230   : >> { %v1374_v8 = vadd.f32 %v1373_v2, %v1164_v9  ;;  %v1068_v5 = vpop.f32.mrf.mxu0 }
 0x231   : >> { %v1277_v13 = vpop.f32.mrf.mxu1 }
 0x232   : >> { %v1451_v10 = vadd.f32 %v1374_v8, %v354_v4  ;;  %v1278_v0 = vadd.f32 %v1277_v13, %v1068_v5  ;;  %v356_v8 = vld [vmem:[%s2182_s3 + $0x1d8] sm:$0xff] }
 0x234   : >> { %1515 = vst [vmem:[%s2182_s3 + $0x1c8] sm:$0xff] %v1451_v10  ;;  %v1419_v16 = vadd.f32 %v1278_v0, %v322_v1  ;;  %v324_v10 = vld [vmem:[%s2182_s3 + $0xd8] sm:$0xff] }
 0x236   : >> { %1483 = vst [vmem:[%s2182_s3 + $0xc8] sm:$0xff] %v1419_v16  ;;  %v1167_v15 = vpop.f32.mrf.mxu2 }
 0x237   : >> { %v1376_v6 = vpop.f32.mrf.mxu3 }
 0x238   : >> { %v1377_v3 = vadd.f32 %v1376_v6, %v1167_v15  ;;  %v1071_v63 = vpop.f32.mrf.mxu0 }
 0x239   : >> { %v1280_v14 = vpop.f32.mrf.mxu1 }
 0x23a   : >> { %v1452_v12 = vadd.f32 %v1377_v3, %v355_v11  ;;  %v1281_v9 = vadd.f32 %v1280_v14, %v1071_v63  ;;  %v357_v3 = vld [vmem:[%s2182_s3 + $0x1e0] sm:$0xff] }
 0x23c   : >> { %1516 = vst [vmem:[%s2182_s3 + $0x1d0] sm:$0xff] %v1452_v12  ;;  %v1420_v4 = vadd.f32 %v1281_v9, %v323_v7  ;;  %v325_v12 = vld [vmem:[%s2182_s3 + $0xe0] sm:$0xff] }
 0x23e   : >> { %1484 = vst [vmem:[%s2182_s3 + $0xd0] sm:$0xff] %v1420_v4  ;;  %v1170_v2 = vpop.f32.mrf.mxu2 }
 0x23f   : >> { %v1379_v5 = vpop.f32.mrf.mxu3 }
 0x240   : >> { %v1380_v1 = vadd.f32 %v1379_v5, %v1170_v2  ;;  %v1074_v13 = vpop.f32.mrf.mxu0 }
 0x241   : >> { %v1283_v0 = vpop.f32.mrf.mxu1 }
 0x242   : >> { %v1453_v16 = vadd.f32 %v1380_v1, %v356_v8  ;;  %v1284_v15 = vadd.f32 %v1283_v0, %v1074_v13  ;;  %v358_v1 = vld [vmem:[%s2182_s3 + $0x1e8] sm:$0xff] }
 0x244   : >> { %1517 = vst [vmem:[%s2182_s3 + $0x1d8] sm:$0xff] %v1453_v16  ;;  %v1421_v11 = vadd.f32 %v1284_v15, %v324_v10  ;;  %v326_v16 = vld [vmem:[%s2182_s3 + $0xe8] sm:$0xff] }
 0x246   : >> { %1485 = vst [vmem:[%s2182_s3 + $0xd8] sm:$0xff] %v1421_v11  ;;  %v1173_v6 = vpop.f32.mrf.mxu2 }
 0x247   : >> { %v1382_v63 = vpop.f32.mrf.mxu3 }
 0x248   : >> { %v1383_v7 = vadd.f32 %v1382_v63, %v1173_v6  ;;  %v1077_v14 = vpop.f32.mrf.mxu0 }
 0x249   : >> { %v1286_v9 = vpop.f32.mrf.mxu1 }
 0x24a   : >> { %v1454_v4 = vadd.f32 %v1383_v7, %v357_v3  ;;  %v1287_v2 = vadd.f32 %v1286_v9, %v1077_v14  ;;  %v359_v7 = vld [vmem:[%s2182_s3 + $0x1f0] sm:$0xff] }
 0x24c   : >> { %1518 = vst [vmem:[%s2182_s3 + $0x1e0] sm:$0xff] %v1454_v4  ;;  %v1422_v8 = vadd.f32 %v1287_v2, %v325_v12  ;;  %v327_v4 = vld [vmem:[%s2182_s3 + $0xf0] sm:$0xff] }
 0x24e   : >> { %1486 = vst [vmem:[%s2182_s3 + $0xe0] sm:$0xff] %v1422_v8  ;;  %v1176_v5 = vpop.f32.mrf.mxu2 }
 0x24f   : >> { %v1385_v13 = vpop.f32.mrf.mxu3 }
 0x250   : >> { %v1386_v10 = vadd.f32 %v1385_v13, %v1176_v5  ;;  %v1080_v0 = vpop.f32.mrf.mxu0 }
 0x251   : >> { %v1289_v15 = vpop.f32.mrf.mxu1 }
 0x252   : >> { %v1455_v11 = vadd.f32 %v1386_v10, %v358_v1  ;;  %v1290_v6 = vadd.f32 %v1289_v15, %v1080_v0  ;;  %v360_v10 = vld [vmem:[%s2182_s3 + $0x1f8] sm:$0xff] }
 0x254   : >> { %1519 = vst [vmem:[%s2182_s3 + $0x1e8] sm:$0xff] %v1455_v11  ;;  %v1423_v3 = vadd.f32 %v1290_v6, %v326_v16  ;;  %v328_v11 = vld [vmem:[%s2182_s3 + $0xf8] sm:$0xff] }
 0x256   : >> { %1487 = vst [vmem:[%s2182_s3 + $0xe8] sm:$0xff] %v1423_v3  ;;  %v1179_v63 = vpop.f32.mrf.mxu2 }
 0x257   : >> { %v1388_v14 = vpop.f32.mrf.mxu3 }
 0x258   : >> { %v1389_v12 = vadd.f32 %v1388_v14, %v1179_v63  ;;  %v1083_v9 = vpop.f32.mrf.mxu0 }
 0x259   : >> { %v1292_v2 = vpop.f32.mrf.mxu1 }
 0x25a   : >> { %v1456_v8 = vadd.f32 %v1389_v12, %v359_v7  ;;  %v1293_v5 = vadd.f32 %v1292_v2, %v1083_v9 }
 0x25c   : >> { %1520 = vst [vmem:[%s2182_s3 + $0x1f0] sm:$0xff] %v1456_v8  ;;  %v1424_v1 = vadd.f32 %v1293_v5, %v327_v4 }
 0x25e   : >> { %1488 = vst [vmem:[%s2182_s3 + $0xf0] sm:$0xff] %v1424_v1  ;;  %v1182_v13 = vpop.f32.mrf.mxu2 }
 0x25f   : >> { %v1391_v0 = vpop.f32.mrf.mxu3 }
 0x260   : >> { %v1392_v16 = vadd.f32 %v1391_v0, %v1182_v13  ;;  %v1086_v15 = vpop.f32.mrf.mxu0 }
 0x261   : >> { %v1295_v6 = vpop.f32.mrf.mxu1 }
 0x262   : >> { %v1457_v3 = vadd.f32 %v1392_v16, %v360_v10  ;;  %v1296_v17 = vadd.f32 %v1295_v6, %v1086_v15  ;;  %294 = sbr.rel (!%p292_p0) target bundleno = 108 (0x6c), region = 76 }
 0x264   : >> { %1521 = vst [vmem:[%s2182_s3 + $0x1f8] sm:$0xff] %v1457_v3  ;;  %v1425_v63 = vadd.f32 %v1296_v17, %v328_v11 }
 0x266   : >> { %1489 = vst [vmem:[%s2182_s3 + $0xf8] sm:$0xff] %v1425_v63 }
 0x267   : > { %2048 = shalt.err (!%p2045_p9)
}
 0x268   : > { %s2103_s29 = smov 128   ;;  %s2104_s3 = smov 8  }
 0x269   : > { %1927 = dma.vmem_to_hbm [thread:$0]  (%p2158_p5), %s1536_s24, 8192, %s1538_s25, %s1523_s26, %s2103_s29, %s2103_s29, %s2104_s3  }
 0x26a PF: > { %p1939_p10 = scmp.ge.s32.totalorder %s2091_s12, 2  ;;  %s1552_s7 = sand.u32 1, %s2079_s9  }
 0x26b   : > { %s1553_s8 = scalar_lea.sflag [#allocation4], %s1552_s7 }
 0x26c   : > { %p1934_p11 = pnand %p1939_p10, %p2162_p6 }
 0x26e   : > { %p1935_p12 = pneg %p1934_p11 }
 0x270   : > { %2074 = dma.done.wait (%p1935_p12), %s1553_s8, 8192  }
 0x271   : > { %2076 = vsyncadd (%p1935_p12), %s1553_s8, 4294959104  ;;  %p13_p13 = scmp.ge.s32.totalorder %s2145_s15, 4   ;;  %s3085_s9 = smov %s2083_s10 }
 0x272   : > { %s3086_s10 = smov %s2087_s11  ;;  %s3087_s11 = smov %s2156_s18 }
 0x273   : > { %s3088_s12 = smov %s2145_s15  ;;  %15 = sbr.rel (!%p13_p13) target bundleno = 4 (0x4), region = 87 }
 0x278   :  { %1559 = vsyncpa [#allocation3], 1 }
 0x279   :  { %1561 = vsyncpa [#allocation3 + $0x1], 1 }
 0x27a   :  { %1562 = vsyncpa [#allocation4], 1 }
 0x27b   :  { %1564 = vsyncpa [#allocation4 + $0x1], 1 }

// kernel: tpu_custom_call.1
= control target key start
LH: loop header
LB: loop body
LE: loop exit
PB: predicated region body
PF: predicated region fallthrough
CT: control target
= control target key end

     0   :  { %7 = vsyncpa [#allocation3], 0  ;;  %s3042_s0 = inlined_call_operand.vmem [shape: s32[1024,1], index: 0, kind: input, shape index: {}]   ;;  %s3043_s1 = inlined_call_operand.hbm [shape: f32[2048,128], index: 1, kind: input, shape index: {}]   ;;  %s3044_s2 = inlined_call_operand.hbm [shape: f32[1024,128], index: 2, kind: output, shape index: {}]  }
   0x1   :  { %8 = vsyncpa [#allocation4], 0 }
   0x2   :  { %10 = vsyncpa [#allocation4 + $0x1], 0  ;;  %s2120_s9 = smov 0   ;;  %s2122_s10 = smov 0  }
   0x3   :  { %s2124_s11 = smov 0   ;;  %s2126_s12 = smov 0  }
   0x4 LB: > { %s2141_s13 = sadd.s32 4294967295, %s2091_s12   ;;  %s1619_s14 = sadd.s32 4294967294, %s2091_s12   ;;  %s2091_s12 = sphi %s2126_s12, %s3088_s12   ;;  %s2087_s11 = sphi %s2124_s11, %s3087_s11   ;;  %s2083_s10 = sphi %s2122_s10, %s3086_s10   ;;  %s2079_s9 = sphi %s2120_s9, %s3085_s9  }
   0x5   : > { %s2145_s15 = sadd.s32 1, %s2091_s12   ;;  %s70_s16 = sadd.s32 1, %s2087_s11 }
   0x6   : > { %s67_s17 = ssub.s32 %s2091_s12, %s2145_s15  ;;  %p80_p0 = scmp.ne.s32.totalorder %s2087_s11, %s2083_s10 }
   0x7   : > { %p68_p1 = scmp.eq.s32.totalorder %s67_s17, 0  ;;  %p81_p2 = scmp.eq.s32.totalorder %s2141_s13, 1 }
   0x8   : > { %p86_p3 = scmp.ne.s32.totalorder %s2083_s10, %s2079_s9  ;;  %p87_p4 = scmp.eq.s32.totalorder %s1619_s14, 1 }
   0x9   : > { %s2156_s18 = scalar_select %p68_p1, %s2087_s11, %s70_s16  }
   0xa   : > { %p2158_p5 = por %p81_p2, %p80_p0  ;;  %p2162_p6 = por %p87_p4, %p86_p3 }
   0xb   : > { %p1620_p7 = scmp.ge.s32.totalorder %s2091_s12, 1  ;;  %p94_p8 = scmp.lt.s32.totalorder %s2091_s12, 3 }
   0xc   : > { %p1937_p9 = scmp.eq.s32.totalorder %s2141_s13, 0  ;;  %s105_s23 = sshll.u32 %s3043_s1, 4  ;;  %s106_s23 = int_to_ptr.hbm [resolvable:$true] %s105_s23 }
   0xd   : > { %p95_p10 = pnand %p1620_p7, %p94_p8  ;;  %s2097_s24 = smov [#allocation2]  }
   0xe   : > { %s107_s25 = sshll.u32 %s2097_s24, 4  ;;  %s2098_s26 = smov 128   ;;  %s108_s25 = int_to_ptr.vmem [resolvable:$true] %s107_s25 }
   0xf   : > { %p1929_p11 = pneg %p95_p10  ;;  %s2099_s27 = smov 8  }
  0x10   : > { %132 = sbr.rel (%p95_p10) target bundleno = 618 (0x26a), region = 28 }
  0x11   : > { %p1930_p12 = pnand %p1937_p9, %p1929_p11 }
  0x13   : > { %1932 = dma.hbm_to_vmem [thread:$0]  (!%p1930_p12), %s106_s23, 32768, %s108_s25, [#allocation3], %s2098_s26, %s2098_s26, %s2099_s27  }
  0x15   : > { %2070 = dma.done.wait (%p1937_p9), [#allocation3], 32768  }
  0x16   : > { %2072 = vsyncadd (%p1937_p9), [#allocation3], 4294934528  ;;  %s1626_s28 = sshll.u32 %s2141_s13, 6  ;;  %s152_s29 = sand.u32 1, %s2083_s10   ;;  %v2100_v0 = vmov 0.0  }
  0x17   : > { %p156_p13 = scmp.lt.s32.totalorder %s1626_s28, 127  ;;  %s1625_s30 = sshll.u32 %s152_s29, 9 }
  0x18   : > { %s2182_s3 = scalar_lea.vmem [#allocation5], %s1625_s30  ;;  %s2509_s8 = smov 0  }
  0x19   : > { %s3090_s28 = smov (!%p156_p13, %s1626_s28), 127  ;;  %162 = vst [vmem:[%s2182_s3] sm:$0xff] %v2100_v0 }
  0x1a   : > { %163 = vst [vmem:[%s2182_s3 + $0x8] sm:$0xff] %v2100_v0  ;;  %s1627_s4 = sshll.u32 %s3090_s28, 3 }
  0x1b   : > { %164 = vst [vmem:[%s2182_s3 + $0x10] sm:$0xff] %v2100_v0  ;;  %s2193_s7 = scalar_lea.vmem %s3042_s0, %s1627_s4 }
  0x1c   : > { %165 = vst [vmem:[%s2182_s3 + $0x18] sm:$0xff] %v2100_v0  ;;  %v2198_v1 = vld [vmem:[%s2193_s7] sm:$0xff]  ;;  %v2201_v2 = vld [vmem:[%s2193_s7 + $0x8] sm:$0xff]  ;;  %v2204_v3 = vld [vmem:[%s2193_s7 + $0x10] sm:$0xff] }
  0x1d   : > { %3047 = vst [vmem:[#allocation8_spill] sm:$0xff] %v2198_v1  ;;  %v2209_v4 = vld [vmem:[%s2193_s7 + $0x18] sm:$0xff]  ;;  %v2212_v5 = vld [vmem:[%s2193_s7 + $0x20] sm:$0xff]  ;;  %v2215_v6 = vld [vmem:[%s2193_s7 + $0x28] sm:$0xff] }
  0x1e   : > { %3048 = vst [vmem:[#allocation9_spill] sm:$0xff] %v2201_v2  ;;  %v2220_v7 = vld [vmem:[%s2193_s7 + $0x30] sm:$0xff]  ;;  %v2223_v8 = vld [vmem:[%s2193_s7 + $0x38] sm:$0xff]  ;;  %v2226_v9 = vld [vmem:[%s2193_s7 + $0x40] sm:$0xff] }
  0x1f   : > { %3049 = vst [vmem:[#allocation10_spill] sm:$0xff] %v2204_v3  ;;  %v2231_v10 = vld [vmem:[%s2193_s7 + $0x48] sm:$0xff]  ;;  %v2234_v11 = vld [vmem:[%s2193_s7 + $0x50] sm:$0xff]  ;;  %v2237_v12 = vld [vmem:[%s2193_s7 + $0x58] sm:$0xff] }
  0x20   : > { %166 = vst [vmem:[%s2182_s3 + $0x20] sm:$0xff] %v2100_v0  ;;  %v2242_v13 = vld [vmem:[%s2193_s7 + $0x60] sm:$0xff]  ;;  %v2245_v14 = vld [vmem:[%s2193_s7 + $0x68] sm:$0xff]  ;;  %v2248_v15 = vld [vmem:[%s2193_s7 + $0x70] sm:$0xff] }
  0x21   : > { %3050 = vst [vmem:[#allocation11_spill] sm:$0xff] %v2209_v4  ;;  %v2253_v16 = vld [vmem:[%s2193_s7 + $0x78] sm:$0xff]  ;;  %v2256_v17 = vld [vmem:[%s2193_s7 + $0x80] sm:$0xff]  ;;  %v2259_v18 = vld [vmem:[%s2193_s7 + $0x88] sm:$0xff] }
  0x22   : > { %3051 = vst [vmem:[#allocation12_spill] sm:$0xff] %v2212_v5  ;;  %v2264_v19 = vld [vmem:[%s2193_s7 + $0x90] sm:$0xff]  ;;  %v2267_v20 = vld [vmem:[%s2193_s7 + $0x98] sm:$0xff]  ;;  %v2270_v21 = vld [vmem:[%s2193_s7 + $0xa0] sm:$0xff] }
  0x23   : > { %3052 = vst [vmem:[#allocation13_spill] sm:$0xff] %v2215_v6  ;;  %v2275_v22 = vld [vmem:[%s2193_s7 + $0xa8] sm:$0xff]  ;;  %v2278_v23 = vld [vmem:[%s2193_s7 + $0xb0] sm:$0xff]  ;;  %v2281_v24 = vld [vmem:[%s2193_s7 + $0xb8] sm:$0xff] }
  0x24   : > { %167 = vst [vmem:[%s2182_s3 + $0x28] sm:$0xff] %v2100_v0  ;;  %v2286_v25 = vld [vmem:[%s2193_s7 + $0xc0] sm:$0xff]  ;;  %v2289_v26 = vld [vmem:[%s2193_s7 + $0xc8] sm:$0xff]  ;;  %v2292_v27 = vld [vmem:[%s2193_s7 + $0xd0] sm:$0xff] }
  0x25   : > { %3053 = vst [vmem:[#allocation14_spill] sm:$0xff] %v2220_v7  ;;  %v2297_v28 = vld [vmem:[%s2193_s7 + $0xd8] sm:$0xff]  ;;  %v2300_v29 = vld [vmem:[%s2193_s7 + $0xe0] sm:$0xff]  ;;  %v2303_v30 = vld [vmem:[%s2193_s7 + $0xe8] sm:$0xff] }
  0x26   : > { %3054 = vst [vmem:[#allocation15_spill] sm:$0xff] %v2223_v8  ;;  %v2308_v31 = vld [vmem:[%s2193_s7 + $0xf0] sm:$0xff]  ;;  %v2311_v32 = vld [vmem:[%s2193_s7 + $0xf8] sm:$0xff]  ;;  %v2314_v33 = vld [vmem:[%s2193_s7 + $0x100] sm:$0xff] }
  0x27   : > { %3055 = vst [vmem:[#allocation16_spill] sm:$0xff] %v2226_v9  ;;  %v2319_v34 = vld [vmem:[%s2193_s7 + $0x108] sm:$0xff]  ;;  %v2322_v35 = vld [vmem:[%s2193_s7 + $0x110] sm:$0xff]  ;;  %v2325_v36 = vld [vmem:[%s2193_s7 + $0x118] sm:$0xff] }
  0x28   : > { %168 = vst [vmem:[%s2182_s3 + $0x30] sm:$0xff] %v2100_v0  ;;  %v2330_v37 = vld [vmem:[%s2193_s7 + $0x120] sm:$0xff]  ;;  %v2333_v38 = vld [vmem:[%s2193_s7 + $0x128] sm:$0xff]  ;;  %v2336_v39 = vld [vmem:[%s2193_s7 + $0x130] sm:$0xff] }
  0x29   : > { %3056 = vst [vmem:[#allocation17_spill] sm:$0xff] %v2231_v10  ;;  %v2341_v40 = vld [vmem:[%s2193_s7 + $0x138] sm:$0xff]  ;;  %v2344_v41 = vld [vmem:[%s2193_s7 + $0x140] sm:$0xff]  ;;  %v2347_v42 = vld [vmem:[%s2193_s7 + $0x148] sm:$0xff] }
  0x2a   : > { %3057 = vst [vmem:[#allocation18_spill] sm:$0xff] %v2234_v11  ;;  %v2352_v43 = vld [vmem:[%s2193_s7 + $0x150] sm:$0xff]  ;;  %v2355_v44 = vld [vmem:[%s2193_s7 + $0x158] sm:$0xff]  ;;  %v2358_v45 = vld [vmem:[%s2193_s7 + $0x160] sm:$0xff] }
  0x2b   : > { %3058 = vst [vmem:[#allocation19_spill] sm:$0xff] %v2237_v12  ;;  %v2363_v46 = vld [vmem:[%s2193_s7 + $0x168] sm:$0xff]  ;;  %v2366_v47 = vld [vmem:[%s2193_s7 + $0x170] sm:$0xff]  ;;  %v2369_v48 = vld [vmem:[%s2193_s7 + $0x178] sm:$0xff] }
  0x2c   : > { %169 = vst [vmem:[%s2182_s3 + $0x38] sm:$0xff] %v2100_v0  ;;  %v2374_v49 = vld [vmem:[%s2193_s7 + $0x180] sm:$0xff]  ;;  %v2377_v50 = vld [vmem:[%s2193_s7 + $0x188] sm:$0xff]  ;;  %v2380_v51 = vld [vmem:[%s2193_s7 + $0x190] sm:$0xff] }
  0x2d   : > { %3059 = vst [vmem:[#allocation20_spill] sm:$0xff] %v2242_v13  ;;  %v2385_v52 = vld [vmem:[%s2193_s7 + $0x198] sm:$0xff]  ;;  %v2388_v53 = vld [vmem:[%s2193_s7 + $0x1a0] sm:$0xff]  ;;  %v2391_v54 = vld [vmem:[%s2193_s7 + $0x1a8] sm:$0xff] }
  0x2e   : > { %3060 = vst [vmem:[#allocation21_spill] sm:$0xff] %v2245_v14  ;;  %v2396_v55 = vld [vmem:[%s2193_s7 + $0x1b0] sm:$0xff]  ;;  %v2399_v56 = vld [vmem:[%s2193_s7 + $0x1b8] sm:$0xff]  ;;  %v2402_v57 = vld [vmem:[%s2193_s7 + $0x1c0] sm:$0xff] }
  0x2f   : > { %3061 = vst [vmem:[#allocation22_spill] sm:$0xff] %v2248_v15  ;;  %v2407_v58 = vld [vmem:[%s2193_s7 + $0x1c8] sm:$0xff]  ;;  %v2410_v59 = vld [vmem:[%s2193_s7 + $0x1d0] sm:$0xff]  ;;  %v2413_v60 = vld [vmem:[%s2193_s7 + $0x1d8] sm:$0xff] }
  0x30   : > { %170 = vst [vmem:[%s2182_s3 + $0x40] sm:$0xff] %v2100_v0  ;;  %v2418_v61 = vld [vmem:[%s2193_s7 + $0x1e0] sm:$0xff]  ;;  %v2421_v62 = vld [vmem:[%s2193_s7 + $0x1e8] sm:$0xff]  ;;  %v2424_v63 = vld [vmem:[%s2193_s7 + $0x1f0] sm:$0xff] }
  0x31   : > { %3062 = vst [vmem:[#allocation23_spill] sm:$0xff] %v2253_v16 }
  0x32   : > { %3063 = vst [vmem:[#allocation24_spill] sm:$0xff] %v2256_v17 }
  0x33   : > { %171 = vst [vmem:[%s2182_s3 + $0x48] sm:$0xff] %v2100_v0 }
  0x34   : > { %172 = vst [vmem:[%s2182_s3 + $0x50] sm:$0xff] %v2100_v0 }
  0x35   : > { %173 = vst [vmem:[%s2182_s3 + $0x58] sm:$0xff] %v2100_v0 }
  0x36   : > { %174 = vst [vmem:[%s2182_s3 + $0x60] sm:$0xff] %v2100_v0 }
  0x37   : > { %175 = vst [vmem:[%s2182_s3 + $0x68] sm:$0xff] %v2100_v0 }
  0x38   : > { %3064 = vst [vmem:[#allocation25_spill] sm:$0xff] %v2311_v32  ;;  %v2429_v32 = vld [vmem:[%s2193_s7 + $0x1f8] sm:$0xff] }
  0x39   : > { %176 = vst [vmem:[%s2182_s3 + $0x70] sm:$0xff] %v2100_v0 }
  0x3a   : > { %177 = vst [vmem:[%s2182_s3 + $0x78] sm:$0xff] %v2100_v0 }
  0x3b   : > { %178 = vst [vmem:[%s2182_s3 + $0x80] sm:$0xff] %v2100_v0 }
  0x3c   : > { %179 = vst [vmem:[%s2182_s3 + $0x88] sm:$0xff] %v2100_v0 }
  0x3d   : > { %180 = vst [vmem:[%s2182_s3 + $0x90] sm:$0xff] %v2100_v0 }
  0x3e   : > { %181 = vst [vmem:[%s2182_s3 + $0x98] sm:$0xff] %v2100_v0 }
  0x3f   : > { %182 = vst [vmem:[%s2182_s3 + $0xa0] sm:$0xff] %v2100_v0 }
  0x40   : > { %183 = vst [vmem:[%s2182_s3 + $0xa8] sm:$0xff] %v2100_v0 }
  0x41   : > { %184 = vst [vmem:[%s2182_s3 + $0xb0] sm:$0xff] %v2100_v0 }
  0x42   : > { %185 = vst [vmem:[%s2182_s3 + $0xb8] sm:$0xff] %v2100_v0 }
  0x43   : > { %3065 = vst [vmem:[#allocation26_spill] sm:$0xff] %v2424_v63 }
  0x44   : > { %186 = vst [vmem:[%s2182_s3 + $0xc0] sm:$0xff] %v2100_v0 }
  0x45   : > { %187 = vst [vmem:[%s2182_s3 + $0xc8] sm:$0xff] %v2100_v0 }
  0x46   : > { %188 = vst [vmem:[%s2182_s3 + $0xd0] sm:$0xff] %v2100_v0 }
  0x47   : > { %189 = vst [vmem:[%s2182_s3 + $0xd8] sm:$0xff] %v2100_v0 }
  0x48   : > { %190 = vst [vmem:[%s2182_s3 + $0xe0] sm:$0xff] %v2100_v0 }
  0x49   : > { %191 = vst [vmem:[%s2182_s3 + $0xe8] sm:$0xff] %v2100_v0 }
  0x4a   : > { %192 = vst [vmem:[%s2182_s3 + $0xf0] sm:$0xff] %v2100_v0 }
  0x4b   : > { %193 = vst [vmem:[%s2182_s3 + $0xf8] sm:$0xff] %v2100_v0 }
  0x4c   : > { %194 = vst [vmem:[%s2182_s3 + $0x100] sm:$0xff] %v2100_v0 }
  0x4d   : > { %195 = vst [vmem:[%s2182_s3 + $0x108] sm:$0xff] %v2100_v0 }
  0x4e   : > { %196 = vst [vmem:[%s2182_s3 + $0x110] sm:$0xff] %v2100_v0 }
  0x4f   : > { %197 = vst [vmem:[%s2182_s3 + $0x118] sm:$0xff] %v2100_v0 }
  0x50   : > { %198 = vst [vmem:[%s2182_s3 + $0x120] sm:$0xff] %v2100_v0 }
  0x51   : > { %199 = vst [vmem:[%s2182_s3 + $0x128] sm:$0xff] %v2100_v0 }
  0x52   : > { %200 = vst [vmem:[%s2182_s3 + $0x130] sm:$0xff] %v2100_v0 }
  0x53   : > { %201 = vst [vmem:[%s2182_s3 + $0x138] sm:$0xff] %v2100_v0 }
  0x54   : > { %202 = vst [vmem:[%s2182_s3 + $0x140] sm:$0xff] %v2100_v0 }
  0x55   : > { %203 = vst [vmem:[%s2182_s3 + $0x148] sm:$0xff] %v2100_v0 }
  0x56   : > { %204 = vst [vmem:[%s2182_s3 + $0x150] sm:$0xff] %v2100_v0 }
  0x57   : > { %205 = vst [vmem:[%s2182_s3 + $0x158] sm:$0xff] %v2100_v0 }
  0x58   : > { %206 = vst [vmem:[%s2182_s3 + $0x160] sm:$0xff] %v2100_v0 }
  0x59   : > { %207 = vst [vmem:[%s2182_s3 + $0x168] sm:$0xff] %v2100_v0 }
  0x5a   : > { %208 = vst [vmem:[%s2182_s3 + $0x170] sm:$0xff] %v2100_v0 }
  0x5b   : > { %209 = vst [vmem:[%s2182_s3 + $0x178] sm:$0xff] %v2100_v0 }
  0x5c   : > { %210 = vst [vmem:[%s2182_s3 + $0x180] sm:$0xff] %v2100_v0 }
  0x5d   : > { %211 = vst [vmem:[%s2182_s3 + $0x188] sm:$0xff] %v2100_v0 }
  0x5e   : > { %212 = vst [vmem:[%s2182_s3 + $0x190] sm:$0xff] %v2100_v0 }
  0x5f   : > { %213 = vst [vmem:[%s2182_s3 + $0x198] sm:$0xff] %v2100_v0 }
  0x60   : > { %214 = vst [vmem:[%s2182_s3 + $0x1a0] sm:$0xff] %v2100_v0 }
  0x61   : > { %215 = vst [vmem:[%s2182_s3 + $0x1a8] sm:$0xff] %v2100_v0 }
  0x62   : > { %216 = vst [vmem:[%s2182_s3 + $0x1b0] sm:$0xff] %v2100_v0 }
  0x63   : > { %217 = vst [vmem:[%s2182_s3 + $0x1b8] sm:$0xff] %v2100_v0 }
  0x64   : > { %218 = vst [vmem:[%s2182_s3 + $0x1c0] sm:$0xff] %v2100_v0 }
  0x65   : > { %219 = vst [vmem:[%s2182_s3 + $0x1c8] sm:$0xff] %v2100_v0 }
  0x66   : > { %220 = vst [vmem:[%s2182_s3 + $0x1d0] sm:$0xff] %v2100_v0 }
  0x67   : > { %221 = vst [vmem:[%s2182_s3 + $0x1d8] sm:$0xff] %v2100_v0 }
  0x68   : > { %222 = vst [vmem:[%s2182_s3 + $0x1e0] sm:$0xff] %v2100_v0 }
  0x69   : > { %223 = vst [vmem:[%s2182_s3 + $0x1e8] sm:$0xff] %v2100_v0 }
  0x6a   : > { %224 = vst [vmem:[%s2182_s3 + $0x1f0] sm:$0xff] %v2100_v0 }
  0x6b   : > { %225 = vst [vmem:[%s2182_s3 + $0x1f8] sm:$0xff] %v2100_v0 }
  0x6c LB: >> { %v2101_v63 = vmov 0   ;;  %v3066_v3 = vld [vmem:[#allocation10_spill] sm:$0xff]  ;;  %v3067_v2 = vld [vmem:[#allocation9_spill] sm:$0xff]  ;;  %v3068_v1 = vld [vmem:[#allocation8_spill] sm:$0xff]  ;;  %s1628_s14 = sshll.u32 %s2095_s8, 8  ;;  %s295_s8 = sadd.s32 1, %s2095_s8   ;;  %s2095_s8 = sphi %s2509_s8, %s295_s8  }
  0x6d   : >> { %1990 = vset.pattern.permute.xlu2 %v2101_v63  ;;  %1989 = vset.pattern.permute.xlu1 %v2101_v63  ;;  %v3069_v4 = vld [vmem:[#allocation11_spill] sm:$0xff]  ;;  %v3070_v6 = vld [vmem:[#allocation13_spill] sm:$0xff]  ;;  %v3071_v5 = vld [vmem:[#allocation12_spill] sm:$0xff]  ;;  %s2538_s16 = scalar_lea.vmem [#allocation2], %s1628_s14  ;;  %p292_p0 = scmp.ge.s32.totalorder %s295_s8, 8  }
  0x6e   : >> { %1988 = vset.pattern.permute.xlu0 %v2101_v63  ;;  %470 = vperm.xlu2 %1990, %v2322_v35   ;;  %v3072_v7 = vld [vmem:[#allocation14_spill] sm:$0xff]  ;;  %v3073_v9 = vld [vmem:[#allocation16_spill] sm:$0xff]  ;;  %v3074_v8 = vld [vmem:[#allocation15_spill] sm:$0xff]  ;;  %s1890_s17 = sshll.u32 (%p292_p0), %s2141_s13, 9  ;;  %s1535_s24 = sshll.u32 (%p292_p0), %s2182_s3, 4  ;;  %s1536_s24 = int_to_ptr.vmem [resolvable:$true] %s1535_s24 }
  0x6f   : >> { %467 = vperm.xlu1 %1989, %v2319_v34   ;;  %464 = vperm.xlu0 %1988, %v2314_v33   ;;  %v3075_v10 = vld [vmem:[#allocation17_spill] sm:$0xff]  ;;  %v959_v0 = vld [vmem:[%s2538_s16 + $0x78] sm:$0xff]  ;;  %v3077_v11 = vld [vmem:[#allocation18_spill] sm:$0xff]  ;;  %s1534_s23 = scalar_lea.hbm (%p292_p0), %s3044_s2, %s1890_s17  ;;  %s1523_s26 = scalar_lea.sflag (%p292_p0), [#allocation4], %s152_s29 }
  0x70   : >> { %v975_v63 = vld [vmem:[%s2538_s16 + $0xf8] sm:$0xff]  ;;  %1891 = vmatpush.msra.mxu2 %v959_v0  ;;  %976 = vmatpush.msra.mxu0 %v959_v0  ;;  %v972_v0 = vld [vmem:[%s2538_s16 + $0xe0] sm:$0xff]  ;;  %v3079_v15 = vld [vmem:[#allocation22_spill] sm:$0xff]  ;;  %s1537_s25 = sshll.u32 (%p292_p0), %s1534_s23, 4  ;;  %s2041_s13 = scalar_lea.hbm (%p292_p0), %s3044_s2, 1024  ;;  %s1538_s25 = int_to_ptr.hbm [resolvable:$true] %s1537_s25 }
  0x71   : >> { %1907 = vmatpush.msra.mxu3 %v975_v63  ;;  %1185 = vmatpush.msra.mxu1 %v975_v63  ;;  %v3076_v12 = vld [vmem:[#allocation19_spill] sm:$0xff]  ;;  %v3078_v13 = vld [vmem:[#allocation20_spill] sm:$0xff]  ;;  %v3080_v14 = vld [vmem:[#allocation21_spill] sm:$0xff]  ;;  %s2035_s27 = sshra.s32 (%p292_p0), %s1538_s25, 4  ;;  %s2036_s27 = int_to_ptr.hbm [resolvable:$true] %s2035_s27 }
  0x72   : >> { %v971_v63 = vld [vmem:[%s2538_s16 + $0xd8] sm:$0xff]  ;;  %v3082_v17 = vld [vmem:[#allocation24_spill] sm:$0xff]  ;;  %s2037_s28 = scalar_lea.hbm (%p292_p0), %s2036_s27, 512  ;;  %p2042_p4 = scmp.lt.s32.totalorder (%p292_p0), %s2036_s27, %s3044_s2 }
  0x73   : >> { %v3081_v16 = vld [vmem:[#allocation23_spill] sm:$0xff]  ;;  %p2038_p1 = scmp.ne.s32.totalorder (%p292_p0), %s2036_s27, %s2037_s28  ;;  %p2043_p7 = scmp.lt.s32.totalorder (%p292_p0), %s2041_s13, %s2037_s28 }
  0x75   : > { %p2039_p2 = pnand (%p292_p0), %p2038_p1, %p2158_p5  ;;  %p2044_p8 = por (%p292_p0), %p2043_p7, %p2042_p4 }
  0x76   : >> { %374 = vperm.xlu2 %1990, %v3066_v3   ;;  %v957_v3 = vld [vmem:[%s2538_s16 + $0x68] sm:$0xff] }
  0x77   : >> { %371 = vperm.xlu1 %1989, %v3067_v2   ;;  %368 = vperm.xlu0 %1988, %v3068_v1   ;;  %v958_v1 = vld [vmem:[%s2538_s16 + $0x70] sm:$0xff]  ;;  %p2040_p3 = pneg (%p292_p0), %p2039_p2 }
  0x78   : >> { %v974_v2 = vld [vmem:[%s2538_s16 + $0xf0] sm:$0xff]  ;;  %1892 = vmatpush.msra.mxu2 %v958_v1  ;;  %977 = vmatpush.msra.mxu0 %v958_v1 }
  0x79   : >> { %1908 = vmatpush.msra.mxu3 %v974_v2  ;;  %1186 = vmatpush.msra.mxu1 %v974_v2  ;;  %v954_v1 = vld [vmem:[%s2538_s16 + $0x50] sm:$0xff]  ;;  %p2045_p9 = pnand (%p292_p0), %p2044_p8, %p2040_p3 }
  0x7a   : >> { %1893 = vmatpush.msra.mxu2 %v957_v3  ;;  %978 = vmatpush.msra.mxu0 %v957_v3  ;;  %v970_v2 = vld [vmem:[%s2538_s16 + $0xd0] sm:$0xff]  ;;  %v953_v3 = vld [vmem:[%s2538_s16 + $0x48] sm:$0xff] }
  0x7e   : >> { %476 = vperm.xlu2 %1990, %v2330_v37  }
  0x7f   : >> { %377 = vperm.xlu1 %1989, %v3069_v4   ;;  %473 = vperm.xlu0 %1988, %v2325_v36   ;;  %v973_v4 = vld [vmem:[%s2538_s16 + $0xe8] sm:$0xff] }
  0x80   : >> { %1909 = vmatpush.msra.mxu3 %v973_v4  ;;  %1187 = vmatpush.msra.mxu1 %v973_v4  ;;  %v969_v4 = vld [vmem:[%s2538_s16 + $0xc8] sm:$0xff] }
  0x82   : >> { %1910 = vmatpush.msra.mxu3 %v972_v0  ;;  %1188 = vmatpush.msra.mxu1 %v972_v0  ;;  %v968_v0 = vld [vmem:[%s2538_s16 + $0xc0] sm:$0xff] }
  0x84   : >> { %1911 = vmatpush.msra.mxu3 %v971_v63  ;;  %1189 = vmatpush.msra.mxu1 %v971_v63  ;;  %v950_v63 = vld [vmem:[%s2538_s16 + $0x30] sm:$0xff] }
  0x86   : >> { %383 = vperm.xlu2 %1990, %v3070_v6   ;;  %v955_v6 = vld [vmem:[%s2538_s16 + $0x58] sm:$0xff]  ;;  %1912 = vmatpush.msra.mxu3 %v970_v2 }
  0x87   : >> { %479 = vperm.xlu1 %1989, %v2333_v38   ;;  %380 = vperm.xlu0 %1988, %v3071_v5   ;;  %v956_v5 = vld [vmem:[%s2538_s16 + $0x60] sm:$0xff] }
  0x88   : >> { %1894 = vmatpush.msra.mxu2 %v956_v5  ;;  %979 = vmatpush.msra.mxu0 %v956_v5  ;;  %v952_v5 = vld [vmem:[%s2538_s16 + $0x40] sm:$0xff] }
  0x89   : >> { %1190 = vmatpush.msra.mxu1 %v970_v2  ;;  %1913 = vmatpush.msra.mxu3 %v969_v4  ;;  %v965_v2 = vld [vmem:[%s2538_s16 + $0xa8] sm:$0xff] }
  0x8a   : >> { %1895 = vmatpush.msra.mxu2 %v955_v6  ;;  %980 = vmatpush.msra.mxu0 %v955_v6  ;;  %v967_v6 = vld [vmem:[%s2538_s16 + $0xb8] sm:$0xff] }
  0x8b   : >> { %1191 = vmatpush.msra.mxu1 %v969_v4  ;;  %1914 = vmatpush.msra.mxu3 %v968_v0  ;;  %v964_v4 = vld [vmem:[%s2538_s16 + $0xa0] sm:$0xff] }
  0x8c   : >> { %1896 = vmatpush.msra.mxu2 %v954_v1  ;;  %981 = vmatpush.msra.mxu0 %v954_v1  ;;  %v949_v1 = vld [vmem:[%s2538_s16 + $0x28] sm:$0xff] }
  0x8d   : >> { %1192 = vmatpush.msra.mxu1 %v968_v0  ;;  %1915 = vmatpush.msra.mxu3 %v967_v6  ;;  %v963_v0 = vld [vmem:[%s2538_s16 + $0x98] sm:$0xff] }
  0x8e   : >> { %485 = vperm.xlu2 %1990, %v2341_v40   ;;  %1897 = vmatpush.msra.mxu2 %v953_v3 }
  0x8f   : >> { %386 = vperm.xlu1 %1989, %v3072_v7   ;;  %482 = vperm.xlu0 %1988, %v2336_v39   ;;  %v951_v7 = vld [vmem:[%s2538_s16 + $0x38] sm:$0xff] }
  0x90   : >> { %1898 = vmatpush.msra.mxu2 %v952_v5  ;;  %982 = vmatpush.msra.mxu0 %v953_v3  ;;  %v948_v3 = vld [vmem:[%s2538_s16 + $0x20] sm:$0xff] }
  0x91   : >> { %1193 = vmatpush.msra.mxu1 %v967_v6  ;;  %v945_v6 = vld [vmem:[%s2538_s16 + $0x8] sm:$0xff] }
  0x92   : >> { %1899 = vmatpush.msra.mxu2 %v951_v7  ;;  %983 = vmatpush.msra.mxu0 %v952_v5  ;;  %v947_v5 = vld [vmem:[%s2538_s16 + $0x18] sm:$0xff] }
  0x94   : >> { %1900 = vmatpush.msra.mxu2 %v950_v63  ;;  %984 = vmatpush.msra.mxu0 %v951_v7  ;;  %v962_v7 = vld [vmem:[%s2538_s16 + $0x90] sm:$0xff] }
  0x96   : >> { %392 = vperm.xlu2 %1990, %v3073_v9   ;;  %1901 = vmatpush.msra.mxu2 %v949_v1  ;;  %v946_v9 = vld [vmem:[%s2538_s16 + $0x10] sm:$0xff] }
  0x97   : >> { %488 = vperm.xlu1 %1989, %v2344_v41   ;;  %389 = vperm.xlu0 %1988, %v3074_v8   ;;  %v966_v8 = vld [vmem:[%s2538_s16 + $0xb0] sm:$0xff] }
  0x98   : >> { %1916 = vmatpush.msra.mxu3 %v966_v8  ;;  %985 = vmatpush.msra.mxu0 %v950_v63  ;;  %v944_v63 = vld [vmem:[%s2538_s16] sm:$0xff] }
  0x99   : >> { %1194 = vmatpush.msra.mxu1 %v966_v8  ;;  %1902 = vmatpush.msra.mxu2 %v948_v3  ;;  %v961_v8 = vld [vmem:[%s2538_s16 + $0x88] sm:$0xff] }
  0x9a   : >> { %1917 = vmatpush.msra.mxu3 %v965_v2  ;;  %986 = vmatpush.msra.mxu0 %v949_v1  ;;  %v960_v1 = vld [vmem:[%s2538_s16 + $0x80] sm:$0xff] }
  0x9b   : >> { %1195 = vmatpush.msra.mxu1 %v965_v2  ;;  %1903 = vmatpush.msra.mxu2 %v947_v5 }
  0x9c   : >> { %1918 = vmatpush.msra.mxu3 %v964_v4  ;;  %987 = vmatpush.msra.mxu0 %v948_v3 }
  0x9d   : >> { %1904 = vmatpush.msra.mxu2 %v946_v9  ;;  %1196 = vmatpush.msra.mxu1 %v964_v4  ;;  %v364_v4 = vstv %s1628_s14 }
  0x9e   : >> { %494 = vperm.xlu2 %1990, %v2352_v43   ;;  %1919 = vmatpush.msra.mxu3 %v963_v0 }
  0x9f   : >> { %395 = vperm.xlu1 %1989, %v3075_v10   ;;  %491 = vperm.xlu0 %1988, %v2347_v42  }
  0xa0   : >> { %1920 = vmatpush.msra.mxu3 %v962_v7  ;;  %1905 = vmatpush.msra.mxu2 %v945_v6 }
  0xa1   : >> { %988 = vmatpush.msra.mxu0 %v947_v5  ;;  %1197 = vmatpush.msra.mxu1 %v963_v0 }
  0xa2   : >> { %1921 = vmatpush.msra.mxu3 %v961_v8  ;;  %1906 = vmatpush.msra.mxu2 %v944_v63 }
  0xa3   : >> { %989 = vmatpush.msra.mxu0 %v946_v9  ;;  %1198 = vmatpush.msra.mxu1 %v962_v7  ;;  %v361_v9 = vlaneseq }
  0xa4   : >> { %1922 = vmatpush.msra.mxu3 %v960_v1 }
  0xa5   : >> { %990 = vmatpush.msra.mxu0 %v945_v6  ;;  %1199 = vmatpush.msra.mxu1 %v961_v8  ;;  %v362_v2 = vand.u32 127, %v361_v9  ;;  %v2102_v6 = vmov 1.0  }
  0xa6   : >> { %401 = vperm.xlu2 %1990, %v3076_v12   ;;  %v297_v12 = vld [vmem:[%s2182_s3] sm:$0xff] }
  0xa7   : >> { %497 = vperm.xlu1 %1989, %v2355_v44   ;;  %398 = vperm.xlu0 %1988, %v3077_v11   ;;  %v363_v3 = vadd.s32 128, %v362_v2  ;;  %v2595_v5 = vadd.s32 %v364_v4, %v362_v2 }
  0xa8   : >> { %991 = vmatpush.msra.mxu0 %v944_v63  ;;  %1200 = vmatpush.msra.mxu1 %v960_v1 }
  0xa9   : >> { %v2597_v0 = vadd.s32 %v364_v4, %v363_v3 }
  0xae   : >> { %503 = vperm.xlu2 %1990, %v2363_v46  }
  0xaf   : >> { %404 = vperm.xlu1 %1989, %v3078_v13   ;;  %500 = vperm.xlu0 %1988, %v2358_v45  }
  0xb6   : >> { %410 = vperm.xlu2 %1990, %v3079_v15  }
  0xb7   : >> { %506 = vperm.xlu1 %1989, %v2366_v47   ;;  %407 = vperm.xlu0 %1988, %v3080_v14   ;;  %v298_v14 = vld [vmem:[%s2182_s3 + $0x8] sm:$0xff] }
  0xbe   : >> { %512 = vperm.xlu2 %1990, %v2374_v49  }
  0xbf   : >> { %413 = vperm.xlu1 %1989, %v3081_v16   ;;  %509 = vperm.xlu0 %1988, %v2369_v48  }
  0xc6   : >> { %419 = vperm.xlu2 %1990, %v2259_v18  }
  0xc7   : >> { %515 = vperm.xlu1 %1989, %v2377_v50   ;;  %416 = vperm.xlu0 %1988, %v3082_v17  }
  0xc8   : >> { %v471_v1 = vpop.permute.xlu2 %470 }
  0xc9   : >> { %vm627_vm6 = vcmp.eq.s32.totalorder %v2595_v5, %v471_v1  ;;  %vm628_vm7 = vcmp.eq.s32.totalorder %v2597_v0, %v471_v1 }
  0xce   : >> { %521 = vperm.xlu2 %1990, %v2385_v52  }
  0xcf   : >> { %422 = vperm.xlu1 %1989, %v2264_v19   ;;  %518 = vperm.xlu0 %1988, %v2380_v51  }
  0xd0   : >> { %v375_v2 = vpop.permute.xlu2 %374 }
  0xd1   : >> { %vm563_vm10 = vcmp.eq.s32.totalorder %v2595_v5, %v375_v2  ;;  %vm564_vm12 = vcmp.eq.s32.totalorder %v2597_v0, %v375_v2  ;;  %v3083_v2 = vld [vmem:[#allocation26_spill] sm:$0xff] }
  0xd6   : >> { %428 = vperm.xlu2 %1990, %v2270_v21  }
  0xd7   : >> { %524 = vperm.xlu1 %1989, %v2388_v53   ;;  %425 = vperm.xlu0 %1988, %v2267_v20  }
  0xde   : >> { %530 = vperm.xlu2 %1990, %v2396_v55  }
  0xdf   : >> { %431 = vperm.xlu1 %1989, %v2275_v22   ;;  %527 = vperm.xlu0 %1988, %v2391_v54  }
  0xe1   : >> { %v465_v7 = vpop.permute.xlu0 %464  ;;  %v468_v8 = vpop.permute.xlu1 %467 }
  0xe2   : >> { %vm623_vm0 = vcmp.eq.s32.totalorder %v2595_v5, %v465_v7  ;;  %vm624_vm1 = vcmp.eq.s32.totalorder %v2597_v0, %v465_v7  ;;  %vm625_vm2 = vcmp.eq.s32.totalorder %v2595_v5, %v468_v8  ;;  %vm626_vm3 = vcmp.eq.s32.totalorder %v2597_v0, %v468_v8  ;;  %v477_v7 = vpop.permute.xlu2 %476 }
  0xe3   : >> { %1789 = vmatmul.msk.f32.vlgmr.msra.gmra.mxu2 %vm623_vm0, %v2102_v6  ;;  %1853 = vmatmul.msk.f32.vlgmr.msra.gmra.mxu3 %vm624_vm1, %v2102_v6  ;;  %vm631_vm15 = vcmp.eq.s32.totalorder %v2595_v5, %v477_v7  ;;  %vm632_vm1 = vcmp.eq.s32.totalorder %v2597_v0, %v477_v7 }
  0xe6   : >> { %437 = vperm.xlu2 %1990, %v2281_v24  }
  0xe7   : >> { %533 = vperm.xlu1 %1989, %v2399_v56   ;;  %434 = vperm.xlu0 %1988, %v2278_v23  }
  0xe9   : >> { %v369_v63 = vpop.permute.xlu0 %368  ;;  %v372_v9 = vpop.permute.xlu1 %371 }
  0xea   : >> { %vm559_vm4 = vcmp.eq.s32.totalorder %v2595_v5, %v369_v63  ;;  %vm560_vm5 = vcmp.eq.s32.totalorder %v2597_v0, %v369_v63  ;;  %vm561_vm8 = vcmp.eq.s32.totalorder %v2595_v5, %v372_v9  ;;  %vm562_vm9 = vcmp.eq.s32.totalorder %v2597_v0, %v372_v9  ;;  %v384_v1 = vpop.permute.xlu2 %383 }
  0xeb   : >> { %1757 = vmatmul.msk.f32.vlgmr.msra.gmra.mxu0 %vm559_vm4, %v2102_v6  ;;  %1790 = vmatmul.msk.f32.gmra.mxu2 %vm625_vm2, %v2102_v6 }
  0xec   : >> { %1821 = vmatmul.msk.f32.vlgmr.msra.gmra.mxu1 %vm560_vm5, %v2102_v6  ;;  %1854 = vmatmul.msk.f32.gmra.mxu3 %vm626_vm3, %v2102_v6 }
  0xee   : >> { %539 = vperm.xlu2 %1990, %v2407_v58  }
  0xef   : >> { %440 = vperm.xlu1 %1989, %v2286_v25   ;;  %536 = vperm.xlu0 %1988, %v2402_v57  }
  0xf1   : >> { %v474_v3 = vpop.permute.xlu0 %473  ;;  %v378_v4 = vpop.permute.xlu1 %377 }
  0xf2   : >> { %vm629_vm11 = vcmp.eq.s32.totalorder %v2595_v5, %v474_v3  ;;  %vm630_vm13 = vcmp.eq.s32.totalorder %v2597_v0, %v474_v3  ;;  %vm565_vm14 = vcmp.eq.s32.totalorder %v2595_v5, %v378_v4  ;;  %vm566_vm0 = vcmp.eq.s32.totalorder %v2597_v0, %v378_v4  ;;  %v3084_v4 = vld [vmem:[#allocation25_spill] sm:$0xff]  ;;  %v486_v7 = vpop.permute.xlu2 %485 }
  0xf3   : >> { %1758 = vmatmul.msk.f32.gmra.mxu0 %vm561_vm8, %v2102_v6  ;;  %1791 = vmatmul.msk.f32.gmra.mxu2 %vm627_vm6, %v2102_v6  ;;  %vm569_vm6 = vcmp.eq.s32.totalorder %v2595_v5, %v384_v1  ;;  %vm570_vm8 = vcmp.eq.s32.totalorder %v2597_v0, %v384_v1 }
  0xf4   : >> { %1822 = vmatmul.msk.f32.gmra.mxu1 %vm562_vm9, %v2102_v6  ;;  %1855 = vmatmul.msk.f32.gmra.mxu3 %vm628_vm7, %v2102_v6 }
  0xf6   : >> { %446 = vperm.xlu2 %1990, %v2292_v27  }
  0xf7   : >> { %542 = vperm.xlu1 %1989, %v2410_v59   ;;  %443 = vperm.xlu0 %1988, %v2289_v26  }
  0xf9   : >> { %v381_v8 = vpop.permute.xlu0 %380  ;;  %v480_v63 = vpop.permute.xlu1 %479 }
  0xfa   : >> { %vm567_vm2 = vcmp.eq.s32.totalorder %v2595_v5, %v381_v8  ;;  %vm633_vm3 = vcmp.eq.s32.totalorder %v2595_v5, %v480_v63  ;;  %vm568_vm4 = vcmp.eq.s32.totalorder %v2597_v0, %v381_v8  ;;  %vm634_vm5 = vcmp.eq.s32.totalorder %v2597_v0, %v480_v63  ;;  %v393_v1 = vpop.permute.xlu2 %392 }
  0xfb   : >> { %1759 = vmatmul.msk.f32.gmra.mxu0 %vm563_vm10, %v2102_v6  ;;  %1792 = vmatmul.msk.f32.gmra.mxu2 %vm629_vm11, %v2102_v6  ;;  %vm637_vm11 = vcmp.eq.s32.totalorder %v2595_v5, %v486_v7 }
  0xfc   : >> { %1823 = vmatmul.msk.f32.gmra.mxu1 %vm564_vm12, %v2102_v6  ;;  %1856 = vmatmul.msk.f32.gmra.mxu3 %vm630_vm13, %v2102_v6  ;;  %vm638_vm13 = vcmp.eq.s32.totalorder %v2597_v0, %v486_v7 }
  0xfe   : >> { %548 = vperm.xlu2 %1990, %v2418_v61  }
  0xff   : >> { %449 = vperm.xlu1 %1989, %v2297_v28   ;;  %545 = vperm.xlu0 %1988, %v2413_v60  }
 0x101   : >> { %v483_v9 = vpop.permute.xlu0 %482  ;;  %v387_v3 = vpop.permute.xlu1 %386 }
 0x102   : >> { %vm635_vm7 = vcmp.eq.s32.totalorder %v2595_v5, %v483_v9  ;;  %vm636_vm9 = vcmp.eq.s32.totalorder %v2597_v0, %v483_v9  ;;  %vm571_vm10 = vcmp.eq.s32.totalorder %v2595_v5, %v387_v3  ;;  %vm572_vm12 = vcmp.eq.s32.totalorder %v2597_v0, %v387_v3  ;;  %v495_v3 = vpop.permute.xlu2 %494 }
 0x103   : >> { %1760 = vmatmul.msk.f32.gmra.mxu0 %vm565_vm14, %v2102_v6  ;;  %1793 = vmatmul.msk.f32.gmra.mxu2 %vm631_vm15, %v2102_v6 }
 0x104   : >> { %1824 = vmatmul.msk.f32.gmra.mxu1 %vm566_vm0, %v2102_v6  ;;  %1857 = vmatmul.msk.f32.gmra.mxu3 %vm632_vm1, %v2102_v6 }
 0x106   : >> { %455 = vperm.xlu2 %1990, %v2303_v30  }
 0x107   : >> { %551 = vperm.xlu1 %1989, %v2421_v62   ;;  %452 = vperm.xlu0 %1988, %v2300_v29  }
 0x109   : >> { %v390_v8 = vpop.permute.xlu0 %389  ;;  %v489_v63 = vpop.permute.xlu1 %488 }
 0x10a   : >> { %vm573_vm14 = vcmp.eq.s32.totalorder %v2595_v5, %v390_v8  ;;  %vm639_vm15 = vcmp.eq.s32.totalorder %v2595_v5, %v489_v63  ;;  %vm574_vm0 = vcmp.eq.s32.totalorder %v2597_v0, %v390_v8  ;;  %vm640_vm1 = vcmp.eq.s32.totalorder %v2597_v0, %v489_v63  ;;  %v402_v8 = vpop.permute.xlu2 %401 }
 0x10b   : >> { %1761 = vmatmul.msk.f32.gmra.mxu0 %vm567_vm2, %v2102_v6  ;;  %1794 = vmatmul.msk.f32.gmra.mxu2 %vm633_vm3, %v2102_v6  ;;  %vm575_vm2 = vcmp.eq.s32.totalorder %v2595_v5, %v393_v1 }
 0x10c   : >> { %1825 = vmatmul.msk.f32.gmra.mxu1 %vm568_vm4, %v2102_v6  ;;  %1858 = vmatmul.msk.f32.gmra.mxu3 %vm634_vm5, %v2102_v6  ;;  %vm576_vm4 = vcmp.eq.s32.totalorder %v2597_v0, %v393_v1 }
 0x10e   : >> { %557 = vperm.xlu2 %1990, %v2429_v32  }
 0x10f   : >> { %458 = vperm.xlu1 %1989, %v2308_v31   ;;  %554 = vperm.xlu0 %1988, %v3083_v2  }
 0x111   : >> { %v492_v9 = vpop.permute.xlu0 %491  ;;  %v396_v2 = vpop.permute.xlu1 %395 }
 0x112   : >> { %vm641_vm3 = vcmp.eq.s32.totalorder %v2595_v5, %v492_v9  ;;  %vm642_vm5 = vcmp.eq.s32.totalorder %v2597_v0, %v492_v9  ;;  %v504_v9 = vpop.permute.xlu2 %503 }
 0x113   : >> { %1762 = vmatmul.msk.f32.gmra.mxu0 %vm569_vm6, %v2102_v6  ;;  %1795 = vmatmul.msk.f32.gmra.mxu2 %vm635_vm7, %v2102_v6  ;;  %vm577_vm6 = vcmp.eq.s32.totalorder %v2595_v5, %v396_v2  ;;  %vm643_vm7 = vcmp.eq.s32.totalorder %v2595_v5, %v495_v3 }
 0x114   : >> { %1826 = vmatmul.msk.f32.gmra.mxu1 %vm570_vm8, %v2102_v6  ;;  %1859 = vmatmul.msk.f32.gmra.mxu3 %vm636_vm9, %v2102_v6  ;;  %vm578_vm8 = vcmp.eq.s32.totalorder %v2597_v0, %v396_v2  ;;  %vm644_vm9 = vcmp.eq.s32.totalorder %v2597_v0, %v495_v3 }
 0x117   : >> { %461 = vperm.xlu0 %1988, %v3084_v4  }
 0x119   : >> { %v399_v4 = vpop.permute.xlu0 %398  ;;  %v498_v7 = vpop.permute.xlu1 %497 }
 0x11b   : >> { %1763 = vmatmul.msk.f32.gmra.mxu0 %vm571_vm10, %v2102_v6  ;;  %1796 = vmatmul.msk.f32.gmra.mxu2 %vm637_vm11, %v2102_v6  ;;  %vm579_vm10 = vcmp.eq.s32.totalorder %v2595_v5, %v399_v4  ;;  %vm645_vm11 = vcmp.eq.s32.totalorder %v2595_v5, %v498_v7 }
 0x11c   : >> { %1827 = vmatmul.msk.f32.gmra.mxu1 %vm572_vm12, %v2102_v6  ;;  %1860 = vmatmul.msk.f32.gmra.mxu3 %vm638_vm13, %v2102_v6  ;;  %vm580_vm12 = vcmp.eq.s32.totalorder %v2597_v0, %v399_v4  ;;  %vm646_vm13 = vcmp.eq.s32.totalorder %v2597_v0, %v498_v7  ;;  %v411_v4 = vpop.permute.xlu2 %410 }
 0x121   : >> { %v501_v63 = vpop.permute.xlu0 %500  ;;  %v405_v1 = vpop.permute.xlu1 %404 }
 0x123   : >> { %1764 = vmatmul.msk.f32.gmra.mxu0 %vm573_vm14, %v2102_v6  ;;  %1797 = vmatmul.msk.f32.gmra.mxu2 %vm639_vm15, %v2102_v6  ;;  %vm581_vm14 = vcmp.eq.s32.totalorder %v2595_v5, %v402_v8  ;;  %vm647_vm15 = vcmp.eq.s32.totalorder %v2595_v5, %v501_v63 }
 0x124   : >> { %1828 = vmatmul.msk.f32.gmra.mxu1 %vm574_vm0, %v2102_v6  ;;  %1861 = vmatmul.msk.f32.gmra.mxu3 %vm640_vm1, %v2102_v6  ;;  %vm582_vm0 = vcmp.eq.s32.totalorder %v2597_v0, %v402_v8  ;;  %vm648_vm1 = vcmp.eq.s32.totalorder %v2597_v0, %v501_v63  ;;  %v513_v63 = vpop.permute.xlu2 %512 }
 0x129   : >> { %v408_v2 = vpop.permute.xlu0 %407  ;;  %v507_v3 = vpop.permute.xlu1 %506 }
 0x12b   : >> { %1765 = vmatmul.msk.f32.gmra.mxu0 %vm575_vm2, %v2102_v6  ;;  %1798 = vmatmul.msk.f32.gmra.mxu2 %vm641_vm3, %v2102_v6  ;;  %vm583_vm2 = vcmp.eq.s32.totalorder %v2595_v5, %v405_v1  ;;  %vm649_vm3 = vcmp.eq.s32.totalorder %v2595_v5, %v504_v9 }
 0x12c   : >> { %1829 = vmatmul.msk.f32.gmra.mxu1 %vm576_vm4, %v2102_v6  ;;  %1862 = vmatmul.msk.f32.gmra.mxu3 %vm642_vm5, %v2102_v6  ;;  %vm584_vm4 = vcmp.eq.s32.totalorder %v2597_v0, %v405_v1  ;;  %vm650_vm5 = vcmp.eq.s32.totalorder %v2597_v0, %v504_v9 }
 0x131   : >> { %v510_v7 = vpop.permute.xlu0 %509  ;;  %v414_v8 = vpop.permute.xlu1 %413 }
 0x133   : >> { %1766 = vmatmul.msk.f32.gmra.mxu0 %vm577_vm6, %v2102_v6  ;;  %1799 = vmatmul.msk.f32.gmra.mxu2 %vm643_vm7, %v2102_v6  ;;  %vm585_vm6 = vcmp.eq.s32.totalorder %v2595_v5, %v408_v2  ;;  %vm651_vm7 = vcmp.eq.s32.totalorder %v2595_v5, %v507_v3 }
 0x134   : >> { %1830 = vmatmul.msk.f32.gmra.mxu1 %vm578_vm8, %v2102_v6  ;;  %1863 = vmatmul.msk.f32.gmra.mxu3 %vm644_vm9, %v2102_v6  ;;  %vm586_vm8 = vcmp.eq.s32.totalorder %v2597_v0, %v408_v2  ;;  %vm652_vm9 = vcmp.eq.s32.totalorder %v2597_v0, %v507_v3  ;;  %v329_v2 = vld [vmem:[%s2182_s3 + $0x100] sm:$0xff] }
 0x139   : >> { %v417_v1 = vpop.permute.xlu0 %416 }
 0x13b   : >> { %1767 = vmatmul.msk.f32.gmra.mxu0 %vm579_vm10, %v2102_v6  ;;  %1800 = vmatmul.msk.f32.gmra.mxu2 %vm645_vm11, %v2102_v6  ;;  %vm587_vm10 = vcmp.eq.s32.totalorder %v2595_v5, %v411_v4  ;;  %vm653_vm11 = vcmp.eq.s32.totalorder %v2595_v5, %v510_v7 }
 0x13c   : >> { %1831 = vmatmul.msk.f32.gmra.mxu1 %vm580_vm12, %v2102_v6  ;;  %1864 = vmatmul.msk.f32.gmra.mxu3 %vm646_vm13, %v2102_v6  ;;  %vm588_vm12 = vcmp.eq.s32.totalorder %v2597_v0, %v411_v4  ;;  %vm654_vm13 = vcmp.eq.s32.totalorder %v2597_v0, %v510_v7  ;;  %v516_v4 = vpop.permute.xlu1 %515 }
 0x143   : >> { %1768 = vmatmul.msk.f32.gmra.mxu0 %vm581_vm14, %v2102_v6  ;;  %1801 = vmatmul.msk.f32.gmra.mxu2 %vm647_vm15, %v2102_v6  ;;  %vm589_vm14 = vcmp.eq.s32.totalorder %v2595_v5, %v414_v8  ;;  %vm655_vm15 = vcmp.eq.s32.totalorder %v2595_v5, %v513_v63 }
 0x144   : >> { %1832 = vmatmul.msk.f32.gmra.mxu1 %vm582_vm0, %v2102_v6  ;;  %1865 = vmatmul.msk.f32.gmra.mxu3 %vm648_vm1, %v2102_v6  ;;  %vm590_vm0 = vcmp.eq.s32.totalorder %v2597_v0, %v414_v8  ;;  %vm656_vm1 = vcmp.eq.s32.totalorder %v2597_v0, %v513_v63 }
 0x14b   : >> { %1769 = vmatmul.msk.f32.gmra.mxu0 %vm583_vm2, %v2102_v6  ;;  %1802 = vmatmul.msk.f32.gmra.mxu2 %vm649_vm3, %v2102_v6  ;;  %vm591_vm2 = vcmp.eq.s32.totalorder %v2595_v5, %v417_v1  ;;  %vm657_vm3 = vcmp.eq.s32.totalorder %v2595_v5, %v516_v4 }
 0x14c   : >> { %1833 = vmatmul.msk.f32.gmra.mxu1 %vm584_vm4, %v2102_v6  ;;  %1866 = vmatmul.msk.f32.gmra.mxu3 %vm650_vm5, %v2102_v6  ;;  %vm592_vm4 = vcmp.eq.s32.totalorder %v2597_v0, %v417_v1  ;;  %vm658_vm5 = vcmp.eq.s32.totalorder %v2597_v0, %v516_v4 }
 0x153   : >> { %1770 = vmatmul.msk.f32.gmra.mxu0 %vm585_vm6, %v2102_v6  ;;  %1803 = vmatmul.msk.f32.gmra.mxu2 %vm651_vm7, %v2102_v6 }
 0x154   : >> { %1834 = vmatmul.msk.f32.gmra.mxu1 %vm586_vm8, %v2102_v6  ;;  %1867 = vmatmul.msk.f32.gmra.mxu3 %vm652_vm9, %v2102_v6 }
 0x15b   : >> { %1771 = vmatmul.msk.f32.gmra.mxu0 %vm587_vm10, %v2102_v6  ;;  %1804 = vmatmul.msk.f32.gmra.mxu2 %vm653_vm11, %v2102_v6 }
 0x15c   : >> { %1835 = vmatmul.msk.f32.gmra.mxu1 %vm588_vm12, %v2102_v6  ;;  %1868 = vmatmul.msk.f32.gmra.mxu3 %vm654_vm13, %v2102_v6 }
 0x163   : >> { %1772 = vmatmul.msk.f32.gmra.mxu0 %vm589_vm14, %v2102_v6  ;;  %1805 = vmatmul.msk.f32.gmra.mxu2 %vm655_vm15, %v2102_v6 }
 0x164   : >> { %1836 = vmatmul.msk.f32.gmra.mxu1 %vm590_vm0, %v2102_v6  ;;  %1869 = vmatmul.msk.f32.gmra.mxu3 %vm656_vm1, %v2102_v6 }
 0x166   : >> { %v1089_v9 = vpop.f32.mrf.mxu2  ;;  %v1298_v3 = vpop.f32.mrf.mxu3 }
 0x167   : >> { %v1299_v7 = vadd.f32 %v1298_v3, %v1089_v9  ;;  %v519_v9 = vpop.permute.xlu0 %518 }
 0x168   : >> { %v993_v10 = vpop.f32.mrf.mxu0  ;;  %vm659_vm7 = vcmp.eq.s32.totalorder %v2595_v5, %v519_v9  ;;  %vm660_vm9 = vcmp.eq.s32.totalorder %v2597_v0, %v519_v9 }
 0x169   : >> { %v1426_v11 = vadd.f32 %v1299_v7, %v329_v2  ;;  %v1202_v13 = vpop.f32.mrf.mxu1 }
 0x16a   : >> { %v1203_v8 = vadd.f32 %v1202_v13, %v993_v10  ;;  %v420_v10 = vpop.permute.xlu2 %419 }
 0x16b   : >> { %1490 = vst [vmem:[%s2182_s3 + $0x100] sm:$0xff] %v1426_v11  ;;  %1773 = vmatmul.msk.f32.gmra.mxu0 %vm591_vm2, %v2102_v6  ;;  %1806 = vmatmul.msk.f32.gmra.mxu2 %vm657_vm3, %v2102_v6  ;;  %v330_v11 = vld [vmem:[%s2182_s3 + $0x108] sm:$0xff]  ;;  %vm593_vm6 = vcmp.eq.s32.totalorder %v2595_v5, %v420_v10  ;;  %vm594_vm8 = vcmp.eq.s32.totalorder %v2597_v0, %v420_v10 }
 0x16c   : >> { %v1394_v63 = vadd.f32 %v1203_v8, %v297_v12  ;;  %1837 = vmatmul.msk.f32.gmra.mxu1 %vm592_vm4, %v2102_v6  ;;  %1870 = vmatmul.msk.f32.gmra.mxu3 %vm658_vm5, %v2102_v6 }
 0x16e   : >> { %1458 = vst [vmem:[%s2182_s3] sm:$0xff] %v1394_v63  ;;  %v1092_v13 = vpop.f32.mrf.mxu2 }
 0x16f   : >> { %v1301_v2 = vpop.f32.mrf.mxu3 }
 0x170   : >> { %v1302_v3 = vadd.f32 %v1301_v2, %v1092_v13  ;;  %v996_v7 = vpop.f32.mrf.mxu0  ;;  %v331_v13 = vld [vmem:[%s2182_s3 + $0x110] sm:$0xff] }
 0x171   : >> { %v1205_v15 = vpop.f32.mrf.mxu1 }
 0x172   : >> { %v1427_v1 = vadd.f32 %v1302_v3, %v330_v11  ;;  %v1206_v4 = vadd.f32 %v1205_v15, %v996_v7  ;;  %v423_v15 = vpop.permute.xlu1 %422  ;;  %v522_v63 = vpop.permute.xlu2 %521  ;;  %v299_v7 = vld [vmem:[%s2182_s3 + $0x10] sm:$0xff] }
 0x173   : >> { %1774 = vmatmul.msk.f32.gmra.mxu0 %vm593_vm6, %v2102_v6  ;;  %1807 = vmatmul.msk.f32.gmra.mxu2 %vm659_vm7, %v2102_v6  ;;  %vm595_vm10 = vcmp.eq.s32.totalorder %v2595_v5, %v423_v15  ;;  %vm661_vm11 = vcmp.eq.s32.totalorder %v2595_v5, %v522_v63  ;;  %vm596_vm12 = vcmp.eq.s32.totalorder %v2597_v0, %v423_v15 }
 0x174   : >> { %1491 = vst [vmem:[%s2182_s3 + $0x108] sm:$0xff] %v1427_v1  ;;  %v1395_v12 = vadd.f32 %v1206_v4, %v298_v14  ;;  %1838 = vmatmul.msk.f32.gmra.mxu1 %vm594_vm8, %v2102_v6  ;;  %1871 = vmatmul.msk.f32.gmra.mxu3 %vm660_vm9, %v2102_v6  ;;  %vm662_vm13 = vcmp.eq.s32.totalorder %v2597_v0, %v522_v63  ;;  %v426_v1 = vpop.permute.xlu0 %425 }
 0x175   : >> { %vm597_vm14 = vcmp.eq.s32.totalorder %v2595_v5, %v426_v1  ;;  %vm598_vm0 = vcmp.eq.s32.totalorder %v2597_v0, %v426_v1 }
 0x176   : >> { %1459 = vst [vmem:[%s2182_s3 + $0x8] sm:$0xff] %v1395_v12  ;;  %v1095_v8 = vpop.f32.mrf.mxu2 }
 0x177   : >> { %v1304_v11 = vpop.f32.mrf.mxu3 }
 0x178   : >> { %v1305_v2 = vadd.f32 %v1304_v11, %v1095_v8  ;;  %v999_v3 = vpop.f32.mrf.mxu0  ;;  %v332_v8 = vld [vmem:[%s2182_s3 + $0x118] sm:$0xff] }
 0x179   : >> { %v1208_v10 = vpop.f32.mrf.mxu1 }
 0x17a   : >> { %v1428_v16 = vadd.f32 %v1305_v2, %v331_v13  ;;  %v1209_v9 = vadd.f32 %v1208_v10, %v999_v3  ;;  %v525_v12 = vpop.permute.xlu1 %524  ;;  %v300_v3 = vld [vmem:[%s2182_s3 + $0x18] sm:$0xff] }
 0x17b   : >> { %1775 = vmatmul.msk.f32.gmra.mxu0 %vm595_vm10, %v2102_v6  ;;  %1808 = vmatmul.msk.f32.gmra.mxu2 %vm661_vm11, %v2102_v6  ;;  %vm663_vm15 = vcmp.eq.s32.totalorder %v2595_v5, %v525_v12  ;;  %vm664_vm1 = vcmp.eq.s32.totalorder %v2597_v0, %v525_v12 }
 0x17c   : >> { %1492 = vst [vmem:[%s2182_s3 + $0x110] sm:$0xff] %v1428_v16  ;;  %v1396_v14 = vadd.f32 %v1209_v9, %v299_v7  ;;  %1839 = vmatmul.msk.f32.gmra.mxu1 %vm596_vm12, %v2102_v6  ;;  %1872 = vmatmul.msk.f32.gmra.mxu3 %vm662_vm13, %v2102_v6  ;;  %v429_v7 = vpop.permute.xlu2 %428 }
 0x17d   : >> { %vm599_vm2 = vcmp.eq.s32.totalorder %v2595_v5, %v429_v7  ;;  %vm600_vm4 = vcmp.eq.s32.totalorder %v2597_v0, %v429_v7 }
 0x17e   : >> { %1460 = vst [vmem:[%s2182_s3 + $0x10] sm:$0xff] %v1396_v14  ;;  %v1098_v4 = vpop.f32.mrf.mxu2  ;;  %v528_v14 = vpop.permute.xlu0 %527 }
 0x17f   : >> { %v1307_v13 = vpop.f32.mrf.mxu3  ;;  %vm665_vm3 = vcmp.eq.s32.totalorder %v2595_v5, %v528_v14  ;;  %vm666_vm5 = vcmp.eq.s32.totalorder %v2597_v0, %v528_v14 }
 0x180   : >> { %v1308_v11 = vadd.f32 %v1307_v13, %v1098_v4  ;;  %v1002_v2 = vpop.f32.mrf.mxu0  ;;  %v333_v4 = vld [vmem:[%s2182_s3 + $0x120] sm:$0xff] }
 0x181   : >> { %v1211_v15 = vpop.f32.mrf.mxu1 }
 0x182   : >> { %v1429_v10 = vadd.f32 %v1308_v11, %v332_v8  ;;  %v1212_v16 = vadd.f32 %v1211_v15, %v1002_v2  ;;  %v301_v2 = vld [vmem:[%s2182_s3 + $0x20] sm:$0xff] }
 0x183   : >> { %1776 = vmatmul.msk.f32.gmra.mxu0 %vm597_vm14, %v2102_v6  ;;  %1809 = vmatmul.msk.f32.gmra.mxu2 %vm663_vm15, %v2102_v6 }
 0x184   : >> { %1493 = vst [vmem:[%s2182_s3 + $0x118] sm:$0xff] %v1429_v10  ;;  %v1397_v63 = vadd.f32 %v1212_v16, %v300_v3  ;;  %1840 = vmatmul.msk.f32.gmra.mxu1 %vm598_vm0, %v2102_v6  ;;  %1873 = vmatmul.msk.f32.gmra.mxu3 %vm664_vm1, %v2102_v6  ;;  %v432_v10 = vpop.permute.xlu1 %431 }
 0x185   : >> { %vm601_vm6 = vcmp.eq.s32.totalorder %v2595_v5, %v432_v10  ;;  %vm602_vm8 = vcmp.eq.s32.totalorder %v2597_v0, %v432_v10 }
 0x186   : >> { %1461 = vst [vmem:[%s2182_s3 + $0x18] sm:$0xff] %v1397_v63  ;;  %v1101_v9 = vpop.f32.mrf.mxu2  ;;  %v531_v63 = vpop.permute.xlu2 %530 }
 0x187   : >> { %v1310_v8 = vpop.f32.mrf.mxu3  ;;  %vm667_vm7 = vcmp.eq.s32.totalorder %v2595_v5, %v531_v63  ;;  %vm668_vm9 = vcmp.eq.s32.totalorder %v2597_v0, %v531_v63 }
 0x188   : >> { %v1311_v13 = vadd.f32 %v1310_v8, %v1101_v9  ;;  %v1005_v11 = vpop.f32.mrf.mxu0  ;;  %v334_v9 = vld [vmem:[%s2182_s3 + $0x128] sm:$0xff] }
 0x189   : >> { %v1214_v1 = vpop.f32.mrf.mxu1 }
 0x18a   : >> { %v1430_v15 = vadd.f32 %v1311_v13, %v333_v4  ;;  %v1215_v12 = vadd.f32 %v1214_v1, %v1005_v11  ;;  %v302_v11 = vld [vmem:[%s2182_s3 + $0x28] sm:$0xff] }
 0x18b   : >> { %1777 = vmatmul.msk.f32.gmra.mxu0 %vm599_vm2, %v2102_v6  ;;  %1810 = vmatmul.msk.f32.gmra.mxu2 %vm665_vm3, %v2102_v6 }
 0x18c   : >> { %1494 = vst [vmem:[%s2182_s3 + $0x120] sm:$0xff] %v1430_v15  ;;  %v1398_v3 = vadd.f32 %v1215_v12, %v301_v2  ;;  %1841 = vmatmul.msk.f32.gmra.mxu1 %vm600_vm4, %v2102_v6  ;;  %1874 = vmatmul.msk.f32.gmra.mxu3 %vm666_vm5, %v2102_v6  ;;  %v435_v15 = vpop.permute.xlu0 %434 }
 0x18d   : >> { %vm603_vm10 = vcmp.eq.s32.totalorder %v2595_v5, %v435_v15  ;;  %vm604_vm12 = vcmp.eq.s32.totalorder %v2597_v0, %v435_v15 }
 0x18e   : >> { %1462 = vst [vmem:[%s2182_s3 + $0x20] sm:$0xff] %v1398_v3  ;;  %v1104_v16 = vpop.f32.mrf.mxu2  ;;  %v534_v3 = vpop.permute.xlu1 %533 }
 0x18f   : >> { %v1313_v4 = vpop.f32.mrf.mxu3  ;;  %vm669_vm11 = vcmp.eq.s32.totalorder %v2595_v5, %v534_v3  ;;  %vm670_vm13 = vcmp.eq.s32.totalorder %v2597_v0, %v534_v3 }
 0x190   : >> { %v1314_v8 = vadd.f32 %v1313_v4, %v1104_v16  ;;  %v1008_v13 = vpop.f32.mrf.mxu0  ;;  %v335_v16 = vld [vmem:[%s2182_s3 + $0x130] sm:$0xff] }
 0x191   : >> { %v1217_v7 = vpop.f32.mrf.mxu1 }
 0x192   : >> { %v1431_v1 = vadd.f32 %v1314_v8, %v334_v9  ;;  %v1218_v14 = vadd.f32 %v1217_v7, %v1008_v13  ;;  %v303_v13 = vld [vmem:[%s2182_s3 + $0x30] sm:$0xff] }
 0x193   : >> { %1778 = vmatmul.msk.f32.gmra.mxu0 %vm601_vm6, %v2102_v6  ;;  %1811 = vmatmul.msk.f32.gmra.mxu2 %vm667_vm7, %v2102_v6 }
 0x194   : >> { %1495 = vst [vmem:[%s2182_s3 + $0x128] sm:$0xff] %v1431_v1  ;;  %v1399_v2 = vadd.f32 %v1218_v14, %v302_v11  ;;  %1842 = vmatmul.msk.f32.gmra.mxu1 %vm602_vm8, %v2102_v6  ;;  %1875 = vmatmul.msk.f32.gmra.mxu3 %vm668_vm9, %v2102_v6  ;;  %v438_v1 = vpop.permute.xlu2 %437 }
 0x195   : >> { %vm605_vm15 = vcmp.eq.s32.totalorder %v2595_v5, %v438_v1  ;;  %vm606_vm1 = vcmp.eq.s32.totalorder %v2597_v0, %v438_v1 }
 0x196   : >> { %1463 = vst [vmem:[%s2182_s3 + $0x28] sm:$0xff] %v1399_v2  ;;  %v1107_v12 = vpop.f32.mrf.mxu2  ;;  %v537_v2 = vpop.permute.xlu0 %536 }
 0x197   : >> { %v1316_v9 = vpop.f32.mrf.mxu3  ;;  %vm671_vm14 = vcmp.eq.s32.totalorder %v2595_v5, %v537_v2  ;;  %vm672_vm0 = vcmp.eq.s32.totalorder %v2597_v0, %v537_v2 }
 0x198   : >> { %v1317_v4 = vadd.f32 %v1316_v9, %v1107_v12  ;;  %v1011_v8 = vpop.f32.mrf.mxu0  ;;  %v336_v12 = vld [vmem:[%s2182_s3 + $0x138] sm:$0xff] }
 0x199   : >> { %v1220_v10 = vpop.f32.mrf.mxu1 }
 0x19a   : >> { %v1432_v7 = vadd.f32 %v1317_v4, %v335_v16  ;;  %v1221_v63 = vadd.f32 %v1220_v10, %v1011_v8  ;;  %v304_v8 = vld [vmem:[%s2182_s3 + $0x38] sm:$0xff] }
 0x19b   : >> { %1779 = vmatmul.msk.f32.gmra.mxu0 %vm603_vm10, %v2102_v6  ;;  %1812 = vmatmul.msk.f32.gmra.mxu2 %vm669_vm11, %v2102_v6 }
 0x19c   : >> { %1496 = vst [vmem:[%s2182_s3 + $0x130] sm:$0xff] %v1432_v7  ;;  %v1400_v11 = vadd.f32 %v1221_v63, %v303_v13  ;;  %1843 = vmatmul.msk.f32.gmra.mxu1 %vm604_vm12, %v2102_v6  ;;  %1876 = vmatmul.msk.f32.gmra.mxu3 %vm670_vm13, %v2102_v6  ;;  %v441_v7 = vpop.permute.xlu1 %440 }
 0x19d   : >> { %vm607_vm3 = vcmp.eq.s32.totalorder %v2595_v5, %v441_v7  ;;  %vm608_vm5 = vcmp.eq.s32.totalorder %v2597_v0, %v441_v7  ;;  %v306_v7 = vld [vmem:[%s2182_s3 + $0x48] sm:$0xff] }
 0x19e   : >> { %1464 = vst [vmem:[%s2182_s3 + $0x30] sm:$0xff] %v1400_v11  ;;  %v1110_v14 = vpop.f32.mrf.mxu2  ;;  %v540_v11 = vpop.permute.xlu2 %539 }
 0x19f   : >> { %v1319_v16 = vpop.f32.mrf.mxu3  ;;  %vm673_vm2 = vcmp.eq.s32.totalorder %v2595_v5, %v540_v11  ;;  %vm674_vm4 = vcmp.eq.s32.totalorder %v2597_v0, %v540_v11 }
 0x1a0   : >> { %v1320_v9 = vadd.f32 %v1319_v16, %v1110_v14  ;;  %v1014_v4 = vpop.f32.mrf.mxu0  ;;  %v337_v14 = vld [vmem:[%s2182_s3 + $0x140] sm:$0xff] }
 0x1a1   : >> { %v1223_v15 = vpop.f32.mrf.mxu1 }
 0x1a2   : >> { %v1433_v3 = vadd.f32 %v1320_v9, %v336_v12  ;;  %v1224_v13 = vadd.f32 %v1223_v15, %v1014_v4  ;;  %v305_v9 = vld [vmem:[%s2182_s3 + $0x40] sm:$0xff] }
 0x1a3   : >> { %1780 = vmatmul.msk.f32.gmra.mxu0 %vm605_vm15, %v2102_v6  ;;  %1813 = vmatmul.msk.f32.gmra.mxu2 %vm671_vm14, %v2102_v6 }
 0x1a4   : >> { %1497 = vst [vmem:[%s2182_s3 + $0x138] sm:$0xff] %v1433_v3  ;;  %v1401_v10 = vadd.f32 %v1224_v13, %v304_v8  ;;  %1844 = vmatmul.msk.f32.gmra.mxu1 %vm606_vm1, %v2102_v6  ;;  %1877 = vmatmul.msk.f32.gmra.mxu3 %vm672_vm0, %v2102_v6  ;;  %v444_v3 = vpop.permute.xlu0 %443 }
 0x1a5   : >> { %vm609_vm7 = vcmp.eq.s32.totalorder %v2595_v5, %v444_v3  ;;  %vm610_vm9 = vcmp.eq.s32.totalorder %v2597_v0, %v444_v3  ;;  %v307_v3 = vld [vmem:[%s2182_s3 + $0x50] sm:$0xff] }
 0x1a6   : >> { %1465 = vst [vmem:[%s2182_s3 + $0x38] sm:$0xff] %v1401_v10  ;;  %v1113_v63 = vpop.f32.mrf.mxu2  ;;  %v543_v10 = vpop.permute.xlu1 %542 }
 0x1a7   : >> { %v1322_v2 = vpop.f32.mrf.mxu3  ;;  %vm675_vm6 = vcmp.eq.s32.totalorder %v2595_v5, %v543_v10  ;;  %vm676_vm8 = vcmp.eq.s32.totalorder %v2597_v0, %v543_v10 }
 0x1a8   : >> { %v1323_v12 = vadd.f32 %v1322_v2, %v1113_v63  ;;  %v1017_v16 = vpop.f32.mrf.mxu0  ;;  %v338_v63 = vld [vmem:[%s2182_s3 + $0x148] sm:$0xff] }
 0x1a9   : >> { %v1226_v4 = vpop.f32.mrf.mxu1 }
 0x1aa   : >> { %v1434_v1 = vadd.f32 %v1323_v12, %v337_v14  ;;  %v1227_v8 = vadd.f32 %v1226_v4, %v1017_v16 }
 0x1ab   : >> { %1781 = vmatmul.msk.f32.gmra.mxu0 %vm607_vm3, %v2102_v6  ;;  %1814 = vmatmul.msk.f32.gmra.mxu2 %vm673_vm2, %v2102_v6 }
 0x1ac   : >> { %1498 = vst [vmem:[%s2182_s3 + $0x140] sm:$0xff] %v1434_v1  ;;  %v1402_v15 = vadd.f32 %v1227_v8, %v305_v9  ;;  %1845 = vmatmul.msk.f32.gmra.mxu1 %vm608_vm5, %v2102_v6  ;;  %1878 = vmatmul.msk.f32.gmra.mxu3 %vm674_vm4, %v2102_v6  ;;  %v447_v1 = vpop.permute.xlu2 %446 }
 0x1ad   : >> { %vm611_vm10 = vcmp.eq.s32.totalorder %v2595_v5, %v447_v1  ;;  %vm612_vm12 = vcmp.eq.s32.totalorder %v2597_v0, %v447_v1 }
 0x1ae   : >> { %1466 = vst [vmem:[%s2182_s3 + $0x40] sm:$0xff] %v1402_v15  ;;  %v1116_v13 = vpop.f32.mrf.mxu2  ;;  %v546_v15 = vpop.permute.xlu0 %545 }
 0x1af   : >> { %v1325_v11 = vpop.f32.mrf.mxu3  ;;  %vm677_vm11 = vcmp.eq.s32.totalorder %v2595_v5, %v546_v15  ;;  %vm678_vm13 = vcmp.eq.s32.totalorder %v2597_v0, %v546_v15  ;;  %v308_v15 = vld [vmem:[%s2182_s3 + $0x58] sm:$0xff] }
 0x1b0   : >> { %v1326_v14 = vadd.f32 %v1325_v11, %v1116_v13  ;;  %v1020_v2 = vpop.f32.mrf.mxu0  ;;  %v339_v13 = vld [vmem:[%s2182_s3 + $0x150] sm:$0xff] }
 0x1b1   : >> { %v1229_v12 = vpop.f32.mrf.mxu1 }
 0x1b2   : >> { %v1435_v16 = vadd.f32 %v1326_v14, %v338_v63  ;;  %v1230_v9 = vadd.f32 %v1229_v12, %v1020_v2 }
 0x1b3   : >> { %1782 = vmatmul.msk.f32.gmra.mxu0 %vm609_vm7, %v2102_v6  ;;  %1815 = vmatmul.msk.f32.gmra.mxu2 %vm675_vm6, %v2102_v6 }
 0x1b4   : >> { %1499 = vst [vmem:[%s2182_s3 + $0x148] sm:$0xff] %v1435_v16  ;;  %v1403_v4 = vadd.f32 %v1230_v9, %v306_v7  ;;  %1846 = vmatmul.msk.f32.gmra.mxu1 %vm610_vm9, %v2102_v6  ;;  %1879 = vmatmul.msk.f32.gmra.mxu3 %vm676_vm8, %v2102_v6  ;;  %v450_v16 = vpop.permute.xlu1 %449 }
 0x1b5   : >> { %vm613_vm15 = vcmp.eq.s32.totalorder %v2595_v5, %v450_v16  ;;  %vm614_vm1 = vcmp.eq.s32.totalorder %v2597_v0, %v450_v16  ;;  %v309_v16 = vld [vmem:[%s2182_s3 + $0x60] sm:$0xff] }
 0x1b6   : >> { %1467 = vst [vmem:[%s2182_s3 + $0x48] sm:$0xff] %v1403_v4  ;;  %v1119_v8 = vpop.f32.mrf.mxu2  ;;  %v549_v4 = vpop.permute.xlu2 %548 }
 0x1b7   : >> { %v1328_v10 = vpop.f32.mrf.mxu3  ;;  %vm679_vm14 = vcmp.eq.s32.totalorder %v2595_v5, %v549_v4  ;;  %vm680_vm0 = vcmp.eq.s32.totalorder %v2597_v0, %v549_v4 }
 0x1b8   : >> { %v1329_v63 = vadd.f32 %v1328_v10, %v1119_v8  ;;  %v1023_v11 = vpop.f32.mrf.mxu0  ;;  %v340_v8 = vld [vmem:[%s2182_s3 + $0x158] sm:$0xff] }
 0x1b9   : >> { %v1232_v14 = vpop.f32.mrf.mxu1 }
 0x1ba   : >> { %v1436_v2 = vadd.f32 %v1329_v63, %v339_v13  ;;  %v1233_v7 = vadd.f32 %v1232_v14, %v1023_v11 }
 0x1bb   : >> { %1783 = vmatmul.msk.f32.gmra.mxu0 %vm611_vm10, %v2102_v6  ;;  %1816 = vmatmul.msk.f32.gmra.mxu2 %vm677_vm11, %v2102_v6 }
 0x1bc   : >> { %1500 = vst [vmem:[%s2182_s3 + $0x150] sm:$0xff] %v1436_v2  ;;  %v1404_v12 = vadd.f32 %v1233_v7, %v307_v3  ;;  %1847 = vmatmul.msk.f32.gmra.mxu1 %vm612_vm12, %v2102_v6  ;;  %1880 = vmatmul.msk.f32.gmra.mxu3 %vm678_vm13, %v2102_v6  ;;  %v453_v2 = vpop.permute.xlu0 %452 }
 0x1bd   : >> { %vm615_vm3 = vcmp.eq.s32.totalorder %v2595_v5, %v453_v2  ;;  %vm616_vm5 = vcmp.eq.s32.totalorder %v2597_v0, %v453_v2  ;;  %v310_v2 = vld [vmem:[%s2182_s3 + $0x68] sm:$0xff] }
 0x1be   : >> { %1468 = vst [vmem:[%s2182_s3 + $0x50] sm:$0xff] %v1404_v12  ;;  %v1122_v9 = vpop.f32.mrf.mxu2  ;;  %v552_v12 = vpop.permute.xlu1 %551 }
 0x1bf   : >> { %v1331_v1 = vpop.f32.mrf.mxu3  ;;  %vm681_vm2 = vcmp.eq.s32.totalorder %v2595_v5, %v552_v12  ;;  %vm682_vm4 = vcmp.eq.s32.totalorder %v2597_v0, %v552_v12 }
 0x1c0   : >> { %v1332_v13 = vadd.f32 %v1331_v1, %v1122_v9  ;;  %v1026_v10 = vpop.f32.mrf.mxu0  ;;  %v341_v9 = vld [vmem:[%s2182_s3 + $0x160] sm:$0xff] }
 0x1c1   : >> { %v1235_v63 = vpop.f32.mrf.mxu1 }
 0x1c2   : >> { %v1437_v11 = vadd.f32 %v1332_v13, %v340_v8  ;;  %v1236_v3 = vadd.f32 %v1235_v63, %v1026_v10  ;;  %v456_v63 = vpop.permute.xlu2 %455 }
 0x1c3   : >> { %1784 = vmatmul.msk.f32.gmra.mxu0 %vm613_vm15, %v2102_v6  ;;  %1817 = vmatmul.msk.f32.gmra.mxu2 %vm679_vm14, %v2102_v6  ;;  %vm617_vm6 = vcmp.eq.s32.totalorder %v2595_v5, %v456_v63  ;;  %vm618_vm8 = vcmp.eq.s32.totalorder %v2597_v0, %v456_v63 }
 0x1c4   : >> { %1501 = vst [vmem:[%s2182_s3 + $0x158] sm:$0xff] %v1437_v11  ;;  %v1405_v14 = vadd.f32 %v1236_v3, %v308_v15  ;;  %1848 = vmatmul.msk.f32.gmra.mxu1 %vm614_vm1, %v2102_v6  ;;  %1881 = vmatmul.msk.f32.gmra.mxu3 %vm680_vm0, %v2102_v6 }
 0x1c6   : >> { %1469 = vst [vmem:[%s2182_s3 + $0x58] sm:$0xff] %v1405_v14  ;;  %v1125_v7 = vpop.f32.mrf.mxu2  ;;  %v555_v14 = vpop.permute.xlu0 %554 }
 0x1c7   : >> { %v1334_v4 = vpop.f32.mrf.mxu3  ;;  %vm683_vm7 = vcmp.eq.s32.totalorder %v2595_v5, %v555_v14  ;;  %vm684_vm9 = vcmp.eq.s32.totalorder %v2597_v0, %v555_v14 }
 0x1c8   : >> { %v1335_v8 = vadd.f32 %v1334_v4, %v1125_v7  ;;  %v1029_v1 = vpop.f32.mrf.mxu0  ;;  %v342_v7 = vld [vmem:[%s2182_s3 + $0x168] sm:$0xff] }
 0x1c9   : >> { %v1238_v13 = vpop.f32.mrf.mxu1 }
 0x1ca   : >> { %v1438_v10 = vadd.f32 %v1335_v8, %v341_v9  ;;  %v1239_v15 = vadd.f32 %v1238_v13, %v1029_v1 }
 0x1cb   : >> { %1785 = vmatmul.msk.f32.gmra.mxu0 %vm615_vm3, %v2102_v6  ;;  %1818 = vmatmul.msk.f32.gmra.mxu2 %vm681_vm2, %v2102_v6 }
 0x1cc   : >> { %1502 = vst [vmem:[%s2182_s3 + $0x160] sm:$0xff] %v1438_v10  ;;  %v1406_v11 = vadd.f32 %v1239_v15, %v309_v16  ;;  %1849 = vmatmul.msk.f32.gmra.mxu1 %vm616_vm5, %v2102_v6  ;;  %1882 = vmatmul.msk.f32.gmra.mxu3 %vm682_vm4, %v2102_v6  ;;  %v558_v10 = vpop.permute.xlu2 %557 }
 0x1cd   : >> { %vm685_vm10 = vcmp.eq.s32.totalorder %v2595_v5, %v558_v10  ;;  %vm686_vm12 = vcmp.eq.s32.totalorder %v2597_v0, %v558_v10 }
 0x1ce   : >> { %1470 = vst [vmem:[%s2182_s3 + $0x60] sm:$0xff] %v1406_v11  ;;  %v1128_v3 = vpop.f32.mrf.mxu2  ;;  %v459_v11 = vpop.permute.xlu1 %458 }
 0x1cf   : >> { %v1337_v12 = vpop.f32.mrf.mxu3  ;;  %vm619_vm11 = vcmp.eq.s32.totalorder %v2595_v5, %v459_v11  ;;  %vm620_vm13 = vcmp.eq.s32.totalorder %v2597_v0, %v459_v11 }
 0x1d0   : >> { %v1338_v9 = vadd.f32 %v1337_v12, %v1128_v3  ;;  %v1032_v4 = vpop.f32.mrf.mxu0  ;;  %v343_v3 = vld [vmem:[%s2182_s3 + $0x170] sm:$0xff] }
 0x1d1   : >> { %v1241_v8 = vpop.f32.mrf.mxu1  ;;  %v311_v12 = vld [vmem:[%s2182_s3 + $0x70] sm:$0xff] }
 0x1d2   : >> { %v1439_v1 = vadd.f32 %v1338_v9, %v342_v7  ;;  %v1242_v16 = vadd.f32 %v1241_v8, %v1032_v4 }
 0x1d3   : >> { %1786 = vmatmul.msk.f32.gmra.mxu0 %vm617_vm6, %v2102_v6  ;;  %1819 = vmatmul.msk.f32.gmra.mxu2 %vm683_vm7, %v2102_v6 }
 0x1d4   : >> { %1503 = vst [vmem:[%s2182_s3 + $0x168] sm:$0xff] %v1439_v1  ;;  %v1407_v13 = vadd.f32 %v1242_v16, %v310_v2  ;;  %1850 = vmatmul.msk.f32.gmra.mxu1 %vm618_vm8, %v2102_v6  ;;  %1883 = vmatmul.msk.f32.gmra.mxu3 %vm684_vm9, %v2102_v6  ;;  %v462_v16 = vpop.permute.xlu0 %461 }
 0x1d5   : >> { %vm621_vm14 = vcmp.eq.s32.totalorder %v2595_v5, %v462_v16  ;;  %vm622_vm15 = vcmp.eq.s32.totalorder %v2597_v0, %v462_v16 }
 0x1d6   : >> { %1471 = vst [vmem:[%s2182_s3 + $0x68] sm:$0xff] %v1407_v13  ;;  %v1131_v15 = vpop.f32.mrf.mxu2  ;;  %v344_v13 = vld [vmem:[%s2182_s3 + $0x178] sm:$0xff] }
 0x1d7   : >> { %v1340_v63 = vpop.f32.mrf.mxu3 }
 0x1d8   : >> { %v1341_v7 = vadd.f32 %v1340_v63, %v1131_v15  ;;  %v1035_v14 = vpop.f32.mrf.mxu0 }
 0x1d9   : >> { %v1244_v9 = vpop.f32.mrf.mxu1 }
 0x1da   : >> { %v1440_v4 = vadd.f32 %v1341_v7, %v343_v3  ;;  %v1245_v2 = vadd.f32 %v1244_v9, %v1035_v14  ;;  %v312_v3 = vld [vmem:[%s2182_s3 + $0x78] sm:$0xff] }
 0x1db   : >> { %1787 = vmatmul.msk.f32.gmra.mxu0 %vm619_vm11, %v2102_v6  ;;  %1820 = vmatmul.msk.f32.gmra.mxu2 %vm685_vm10, %v2102_v6 }
 0x1dc   : >> { %1504 = vst [vmem:[%s2182_s3 + $0x170] sm:$0xff] %v1440_v4  ;;  %v1408_v8 = vadd.f32 %v1245_v2, %v311_v12  ;;  %1851 = vmatmul.msk.f32.gmra.mxu1 %vm620_vm13, %v2102_v6  ;;  %1884 = vmatmul.msk.f32.gmra.mxu3 %vm686_vm12, %v2102_v6  ;;  %v345_v4 = vld [vmem:[%s2182_s3 + $0x180] sm:$0xff] }
 0x1de   : >> { %1472 = vst [vmem:[%s2182_s3 + $0x70] sm:$0xff] %v1408_v8  ;;  %v1134_v1 = vpop.f32.mrf.mxu2 }
 0x1df   : >> { %v1343_v10 = vpop.f32.mrf.mxu3 }
 0x1e0   : >> { %v1344_v15 = vadd.f32 %v1343_v10, %v1134_v1  ;;  %v1038_v11 = vpop.f32.mrf.mxu0  ;;  %v313_v1 = vld [vmem:[%s2182_s3 + $0x80] sm:$0xff] }
 0x1e1   : >> { %v1247_v63 = vpop.f32.mrf.mxu1 }
 0x1e2   : >> { %v1441_v7 = vadd.f32 %v1344_v15, %v344_v13  ;;  %v1248_v14 = vadd.f32 %v1247_v63, %v1038_v11  ;;  %v346_v11 = vld [vmem:[%s2182_s3 + $0x188] sm:$0xff] }
 0x1e3   : >> { %1788 = vmatmul.msk.f32.gmra.mxu0 %vm621_vm14, %v2102_v6 }
 0x1e4   : >> { %1505 = vst [vmem:[%s2182_s3 + $0x178] sm:$0xff] %v1441_v7  ;;  %v1409_v12 = vadd.f32 %v1248_v14, %v312_v3  ;;  %1852 = vmatmul.msk.f32.gmra.mxu1 %vm622_vm15, %v2102_v6  ;;  %v314_v7 = vld [vmem:[%s2182_s3 + $0x88] sm:$0xff] }
 0x1e6   : >> { %1473 = vst [vmem:[%s2182_s3 + $0x78] sm:$0xff] %v1409_v12  ;;  %v1137_v9 = vpop.f32.mrf.mxu2 }
 0x1e7   : >> { %v1346_v2 = vpop.f32.mrf.mxu3 }
 0x1e8   : >> { %v1347_v8 = vadd.f32 %v1346_v2, %v1137_v9  ;;  %v1041_v5 = vpop.f32.mrf.mxu0 }
 0x1e9   : >> { %v1250_v13 = vpop.f32.mrf.mxu1 }
 0x1ea   : >> { %v1442_v10 = vadd.f32 %v1347_v8, %v345_v4  ;;  %v1251_v0 = vadd.f32 %v1250_v13, %v1041_v5  ;;  %v347_v8 = vld [vmem:[%s2182_s3 + $0x190] sm:$0xff] }
 0x1ec   : >> { %1506 = vst [vmem:[%s2182_s3 + $0x180] sm:$0xff] %v1442_v10  ;;  %v1410_v16 = vadd.f32 %v1251_v0, %v313_v1  ;;  %v315_v10 = vld [vmem:[%s2182_s3 + $0x90] sm:$0xff] }
 0x1ee   : >> { %1474 = vst [vmem:[%s2182_s3 + $0x80] sm:$0xff] %v1410_v16  ;;  %v1140_v15 = vpop.f32.mrf.mxu2 }
 0x1ef   : >> { %v1349_v6 = vpop.f32.mrf.mxu3 }
 0x1f0   : >> { %v1350_v3 = vadd.f32 %v1349_v6, %v1140_v15  ;;  %v1044_v63 = vpop.f32.mrf.mxu0 }
 0x1f1   : >> { %v1253_v14 = vpop.f32.mrf.mxu1 }
 0x1f2   : >> { %v1443_v12 = vadd.f32 %v1350_v3, %v346_v11  ;;  %v1254_v9 = vadd.f32 %v1253_v14, %v1044_v63  ;;  %v348_v3 = vld [vmem:[%s2182_s3 + $0x198] sm:$0xff] }
 0x1f4   : >> { %1507 = vst [vmem:[%s2182_s3 + $0x188] sm:$0xff] %v1443_v12  ;;  %v1411_v4 = vadd.f32 %v1254_v9, %v314_v7  ;;  %v316_v12 = vld [vmem:[%s2182_s3 + $0x98] sm:$0xff] }
 0x1f6   : >> { %1475 = vst [vmem:[%s2182_s3 + $0x88] sm:$0xff] %v1411_v4  ;;  %v1143_v2 = vpop.f32.mrf.mxu2 }
 0x1f7   : >> { %v1352_v5 = vpop.f32.mrf.mxu3 }
 0x1f8   : >> { %v1353_v1 = vadd.f32 %v1352_v5, %v1143_v2  ;;  %v1047_v13 = vpop.f32.mrf.mxu0 }
 0x1f9   : >> { %v1256_v0 = vpop.f32.mrf.mxu1 }
 0x1fa   : >> { %v1444_v16 = vadd.f32 %v1353_v1, %v347_v8  ;;  %v1257_v15 = vadd.f32 %v1256_v0, %v1047_v13  ;;  %v349_v1 = vld [vmem:[%s2182_s3 + $0x1a0] sm:$0xff] }
 0x1fc   : >> { %1508 = vst [vmem:[%s2182_s3 + $0x190] sm:$0xff] %v1444_v16  ;;  %v1412_v11 = vadd.f32 %v1257_v15, %v315_v10  ;;  %v317_v16 = vld [vmem:[%s2182_s3 + $0xa0] sm:$0xff] }
 0x1fe   : >> { %1476 = vst [vmem:[%s2182_s3 + $0x90] sm:$0xff] %v1412_v11  ;;  %v1146_v6 = vpop.f32.mrf.mxu2 }
 0x1ff   : >> { %v1355_v63 = vpop.f32.mrf.mxu3 }
 0x200   : >> { %v1356_v7 = vadd.f32 %v1355_v63, %v1146_v6  ;;  %v1050_v14 = vpop.f32.mrf.mxu0 }
 0x201   : >> { %v1259_v9 = vpop.f32.mrf.mxu1 }
 0x202   : >> { %v1445_v4 = vadd.f32 %v1356_v7, %v348_v3  ;;  %v1260_v2 = vadd.f32 %v1259_v9, %v1050_v14  ;;  %v350_v7 = vld [vmem:[%s2182_s3 + $0x1a8] sm:$0xff] }
 0x204   : >> { %1509 = vst [vmem:[%s2182_s3 + $0x198] sm:$0xff] %v1445_v4  ;;  %v1413_v8 = vadd.f32 %v1260_v2, %v316_v12  ;;  %v318_v4 = vld [vmem:[%s2182_s3 + $0xa8] sm:$0xff] }
 0x206   : >> { %1477 = vst [vmem:[%s2182_s3 + $0x98] sm:$0xff] %v1413_v8  ;;  %v1149_v5 = vpop.f32.mrf.mxu2 }
 0x207   : >> { %v1358_v13 = vpop.f32.mrf.mxu3 }
 0x208   : >> { %v1359_v10 = vadd.f32 %v1358_v13, %v1149_v5  ;;  %v1053_v0 = vpop.f32.mrf.mxu0 }
 0x209   : >> { %v1262_v15 = vpop.f32.mrf.mxu1 }
 0x20a   : >> { %v1446_v11 = vadd.f32 %v1359_v10, %v349_v1  ;;  %v1263_v6 = vadd.f32 %v1262_v15, %v1053_v0  ;;  %v351_v10 = vld [vmem:[%s2182_s3 + $0x1b0] sm:$0xff] }
 0x20c   : >> { %1510 = vst [vmem:[%s2182_s3 + $0x1a0] sm:$0xff] %v1446_v11  ;;  %v1414_v3 = vadd.f32 %v1263_v6, %v317_v16  ;;  %v319_v11 = vld [vmem:[%s2182_s3 + $0xb0] sm:$0xff] }
 0x20e   : >> { %1478 = vst [vmem:[%s2182_s3 + $0xa0] sm:$0xff] %v1414_v3  ;;  %v1152_v63 = vpop.f32.mrf.mxu2 }
 0x20f   : >> { %v1361_v14 = vpop.f32.mrf.mxu3 }
 0x210   : >> { %v1362_v12 = vadd.f32 %v1361_v14, %v1152_v63  ;;  %v1056_v9 = vpop.f32.mrf.mxu0 }
 0x211   : >> { %v1265_v2 = vpop.f32.mrf.mxu1 }
 0x212   : >> { %v1447_v8 = vadd.f32 %v1362_v12, %v350_v7  ;;  %v1266_v5 = vadd.f32 %v1265_v2, %v1056_v9  ;;  %v352_v12 = vld [vmem:[%s2182_s3 + $0x1b8] sm:$0xff] }
 0x214   : >> { %1511 = vst [vmem:[%s2182_s3 + $0x1a8] sm:$0xff] %v1447_v8  ;;  %v1415_v1 = vadd.f32 %v1266_v5, %v318_v4  ;;  %v320_v8 = vld [vmem:[%s2182_s3 + $0xb8] sm:$0xff] }
 0x216   : >> { %1479 = vst [vmem:[%s2182_s3 + $0xa8] sm:$0xff] %v1415_v1  ;;  %v1155_v13 = vpop.f32.mrf.mxu2 }
 0x217   : >> { %v1364_v0 = vpop.f32.mrf.mxu3 }
 0x218   : >> { %v1365_v16 = vadd.f32 %v1364_v0, %v1155_v13  ;;  %v1059_v15 = vpop.f32.mrf.mxu0 }
 0x219   : >> { %v1268_v6 = vpop.f32.mrf.mxu1 }
 0x21a   : >> { %v1448_v3 = vadd.f32 %v1365_v16, %v351_v10  ;;  %v1269_v63 = vadd.f32 %v1268_v6, %v1059_v15  ;;  %v353_v16 = vld [vmem:[%s2182_s3 + $0x1c0] sm:$0xff] }
 0x21c   : >> { %1512 = vst [vmem:[%s2182_s3 + $0x1b0] sm:$0xff] %v1448_v3  ;;  %v1416_v7 = vadd.f32 %v1269_v63, %v319_v11  ;;  %v321_v3 = vld [vmem:[%s2182_s3 + $0xc0] sm:$0xff] }
 0x21e   : >> { %1480 = vst [vmem:[%s2182_s3 + $0xb0] sm:$0xff] %v1416_v7  ;;  %v1158_v14 = vpop.f32.mrf.mxu2 }
 0x21f   : >> { %v1367_v9 = vpop.f32.mrf.mxu3 }
 0x220   : >> { %v1368_v4 = vadd.f32 %v1367_v9, %v1158_v14  ;;  %v1062_v2 = vpop.f32.mrf.mxu0 }
 0x221   : >> { %v1271_v5 = vpop.f32.mrf.mxu1 }
 0x222   : >> { %v1449_v1 = vadd.f32 %v1368_v4, %v352_v12  ;;  %v1272_v13 = vadd.f32 %v1271_v5, %v1062_v2  ;;  %v354_v4 = vld [vmem:[%s2182_s3 + $0x1c8] sm:$0xff] }
 0x224   : >> { %1513 = vst [vmem:[%s2182_s3 + $0x1b8] sm:$0xff] %v1449_v1  ;;  %v1417_v10 = vadd.f32 %v1272_v13, %v320_v8  ;;  %v322_v1 = vld [vmem:[%s2182_s3 + $0xc8] sm:$0xff] }
 0x226   : >> { %1481 = vst [vmem:[%s2182_s3 + $0xb8] sm:$0xff] %v1417_v10  ;;  %v1161_v0 = vpop.f32.mrf.mxu2 }
 0x227   : >> { %v1370_v15 = vpop.f32.mrf.mxu3 }
 0x228   : >> { %v1371_v11 = vadd.f32 %v1370_v15, %v1161_v0  ;;  %v1065_v6 = vpop.f32.mrf.mxu0 }
 0x229   : >> { %v1274_v63 = vpop.f32.mrf.mxu1 }
 0x22a   : >> { %v1450_v7 = vadd.f32 %v1371_v11, %v353_v16  ;;  %v1275_v14 = vadd.f32 %v1274_v63, %v1065_v6  ;;  %v355_v11 = vld [vmem:[%s2182_s3 + $0x1d0] sm:$0xff] }
 0x22c   : >> { %1514 = vst [vmem:[%s2182_s3 + $0x1c0] sm:$0xff] %v1450_v7  ;;  %v1418_v12 = vadd.f32 %v1275_v14, %v321_v3  ;;  %v323_v7 = vld [vmem:[%s2182_s3 + $0xd0] sm:$0xff] }
 0x22e   : >> { %1482 = vst [vmem:[%s2182_s3 + $0xc0] sm:$0xff] %v1418_v12  ;;  %v1164_v9 = vpop.f32.mrf.mxu2 }
 0x22f   : >> { %v1373_v2 = vpop.f32.mrf.mxu3 }
 0x230   : >> { %v1374_v8 = vadd.f32 %v1373_v2, %v1164_v9  ;;  %v1068_v5 = vpop.f32.mrf.mxu0 }
 0x231   : >> { %v1277_v13 = vpop.f32.mrf.mxu1 }
 0x232   : >> { %v1451_v10 = vadd.f32 %v1374_v8, %v354_v4  ;;  %v1278_v0 = vadd.f32 %v1277_v13, %v1068_v5  ;;  %v356_v8 = vld [vmem:[%s2182_s3 + $0x1d8] sm:$0xff] }
 0x234   : >> { %1515 = vst [vmem:[%s2182_s3 + $0x1c8] sm:$0xff] %v1451_v10  ;;  %v1419_v16 = vadd.f32 %v1278_v0, %v322_v1  ;;  %v324_v10 = vld [vmem:[%s2182_s3 + $0xd8] sm:$0xff] }
 0x236   : >> { %1483 = vst [vmem:[%s2182_s3 + $0xc8] sm:$0xff] %v1419_v16  ;;  %v1167_v15 = vpop.f32.mrf.mxu2 }
 0x237   : >> { %v1376_v6 = vpop.f32.mrf.mxu3 }
 0x238   : >> { %v1377_v3 = vadd.f32 %v1376_v6, %v1167_v15  ;;  %v1071_v63 = vpop.f32.mrf.mxu0 }
 0x239   : >> { %v1280_v14 = vpop.f32.mrf.mxu1 }
 0x23a   : >> { %v1452_v12 = vadd.f32 %v1377_v3, %v355_v11  ;;  %v1281_v9 = vadd.f32 %v1280_v14, %v1071_v63  ;;  %v357_v3 = vld [vmem:[%s2182_s3 + $0x1e0] sm:$0xff] }
 0x23c   : >> { %1516 = vst [vmem:[%s2182_s3 + $0x1d0] sm:$0xff] %v1452_v12  ;;  %v1420_v4 = vadd.f32 %v1281_v9, %v323_v7  ;;  %v325_v12 = vld [vmem:[%s2182_s3 + $0xe0] sm:$0xff] }
 0x23e   : >> { %1484 = vst [vmem:[%s2182_s3 + $0xd0] sm:$0xff] %v1420_v4  ;;  %v1170_v2 = vpop.f32.mrf.mxu2 }
 0x23f   : >> { %v1379_v5 = vpop.f32.mrf.mxu3 }
 0x240   : >> { %v1380_v1 = vadd.f32 %v1379_v5, %v1170_v2  ;;  %v1074_v13 = vpop.f32.mrf.mxu0 }
 0x241   : >> { %v1283_v0 = vpop.f32.mrf.mxu1 }
 0x242   : >> { %v1453_v16 = vadd.f32 %v1380_v1, %v356_v8  ;;  %v1284_v15 = vadd.f32 %v1283_v0, %v1074_v13  ;;  %v358_v1 = vld [vmem:[%s2182_s3 + $0x1e8] sm:$0xff] }
 0x244   : >> { %1517 = vst [vmem:[%s2182_s3 + $0x1d8] sm:$0xff] %v1453_v16  ;;  %v1421_v11 = vadd.f32 %v1284_v15, %v324_v10  ;;  %v326_v16 = vld [vmem:[%s2182_s3 + $0xe8] sm:$0xff] }
 0x246   : >> { %1485 = vst [vmem:[%s2182_s3 + $0xd8] sm:$0xff] %v1421_v11  ;;  %v1173_v6 = vpop.f32.mrf.mxu2 }
 0x247   : >> { %v1382_v63 = vpop.f32.mrf.mxu3 }
 0x248   : >> { %v1383_v7 = vadd.f32 %v1382_v63, %v1173_v6  ;;  %v1077_v14 = vpop.f32.mrf.mxu0 }
 0x249   : >> { %v1286_v9 = vpop.f32.mrf.mxu1 }
 0x24a   : >> { %v1454_v4 = vadd.f32 %v1383_v7, %v357_v3  ;;  %v1287_v2 = vadd.f32 %v1286_v9, %v1077_v14  ;;  %v359_v7 = vld [vmem:[%s2182_s3 + $0x1f0] sm:$0xff] }
 0x24c   : >> { %1518 = vst [vmem:[%s2182_s3 + $0x1e0] sm:$0xff] %v1454_v4  ;;  %v1422_v8 = vadd.f32 %v1287_v2, %v325_v12  ;;  %v327_v4 = vld [vmem:[%s2182_s3 + $0xf0] sm:$0xff] }
 0x24e   : >> { %1486 = vst [vmem:[%s2182_s3 + $0xe0] sm:$0xff] %v1422_v8  ;;  %v1176_v5 = vpop.f32.mrf.mxu2 }
 0x24f   : >> { %v1385_v13 = vpop.f32.mrf.mxu3 }
 0x250   : >> { %v1386_v10 = vadd.f32 %v1385_v13, %v1176_v5  ;;  %v1080_v0 = vpop.f32.mrf.mxu0 }
 0x251   : >> { %v1289_v15 = vpop.f32.mrf.mxu1 }
 0x252   : >> { %v1455_v11 = vadd.f32 %v1386_v10, %v358_v1  ;;  %v1290_v6 = vadd.f32 %v1289_v15, %v1080_v0  ;;  %v360_v10 = vld [vmem:[%s2182_s3 + $0x1f8] sm:$0xff] }
 0x254   : >> { %1519 = vst [vmem:[%s2182_s3 + $0x1e8] sm:$0xff] %v1455_v11  ;;  %v1423_v3 = vadd.f32 %v1290_v6, %v326_v16  ;;  %v328_v11 = vld [vmem:[%s2182_s3 + $0xf8] sm:$0xff] }
 0x256   : >> { %1487 = vst [vmem:[%s2182_s3 + $0xe8] sm:$0xff] %v1423_v3  ;;  %v1179_v63 = vpop.f32.mrf.mxu2 }
 0x257   : >> { %v1388_v14 = vpop.f32.mrf.mxu3 }
 0x258   : >> { %v1389_v12 = vadd.f32 %v1388_v14, %v1179_v63  ;;  %v1083_v9 = vpop.f32.mrf.mxu0 }
 0x259   : >> { %v1292_v2 = vpop.f32.mrf.mxu1 }
 0x25a   : >> { %v1456_v8 = vadd.f32 %v1389_v12, %v359_v7  ;;  %v1293_v5 = vadd.f32 %v1292_v2, %v1083_v9 }
 0x25c   : >> { %1520 = vst [vmem:[%s2182_s3 + $0x1f0] sm:$0xff] %v1456_v8  ;;  %v1424_v1 = vadd.f32 %v1293_v5, %v327_v4 }
 0x25e   : >> { %1488 = vst [vmem:[%s2182_s3 + $0xf0] sm:$0xff] %v1424_v1  ;;  %v1182_v13 = vpop.f32.mrf.mxu2 }
 0x25f   : >> { %v1391_v0 = vpop.f32.mrf.mxu3 }
 0x260   : >> { %v1392_v16 = vadd.f32 %v1391_v0, %v1182_v13  ;;  %v1086_v15 = vpop.f32.mrf.mxu0 }
 0x261   : >> { %v1295_v6 = vpop.f32.mrf.mxu1 }
 0x262   : >> { %v1457_v3 = vadd.f32 %v1392_v16, %v360_v10  ;;  %v1296_v17 = vadd.f32 %v1295_v6, %v1086_v15  ;;  %294 = sbr.rel (!%p292_p0) target bundleno = 108 (0x6c), region = 76 }
 0x264   : >> { %1521 = vst [vmem:[%s2182_s3 + $0x1f8] sm:$0xff] %v1457_v3  ;;  %v1425_v63 = vadd.f32 %v1296_v17, %v328_v11 }
 0x266   : >> { %1489 = vst [vmem:[%s2182_s3 + $0xf8] sm:$0xff] %v1425_v63 }
 0x267   : > { %2048 = shalt.err (!%p2045_p9)
}
 0x268   : > { %s2103_s29 = smov 128   ;;  %s2104_s3 = smov 8  }
 0x269   : > { %1927 = dma.vmem_to_hbm [thread:$0]  (%p2158_p5), %s1536_s24, 8192, %s1538_s25, %s1523_s26, %s2103_s29, %s2103_s29, %s2104_s3  }
 0x26a PF: > { %p1939_p10 = scmp.ge.s32.totalorder %s2091_s12, 2  ;;  %s1552_s7 = sand.u32 1, %s2079_s9  }
 0x26b   : > { %s1553_s8 = scalar_lea.sflag [#allocation4], %s1552_s7 }
 0x26c   : > { %p1934_p11 = pnand %p1939_p10, %p2162_p6 }
 0x26e   : > { %p1935_p12 = pneg %p1934_p11 }
 0x270   : > { %2074 = dma.done.wait (%p1935_p12), %s1553_s8, 8192  }
 0x271   : > { %2076 = vsyncadd (%p1935_p12), %s1553_s8, 4294959104  ;;  %p13_p13 = scmp.ge.s32.totalorder %s2145_s15, 4   ;;  %s3085_s9 = smov %s2083_s10 }
 0x272   : > { %s3086_s10 = smov %s2087_s11  ;;  %s3087_s11 = smov %s2156_s18 }
 0x273   : > { %s3088_s12 = smov %s2145_s15  ;;  %15 = sbr.rel (!%p13_p13) target bundleno = 4 (0x4), region = 87 }
 0x278   :  { %1559 = vsyncpa [#allocation3], 1 }
 0x279   :  { %1561 = vsyncpa [#allocation3 + $0x1], 1 }
 0x27a   :  { %1562 = vsyncpa [#allocation4], 1 }
 0x27b   :  { %1564 = vsyncpa [#allocation4 + $0x1], 1 }

</bundles_post_ra>
